<compile_context>
chip_gen: v6e
topology: v6e:2x2x1
jax: 0.10.0
libtpu: 0.0.40
codegen_flags: <defaults>
</compile_context>

<pallas_src>
import math
import functools

import numpy as np
import jax
import jax.numpy as jnp
from jax import lax
from jax.experimental import pallas as pl
from jax.experimental.pallas import tpu as pltpu

# ---------------- KAN (fixed cubic B-spline) configuration ----------------
GRID_SIZE = 5
SPLINE_ORDER = 3
NUM_BASIS = GRID_SIZE + SPLINE_ORDER          # 8 basis functions per feature

_VMEM_LIMIT = 32 * 1024 * 1024


# ------------------------------ tiling helpers ------------------------------
def _tile_rows(n, target=1024):
    """Largest multiple-of-8 row tile that divides n, <= target, >= 2 steps."""
    cap = min(target, n // 2) if n >= 16 else n
    cap -= cap % 8
    if cap >= 8:
        for t in range(cap, 0, -8):
            if n % t == 0:
                return t
    return n


def _tile_cols(v, target=2048):
    """Vocab (lane) tile: multiple of 128 dividing v, <= target, else full v."""
    if v <= target or v % 128 != 0:
        return v
    for t in range(target - target % 128, 127, -128):
        if v % t == 0:
            return t
    return v


# ----------------------------- kernel helpers -------------------------------
def _bspline_basis(x):
    """Closed-form uniform cubic B-spline basis (NUM_BASIS functions) on [-1,1).

    Uses segment index + local fraction with the 4 nonzero cubic blending
    weights, selected into the 8 basis slots (equivalent to Cox-de Boor on the
    extended uniform knot vector, zero outside [-1, 1)).
    """
    inv_h = GRID_SIZE / 2.0
    y = jnp.clip((x + 1.0) * inv_h, 0.0, float(GRID_SIZE))
    s = jnp.clip(jnp.floor(y), 0.0, float(GRID_SIZE - 1))     # segment index
    u = y - s                                                  # local fraction
    in_grid = jnp.logical_and(x >= -1.0, x < 1.0).astype(jnp.float32)

    u2 = u * u
    u3 = u2 * u
    omu = 1.0 - u
    w = (
        (omu * omu * omu) * (1.0 / 6.0) * in_grid,             # B_s
        (0.5 * u3 - u2 + (2.0 / 3.0)) * in_grid,               # B_{s+1}
        (-0.5 * u3 + 0.5 * u2 + 0.5 * u + (1.0 / 6.0)) * in_grid,  # B_{s+2}
        u3 * (1.0 / 6.0) * in_grid,                            # B_{s+3}
    )

    basis = []
    for i in range(NUM_BASIS):
        acc = None
        for j in range(SPLINE_ORDER + 1):
            seg = i - j
            if 0 <= seg <= GRID_SIZE - 1:
                term = jnp.where(s == float(seg), w[j], 0.0)
                acc = term if acc is None else acc + term
        basis.append(acc)
    return basis


def _kan_features(x):
    """Concatenated [silu(x) | B_0(x) | ... | B_7(x)] -> (rows, 9*D) bf16."""
    base = x * jax.nn.sigmoid(x)
    basis = _bspline_basis(x)
    return jnp.concatenate([base] + basis, axis=-1).astype(jnp.bfloat16)


def _add_layernorm(x, y, gamma, beta):
    """LayerNorm(x + y) over last dim (eps = 1e-5, biased variance)."""
    z = x + y
    mu = jnp.mean(z, axis=-1, keepdims=True)
    c = z - mu
    var = jnp.mean(c * c, axis=-1, keepdims=True)
    return c * lax.rsqrt(var + 1e-5) * gamma + beta


# ------------------------------ Pallas kernels -------------------------------
def encoder_layer_kernel(x_ref, bias_ref, sel_ref, emb_ref,
                         wq_ref, wk_ref, wv_ref, wo_ref,
                         g1_ref, be1_ref,
                         w1_ref, b1_ref, w2_ref, b2_ref,
                         g2_ref, be2_ref,
                         y_ref, *, num_heads, scale):
    """One full EncoderLayer for one batch element, entirely in VMEM."""
    x = x_ref[0].astype(jnp.float32)                    # (L, D)
    L, D = x.shape
    H = num_heads
    Dh = D // H

    # ---- KAN Q / K / V (shared basis features, three MXU dots, K = 9*D) ----
    feats = _kan_features(x)                             # (L, 9D) bf16
    q2d = jnp.dot(feats, wq_ref[...], preferred_element_type=jnp.float32)
    k2d = jnp.dot(feats, wk_ref[...], preferred_element_type=jnp.float32)
    v2d = jnp.dot(feats, wv_ref[...], preferred_element_type=jnp.float32)

    # torch's `.view(B, H, L, Dh)` flat head split, via 0/1 selection matmuls
    # (row r of the stacked (H*L, Dh) result is q2d[r // H, (r % H)*Dh + j]).
    def to_heads(z2d):
        stack = None
        for b in range(H):
            zb = z2d[:, b * Dh:(b + 1) * Dh]             # (L, Dh)
            contrib = jnp.dot(sel_ref[b], zb,
                              preferred_element_type=jnp.float32)  # (H*L, Dh)
            stack = contrib if stack is None else stack + contrib
        return stack.reshape(H, L, Dh)

    q3 = to_heads(q2d)
    k3 = to_heads(k2d)
    v3 = to_heads(v2d)

    # ---- scaled dot-product attention, all heads at once ----
    s = jnp.einsum('hld,hmd->hlm', q3, k3,
                   preferred_element_type=jnp.float32) * scale     # (H, L, L)
    s = s + bias_ref[...]                                # (1, 1, L) mask bias
    s = s - jnp.max(s, axis=-1, keepdims=True)
    e = jnp.exp(s)
    p = e / jnp.sum(e, axis=-1, keepdims=True)           # exact divide
    o3 = jnp.einsum('hlm,hmd->hld', p, v3,
                    preferred_element_type=jnp.float32)  # (H, L, Dh)

    # torch's `.transpose(1, 2).contiguous().view(B, L, D)` head re-interleave
    attn2d = None
    for h in range(H):
        contrib = jnp.dot(o3[h], emb_ref[h],
                          preferred_element_type=jnp.float32)      # (L, D)
        attn2d = contrib if attn2d is None else attn2d + contrib

    # ---- KAN O-projection + add & LayerNorm #1 ----
    feats_o = _kan_features(attn2d)
    attn_out = jnp.dot(feats_o, wo_ref[...],
                       preferred_element_type=jnp.float32)         # (L, D)
    add_norm = _add_layernorm(x, attn_out, g1_ref[...], be1_ref[...])

    # ---- FeedForward (consumes attn_out, per the reference) + add & LN #2 ---
    h1 = jnp.dot(attn_out.astype(jnp.bfloat16), w1_ref[...],
                 preferred_element_type=jnp.float32) + b1_ref[...]
    h1 = jnp.maximum(h1, 0.0)
    ff = jnp.dot(h1.astype(jnp.bfloat16), w2_ref[...],
                 preferred_element_type=jnp.float32) + b2_ref[...]
    y = _add_layernorm(add_norm, ff, g2_ref[...], be2_ref[...])
    y_ref[0] = y.astype(y_ref.dtype)


def gen_lse_kernel(x_ref, w_ref, b_ref, lse_ref, m_sc, s_sc):
    """Pass 1 of GeneratorOutput: online log-sum-exp over vocab tiles."""
    j = pl.program_id(1)
    logits = jnp.dot(x_ref[...], w_ref[...],
                     preferred_element_type=jnp.float32) + b_ref[...]

    @pl.when(j == 0)
    def _():
        m_sc[...] = jnp.full_like(m_sc, -jnp.inf)
        s_sc[...] = jnp.zeros_like(s_sc)

    m_prev = m_sc[...]
    m_new = jnp.maximum(m_prev, jnp.max(logits, axis=-1, keepdims=True))
    s_sc[...] = (s_sc[...] * jnp.exp(m_prev - m_new)
                 + jnp.sum(jnp.exp(logits - m_new), axis=-1, keepdims=True))
    m_sc[...] = m_new

    @pl.when(j == pl.num_programs(1) - 1)
    def _():
        lse_ref[...] = m_sc[...] + jnp.log(s_sc[...])


def gen_out_kernel(x_ref, w_ref, b_ref, lse_ref, o_ref):
    """Pass 2 of GeneratorOutput: log_softmax tile = logits - lse."""
    logits = jnp.dot(x_ref[...], w_ref[...],
                     preferred_element_type=jnp.float32) + b_ref[...]
    o_ref[...] = logits - lse_ref[...]


# -------------------------------- wrappers -----------------------------------
def encoder_layer_apply(x, bias3, sel, emb, lp, *, num_heads, scale):
    B, L, D = x.shape
    F = lp["w1"].shape[1]
    nine_d = lp["w_q"].shape[0]
    H = num_heads
    Dh = D // H
    full2 = lambda b: (0, 0)
    full3 = lambda b: (0, 0, 0)
    return pl.pallas_call(
        functools.partial(encoder_layer_kernel, num_heads=H, scale=scale),
        out_shape=jax.ShapeDtypeStruct((B, L, D), jnp.bfloat16),
        grid=(B,),
        in_specs=[
            pl.BlockSpec((1, L, D), lambda b: (b, 0, 0)),      # x
            pl.BlockSpec((1, 1, L), lambda b: (b, 0, 0)),      # mask bias
            pl.BlockSpec((H, H * L, L), full3),                # head-split sel
            pl.BlockSpec((H, Dh, D), full3),                   # head re-embed
            pl.BlockSpec((nine_d, D), full2),                  # w_q
            pl.BlockSpec((nine_d, D), full2),                  # w_k
            pl.BlockSpec((nine_d, D), full2),                  # w_v
            pl.BlockSpec((nine_d, D), full2),                  # w_o
            pl.BlockSpec((1, D), full2),                       # g1
            pl.BlockSpec((1, D), full2),                       # be1
            pl.BlockSpec((D, F), full2),                       # w1
            pl.BlockSpec((1, F), full2),                       # b1
            pl.BlockSpec((F, D), full2),                       # w2
            pl.BlockSpec((1, D), full2),                       # b2
            pl.BlockSpec((1, D), full2),                       # g2
            pl.BlockSpec((1, D), full2),                       # be2
        ],
        out_specs=pl.BlockSpec((1, L, D), lambda b: (b, 0, 0)),
        compiler_params=pltpu.CompilerParams(
            dimension_semantics=("parallel",),
            vmem_limit_bytes=_VMEM_LIMIT),
    )(x, bias3, sel, emb, lp["w_q"], lp["w_k"], lp["w_v"], lp["w_o"],
      lp["g1"], lp["be1"], lp["w1"], lp["b1"], lp["w2"], lp["b2"],
      lp["g2"], lp["be2"])


def generator_apply(x2d, w, b):
    """Vocab-tiled linear + log_softmax (two passes: online LSE, then write)."""
    n, d = x2d.shape
    v = w.shape[1]
    tm = _tile_rows(n)
    tv = _tile_cols(v)
    grid = (n // tm, v // tv)
    row_spec = pl.BlockSpec((tm, d), lambda i, j: (i, 0))
    w_spec = pl.BlockSpec((d, tv), lambda i, j: (0, j))
    b_spec = pl.BlockSpec((1, tv), lambda i, j: (0, j))
    lse_spec = pl.BlockSpec((tm, 1), lambda i, j: (i, 0))

    lse = pl.pallas_call(
        gen_lse_kernel,
        out_shape=jax.ShapeDtypeStruct((n, 1), jnp.float32),
        grid=grid,
        in_specs=[row_spec, w_spec, b_spec],
        out_specs=lse_spec,
        scratch_shapes=[pltpu.VMEM((tm, 1), jnp.float32),
                        pltpu.VMEM((tm, 1), jnp.float32)],
        compiler_params=pltpu.CompilerParams(
            dimension_semantics=("parallel", "arbitrary"),
            vmem_limit_bytes=_VMEM_LIMIT),
    )(x2d, w, b)

    return pl.pallas_call(
        gen_out_kernel,
        out_shape=jax.ShapeDtypeStruct((n, v), jnp.float32),
        grid=grid,
        in_specs=[row_spec, w_spec, b_spec, lse_spec],
        out_specs=pl.BlockSpec((tm, tv), lambda i, j: (i, j)),
        compiler_params=pltpu.CompilerParams(
            dimension_semantics=("parallel", "arbitrary"),
            vmem_limit_bytes=_VMEM_LIMIT),
    )(x2d, w, b, lse)


# ------------------------------- parameters ----------------------------------
def init_params(key, *, vocab_size, embedding_dim, vocab_type_size, hidden_dim,
                num_heads, ff_dim, num_layers, max_pos_embedding):
    assert embedding_dim == hidden_dim, "encoder dim must match embedding dim"
    assert hidden_dim % num_heads == 0
    D, F, V = hidden_dim, ff_dim, vocab_size
    keys = iter(jax.random.split(key, 4 + num_layers * 10))

    def nrm(shape, scale=0.02, dtype=jnp.float32):
        return (jax.random.normal(next(keys), shape, jnp.float32)
                * scale).astype(dtype)

    def kan_w(out_dim):
        # stacked [Wbase ; Wspline] -> ((NUM_BASIS+1)*D, out_dim) bf16
        wb = jax.random.normal(next(keys), (D, out_dim),
                               jnp.float32) / math.sqrt(D)
        ws = (jax.random.normal(next(keys), (NUM_BASIS, D, out_dim),
                                jnp.float32) * (0.1 / math.sqrt(D)))
        return jnp.concatenate(
            [wb, ws.reshape(NUM_BASIS * D, out_dim)], axis=0
        ).astype(jnp.bfloat16)

    params = dict(
        tok_emb=nrm((V, D)),
        pos_emb=nrm((max_pos_embedding, D)),
        typ_emb=nrm((vocab_type_size, D)),
        gen_w=nrm((D, V), 1.0 / math.sqrt(D), jnp.bfloat16),
        gen_b=jnp.zeros((1, V), jnp.float32),
        layers=[],
    )
    for _ in range(num_layers):
        params["layers"].append(dict(
            w_q=kan_w(D), w_k=kan_w(D), w_v=kan_w(D), w_o=kan_w(D),
            w1=nrm((D, F), 1.0 / math.sqrt(D), jnp.bfloat16),
            b1=jnp.zeros((1, F), jnp.float32),
            w2=nrm((F, D), 1.0 / math.sqrt(F), jnp.bfloat16),
            b2=jnp.zeros((1, D), jnp.float32),
            g1=jnp.ones((1, D), jnp.float32),
            be1=jnp.zeros((1, D), jnp.float32),
            g2=jnp.ones((1, D), jnp.float32),
            be2=jnp.zeros((1, D), jnp.float32),
        ))
    return params


# -------------------------------- forward ------------------------------------
def electra_generator_forward(params, input_ids, attention_mask, token_type_ids,
                              *, num_heads):
    B, L = input_ids.shape
    D = params["tok_emb"].shape[1]
    H = num_heads
    Dh = D // H
    scale = 1.0 / math.sqrt(Dh)

    # InputEmbedding (gathers are glue, kept in plain JAX); bf16 activations
    tok = jnp.take(params["tok_emb"], input_ids, axis=0)
    pos_ids = jnp.broadcast_to(jnp.arange(L, dtype=jnp.int32)[None, :], (B, L))
    pos = jnp.take(params["pos_emb"], pos_ids, axis=0)
    typ = jnp.take(params["typ_emb"], token_type_ids, axis=0)
    x = (tok + pos + typ).astype(jnp.bfloat16)                      # (B, L, D)

    # additive attention bias (masks the key axis, as in the reference)
    bias3 = jnp.where(attention_mask == 0, -1e9, 0.0).astype(
        jnp.float32).reshape(B, 1, L)

    # constant 0/1 operands implementing torch's flat `.view(B,H,L,Dh)` split
    # and the `.transpose(1,2).view(B,L,D)` re-interleave (no in-kernel
    # minor-dim reshapes needed).
    r = np.arange(H * L)
    sel_np = np.zeros((H, H * L, L), np.float32)
    sel_np[r % H, r, r // H] = 1.0
    emb_np = np.zeros((H, Dh, D), np.float32)
    jj = np.arange(Dh)
    for h in range(H):
        emb_np[h, jj, h * Dh + jj] = 1.0
    sel = jnp.asarray(sel_np)
    emb = jnp.asarray(emb_np)

    for lp in params["layers"]:
        x = encoder_layer_apply(x, bias3, sel, emb, lp,
                                num_heads=H, scale=scale)

    # GeneratorOutput: linear + log_softmax (vocab-tiled, two passes)
    logp = generator_apply(x.reshape(B * L, D), params["gen_w"],
                           params["gen_b"])
    return logp.reshape(B, L, -1)


# ---------------------------------- main --------------------------------------
if __name__ == "__main__":
    vocab_size = 128
    embedding_dim = 64
    vocab_type_size = 2
    hidden_dim = 64
    num_heads = 4
    ff_dim = 128
    num_layers = 2
    max_pos_embedding = 16
    B, L = 2, 16

    key = jax.random.PRNGKey(0)
    k_ids, k_typ, k_par = jax.random.split(key, 3)
    input_ids = jax.random.randint(k_ids, (B, L), 0, vocab_size, dtype=jnp.int32)
    token_type_ids = jax.random.randint(k_typ, (B, L), 0, vocab_type_size,
                                        dtype=jnp.int32)
    attention_mask = jnp.concatenate(
        [jnp.ones((B, L - 4), jnp.int32), jnp.zeros((B, 4), jnp.int32)], axis=1)

    params = init_params(
        k_par, vocab_size=vocab_size, embedding_dim=embedding_dim,
        vocab_type_size=vocab_type_size, hidden_dim=hidden_dim,
        num_heads=num_heads, ff_dim=ff_dim, num_layers=num_layers,
        max_pos_embedding=max_pos_embedding)

    fwd = jax.jit(functools.partial(electra_generator_forward,
                                    num_heads=num_heads))
    out = fwd(params, input_ids, attention_mask, token_type_ids)
    jax.block_until_ready(out)

    assert out.shape == (B, L, vocab_size), out.shape
    assert bool(jnp.all(jnp.isfinite(out)))
    # log-softmax rows must exponentiate-sum to ~1
    assert bool(jnp.allclose(jnp.sum(jnp.exp(out), axis=-1), 1.0, atol=1e-4))
    print("KERNEL_OK")
</pallas_src>

<mosaic_0001>
module attributes {stable_mosaic.version = 11 : i64} {
  func.func @gen_lse_kernel(%arg0: i32, %arg1: i32, %arg2: memref<16x64xbf16, #tpu.memory_space<vmem>>, %arg3: memref<64x128xbf16, #tpu.memory_space<vmem>>, %arg4: memref<1x128xf32, #tpu.memory_space<vmem>>, %arg5: memref<16x1xf32, #tpu.memory_space<vmem>>, %arg6: memref<16x1xf32, #tpu.memory_space<vmem>>, %arg7: memref<16x1xf32, #tpu.memory_space<vmem>>) attributes {dimension_semantics = [#tpu.dimension_semantics<parallel>, #tpu.dimension_semantics<arbitrary>], iteration_bounds = array<i64: 2, 1>, scalar_prefetch = 0 : i64, scratch_operands = 2 : i64, tpu.core_type = #tpu.core_type<tc>, window_params = [{transform_indices = @transform_0, window_bounds = array<i64: 16, 64>}, {transform_indices = @transform_1, window_bounds = array<i64: 64, 128>}, {transform_indices = @transform_2, window_bounds = array<i64: 1, 128>}, {transform_indices = @transform_3, window_bounds = array<i64: 16, 1>}]} {
    %c0 = arith.constant 0 : index
    %c0_0 = arith.constant 0 : index
    %0 = vector.load %arg2[%c0, %c0_0] : memref<16x64xbf16, #tpu.memory_space<vmem>>, vector<16x64xbf16>
    %c0_1 = arith.constant 0 : index
    %c0_2 = arith.constant 0 : index
    %1 = vector.load %arg3[%c0_1, %c0_2] : memref<64x128xbf16, #tpu.memory_space<vmem>>, vector<64x128xbf16>
    %cst = arith.constant dense<0.000000e+00> : vector<16x128xf32>
    %2 = tpu.matmul %0, %1, %cst {dimension_numbers = #tpu.dot_dimension_numbers<[1], [0], [0], [1], [0, 0, 1, 1], [], []>} : vector<16x64xbf16>, vector<64x128xbf16>, vector<16x128xf32> -> vector<16x128xf32>
    %c0_3 = arith.constant 0 : index
    %c0_4 = arith.constant 0 : index
    %3 = vector.load %arg4[%c0_3, %c0_4] : memref<1x128xf32, #tpu.memory_space<vmem>>, vector<1x128xf32>
    %4 = vector.broadcast %3 : vector<1x128xf32> to vector<16x128xf32>
    %5 = arith.addf %2, %4 : vector<16x128xf32>
    %c0_i32 = arith.constant 0 : i32
    %6 = arith.cmpi eq, %arg1, %c0_i32 : i32
    %7 = arith.extui %6 : i1 to i32
    %c0_i32_5 = arith.constant 0 : i32
    %8 = arith.cmpi ne, %7, %c0_i32_5 : i32
    scf.if %8 {
      %cst_18 = arith.constant 0xFF800000 : f32
      %28 = vector.broadcast %cst_18 : f32 to vector<16x1xf32>
      %c0_19 = arith.constant 0 : index
      %c0_20 = arith.constant 0 : index
      %29 = vector.load %arg6[%c0_19, %c0_20] : memref<16x1xf32, #tpu.memory_space<vmem>>, vector<16x1xf32>
      tpu.vector_store %arg6[%c0_19, %c0_20], %28 {strides = array<i32>} : memref<16x1xf32, #tpu.memory_space<vmem>>, vector<16x1xf32>,
      %cst_21 = arith.constant 0.000000e+00 : f32
      %30 = vector.broadcast %cst_21 : f32 to vector<16x1xf32>
      %c0_22 = arith.constant 0 : index
      %c0_23 = arith.constant 0 : index
      %31 = vector.load %arg7[%c0_22, %c0_23] : memref<16x1xf32, #tpu.memory_space<vmem>>, vector<16x1xf32>
      tpu.vector_store %arg7[%c0_22, %c0_23], %30 {strides = array<i32>} : memref<16x1xf32, #tpu.memory_space<vmem>>, vector<16x1xf32>,
    } else {
    }
    %c0_6 = arith.constant 0 : index
    %c0_7 = arith.constant 0 : index
    %9 = vector.load %arg6[%c0_6, %c0_7] : memref<16x1xf32, #tpu.memory_space<vmem>>, vector<16x1xf32>
    %cst_8 = arith.constant dense<0xFF800000> : vector<16xf32>
    %10 = vector.multi_reduction <maximumf>, %5, %cst_8 [1] : vector<16x128xf32> to vector<16xf32>
    %11 = vector.shape_cast %10 : vector<16xf32> to vector<16x1xf32>
    %12 = arith.maximumf %9, %11 : vector<16x1xf32>
    %c0_9 = arith.constant 0 : index
    %c0_10 = arith.constant 0 : index
    %13 = vector.load %arg7[%c0_9, %c0_10] : memref<16x1xf32, #tpu.memory_space<vmem>>, vector<16x1xf32>
    %14 = arith.subf %9, %12 : vector<16x1xf32>
    %15 = math.exp %14 : vector<16x1xf32>
    %16 = arith.mulf %13, %15 : vector<16x1xf32>
    %17 = vector.broadcast %12 : vector<16x1xf32> to vector<16x128xf32>
    %18 = arith.subf %5, %17 : vector<16x128xf32>
    %19 = math.exp %18 : vector<16x128xf32>
    %cst_11 = arith.constant dense<0.000000e+00> : vector<16xf32>
    %20 = vector.multi_reduction <add>, %19, %cst_11 [1] : vector<16x128xf32> to vector<16xf32>
    %21 = vector.shape_cast %20 : vector<16xf32> to vector<16x1xf32>
    %22 = arith.addf %16, %21 : vector<16x1xf32>
    %c0_12 = arith.constant 0 : index
    %c0_13 = arith.constant 0 : index
    %23 = vector.load %arg7[%c0_12, %c0_13] : memref<16x1xf32, #tpu.memory_space<vmem>>, vector<16x1xf32>
    tpu.vector_store %arg7[%c0_12, %c0_13], %22 {strides = array<i32>} : memref<16x1xf32, #tpu.memory_space<vmem>>, vector<16x1xf32>,
    %c0_14 = arith.constant 0 : index
    %c0_15 = arith.constant 0 : index
    %24 = vector.load %arg6[%c0_14, %c0_15] : memref<16x1xf32, #tpu.memory_space<vmem>>, vector<16x1xf32>
    tpu.vector_store %arg6[%c0_14, %c0_15], %12 {strides = array<i32>} : memref<16x1xf32, #tpu.memory_space<vmem>>, vector<16x1xf32>,
    %c0_i32_16 = arith.constant 0 : i32
    %25 = arith.cmpi eq, %arg1, %c0_i32_16 : i32
    %26 = arith.extui %25 : i1 to i32
    %c0_i32_17 = arith.constant 0 : i32
    %27 = arith.cmpi ne, %26, %c0_i32_17 : i32
    scf.if %27 {
      %c0_18 = arith.constant 0 : index
      %c0_19 = arith.constant 0 : index
      %28 = vector.load %arg6[%c0_18, %c0_19] : memref<16x1xf32, #tpu.memory_space<vmem>>, vector<16x1xf32>
      %c0_20 = arith.constant 0 : index
      %c0_21 = arith.constant 0 : index
      %29 = vector.load %arg7[%c0_20, %c0_21] : memref<16x1xf32, #tpu.memory_space<vmem>>, vector<16x1xf32>
      %30 = math.log %29 : vector<16x1xf32>
      %31 = arith.addf %28, %30 : vector<16x1xf32>
      %c0_22 = arith.constant 0 : index
      %c0_23 = arith.constant 0 : index
      %32 = vector.load %arg5[%c0_22, %c0_23] : memref<16x1xf32, #tpu.memory_space<vmem>>, vector<16x1xf32>
      tpu.vector_store %arg5[%c0_22, %c0_23], %31 {strides = array<i32>} : memref<16x1xf32, #tpu.memory_space<vmem>>, vector<16x1xf32>,
    } else {
    }
    return
  }
  func.func @transform_0(%arg0: i32, %arg1: i32) -> (i32, i32) {
    %c0_i32 = arith.constant 0 : i32
    %c0_i32_0 = arith.constant 0 : i32
    return %arg0, %c0_i32 : i32, i32
  }
  func.func @transform_1(%arg0: i32, %arg1: i32) -> (i32, i32) {
    %c0_i32 = arith.constant 0 : i32
    %c0_i32_0 = arith.constant 0 : i32
    return %c0_i32, %arg1 : i32, i32
  }
  func.func @transform_2(%arg0: i32, %arg1: i32) -> (i32, i32) {
    %c0_i32 = arith.constant 0 : i32
    %c0_i32_0 = arith.constant 0 : i32
    return %c0_i32, %arg1 : i32, i32
  }
  func.func @transform_3(%arg0: i32, %arg1: i32) -> (i32, i32) {
    %c0_i32 = arith.constant 0 : i32
    %c0_i32_0 = arith.constant 0 : i32
    return %arg0, %c0_i32 : i32, i32
  }
}

module attributes {stable_mosaic.version = 11 : i64} {
  func.func @gen_out_kernel(%arg0: i32, %arg1: i32, %arg2: memref<16x64xbf16, #tpu.memory_space<vmem>>, %arg3: memref<64x128xbf16, #tpu.memory_space<vmem>>, %arg4: memref<1x128xf32, #tpu.memory_space<vmem>>, %arg5: memref<16x1xf32, #tpu.memory_space<vmem>>, %arg6: memref<16x128xf32, #tpu.memory_space<vmem>>) attributes {dimension_semantics = [#tpu.dimension_semantics<parallel>, #tpu.dimension_semantics<arbitrary>], iteration_bounds = array<i64: 2, 1>, scalar_prefetch = 0 : i64, scratch_operands = 0 : i64, tpu.core_type = #tpu.core_type<tc>, window_params = [{transform_indices = @transform_0, window_bounds = array<i64: 16, 64>}, {transform_indices = @transform_1, window_bounds = array<i64: 64, 128>}, {transform_indices = @transform_2, window_bounds = array<i64: 1, 128>}, {transform_indices = @transform_3, window_bounds = array<i64: 16, 1>}, {transform_indices = @transform_4, window_bounds = array<i64: 16, 128>}]} {
    %c0 = arith.constant 0 : index
    %c0_0 = arith.constant 0 : index
    %0 = vector.load %arg2[%c0, %c0_0] : memref<16x64xbf16, #tpu.memory_space<vmem>>, vector<16x64xbf16>
    %c0_1 = arith.constant 0 : index
    %c0_2 = arith.constant 0 : index
    %1 = vector.load %arg3[%c0_1, %c0_2] : memref<64x128xbf16, #tpu.memory_space<vmem>>, vector<64x128xbf16>
    %cst = arith.constant dense<0.000000e+00> : vector<16x128xf32>
    %2 = tpu.matmul %0, %1, %cst {dimension_numbers = #tpu.dot_dimension_numbers<[1], [0], [0], [1], [0, 0, 1, 1], [], []>} : vector<16x64xbf16>, vector<64x128xbf16>, vector<16x128xf32> -> vector<16x128xf32>
    %c0_3 = arith.constant 0 : index
    %c0_4 = arith.constant 0 : index
    %3 = vector.load %arg4[%c0_3, %c0_4] : memref<1x128xf32, #tpu.memory_space<vmem>>, vector<1x128xf32>
    %4 = vector.broadcast %3 : vector<1x128xf32> to vector<16x128xf32>
    %5 = arith.addf %2, %4 : vector<16x128xf32>
    %c0_5 = arith.constant 0 : index
    %c0_6 = arith.constant 0 : index
    %6 = vector.load %arg5[%c0_5, %c0_6] : memref<16x1xf32, #tpu.memory_space<vmem>>, vector<16x1xf32>
    %7 = vector.broadcast %6 : vector<16x1xf32> to vector<16x128xf32>
    %8 = arith.subf %5, %7 : vector<16x128xf32>
    %c0_7 = arith.constant 0 : index
    %c0_8 = arith.constant 0 : index
    %9 = vector.load %arg6[%c0_7, %c0_8] : memref<16x128xf32, #tpu.memory_space<vmem>>, vector<16x128xf32>
    tpu.vector_store %arg6[%c0_7, %c0_8], %8 {strides = array<i32>} : memref<16x128xf32, #tpu.memory_space<vmem>>, vector<16x128xf32>,
    return
  }
  func.func @transform_0(%arg0: i32, %arg1: i32) -> (i32, i32) {
    %c0_i32 = arith.constant 0 : i32
    %c0_i32_0 = arith.constant 0 : i32
    return %arg0, %c0_i32 : i32, i32
  }
  func.func @transform_1(%arg0: i32, %arg1: i32) -> (i32, i32) {
    %c0_i32 = arith.constant 0 : i32
    %c0_i32_0 = arith.constant 0 : i32
    return %c0_i32, %arg1 : i32, i32
  }
  func.func @transform_2(%arg0: i32, %arg1: i32) -> (i32, i32) {
    %c0_i32 = arith.constant 0 : i32
    %c0_i32_0 = arith.constant 0 : i32
    return %c0_i32, %arg1 : i32, i32
  }
  func.func @transform_3(%arg0: i32, %arg1: i32) -> (i32, i32) {
    %c0_i32 = arith.constant 0 : i32
    %c0_i32_0 = arith.constant 0 : i32
    return %arg0, %c0_i32 : i32, i32
  }
  func.func @transform_4(%arg0: i32, %arg1: i32) -> (i32, i32) {
    %c0_i32 = arith.constant 0 : i32
    return %arg0, %arg1 : i32, i32
  }
}

module attributes {stable_mosaic.version = 11 : i64} {
  func.func @encoder_layer_kernel(%arg0: i32, %arg1: memref<1x16x64xbf16, #tpu.memory_space<vmem>>, %arg2: memref<1x1x16xf32, #tpu.memory_space<vmem>>, %arg3: memref<4x64x16xf32, #tpu.memory_space<vmem>>, %arg4: memref<4x16x64xf32, #tpu.memory_space<vmem>>, %arg5: memref<576x64xbf16, #tpu.memory_space<vmem>>, %arg6: memref<576x64xbf16, #tpu.memory_space<vmem>>, %arg7: memref<576x64xbf16, #tpu.memory_space<vmem>>, %arg8: memref<576x64xbf16, #tpu.memory_space<vmem>>, %arg9: memref<1x64xf32, #tpu.memory_space<vmem>>, %arg10: memref<1x64xf32, #tpu.memory_space<vmem>>, %arg11: memref<64x128xbf16, #tpu.memory_space<vmem>>, %arg12: memref<1x128xf32, #tpu.memory_space<vmem>>, %arg13: memref<128x64xbf16, #tpu.memory_space<vmem>>, %arg14: memref<1x64xf32, #tpu.memory_space<vmem>>, %arg15: memref<1x64xf32, #tpu.memory_space<vmem>>, %arg16: memref<1x64xf32, #tpu.memory_space<vmem>>, %arg17: memref<1x16x64xbf16, #tpu.memory_space<vmem>>) attributes {dimension_semantics = [#tpu.dimension_semantics<parallel>], iteration_bounds = array<i64: 2>, scalar_prefetch = 0 : i64, scratch_operands = 0 : i64, tpu.core_type = #tpu.core_type<tc>, window_params = [{transform_indices = @transform_0, window_bounds = array<i64: 1, 16, 64>}, {transform_indices = @transform_1, window_bounds = array<i64: 1, 1, 16>}, {pipeline_mode = #tpu.pipeline_mode<synchronous>, transform_indices = @transform_2, window_bounds = array<i64: 4, 64, 16>}, {pipeline_mode = #tpu.pipeline_mode<synchronous>, transform_indices = @transform_3, window_bounds = array<i64: 4, 16, 64>}, {pipeline_mode = #tpu.pipeline_mode<synchronous>, transform_indices = @transform_4, window_bounds = array<i64: 576, 64>}, {pipeline_mode = #tpu.pipeline_mode<synchronous>, transform_indices = @transform_5, window_bounds = array<i64: 576, 64>}, {pipeline_mode = #tpu.pipeline_mode<synchronous>, transform_indices = @transform_6, window_bounds = array<i64: 576, 64>}, {pipeline_mode = #tpu.pipeline_mode<synchronous>, transform_indices = @transform_7, window_bounds = array<i64: 576, 64>}, {pipeline_mode = #tpu.pipeline_mode<synchronous>, transform_indices = @transform_8, window_bounds = array<i64: 1, 64>}, {pipeline_mode = #tpu.pipeline_mode<synchronous>, transform_indices = @transform_9, window_bounds = array<i64: 1, 64>}, {pipeline_mode = #tpu.pipeline_mode<synchronous>, transform_indices = @transform_10, window_bounds = array<i64: 64, 128>}, {pipeline_mode = #tpu.pipeline_mode<synchronous>, transform_indices = @transform_11, window_bounds = array<i64: 1, 128>}, {pipeline_mode = #tpu.pipeline_mode<synchronous>, transform_indices = @transform_12, window_bounds = array<i64: 128, 64>}, {pipeline_mode = #tpu.pipeline_mode<synchronous>, transform_indices = @transform_13, window_bounds = array<i64: 1, 64>}, {pipeline_mode = #tpu.pipeline_mode<synchronous>, transform_indices = @transform_14, window_bounds = array<i64: 1, 64>}, {pipeline_mode = #tpu.pipeline_mode<synchronous>, transform_indices = @transform_15, window_bounds = array<i64: 1, 64>}, {transform_indices = @transform_16, window_bounds = array<i64: 1, 16, 64>}]} {
    %c0 = arith.constant 0 : index
    %c0_0 = arith.constant 0 : index
    %c0_1 = arith.constant 0 : index
    %0 = vector.load %arg1[%c0, %c0_0, %c0_1] : memref<1x16x64xbf16, #tpu.memory_space<vmem>>, vector<1x16x64xbf16>
    %1 = vector.shape_cast %0 : vector<1x16x64xbf16> to vector<16x64xbf16>
    %2 = arith.extf %1 : vector<16x64xbf16> to vector<16x64xf32>
    %3 = arith.negf %2 : vector<16x64xf32>
    %4 = math.exp %3 : vector<16x64xf32>
    %cst = arith.constant 1.000000e+00 : f32
    %5 = vector.broadcast %cst : f32 to vector<16x64xf32>
    %6 = arith.addf %5, %4 : vector<16x64xf32>
    %7 = arith.divf %5, %6 : vector<16x64xf32>
    %8 = arith.mulf %2, %7 : vector<16x64xf32>
    %cst_2 = arith.constant 1.000000e+00 : f32
    %9 = vector.broadcast %cst_2 : f32 to vector<16x64xf32>
    %10 = arith.addf %2, %9 : vector<16x64xf32>
    %cst_3 = arith.constant 2.500000e+00 : f32
    %11 = vector.broadcast %cst_3 : f32 to vector<16x64xf32>
    %12 = arith.mulf %10, %11 : vector<16x64xf32>
    %cst_4 = arith.constant 0.000000e+00 : f32
    %cst_5 = arith.constant 5.000000e+00 : f32
    %13 = vector.broadcast %cst_4 : f32 to vector<16x64xf32>
    %14 = arith.maximumf %13, %12 : vector<16x64xf32>
    %15 = vector.broadcast %cst_5 : f32 to vector<16x64xf32>
    %16 = arith.minimumf %15, %14 : vector<16x64xf32>
    %17 = math.floor %16 : vector<16x64xf32>
    %cst_6 = arith.constant 0.000000e+00 : f32
    %cst_7 = arith.constant 4.000000e+00 : f32
    %18 = vector.broadcast %cst_6 : f32 to vector<16x64xf32>
    %19 = arith.maximumf %18, %17 : vector<16x64xf32>
    %20 = vector.broadcast %cst_7 : f32 to vector<16x64xf32>
    %21 = arith.minimumf %20, %19 : vector<16x64xf32>
    %22 = arith.subf %16, %21 : vector<16x64xf32>
    %cst_8 = arith.constant -1.000000e+00 : f32
    %23 = vector.broadcast %cst_8 : f32 to vector<16x64xf32>
    %24 = arith.cmpf oge, %2, %23 : vector<16x64xf32>
    %cst_9 = arith.constant 1.000000e+00 : f32
    %25 = vector.broadcast %cst_9 : f32 to vector<16x64xf32>
    %26 = arith.cmpf olt, %2, %25 : vector<16x64xf32>
    %27 = arith.andi %24, %26 : vector<16x64xi1>
    %28 = arith.extui %27 : vector<16x64xi1> to vector<16x64xi32>
    %29 = arith.sitofp %28 : vector<16x64xi32> to vector<16x64xf32>
    %30 = arith.mulf %22, %22 : vector<16x64xf32>
    %31 = arith.mulf %30, %22 : vector<16x64xf32>
    %cst_10 = arith.constant 1.000000e+00 : f32
    %32 = vector.broadcast %cst_10 : f32 to vector<16x64xf32>
    %33 = arith.subf %32, %22 : vector<16x64xf32>
    %34 = arith.mulf %33, %33 : vector<16x64xf32>
    %35 = arith.mulf %34, %33 : vector<16x64xf32>
    %cst_11 = arith.constant 0.166666672 : f32
    %36 = vector.broadcast %cst_11 : f32 to vector<16x64xf32>
    %37 = arith.mulf %35, %36 : vector<16x64xf32>
    %38 = arith.mulf %37, %29 : vector<16x64xf32>
    %cst_12 = arith.constant 5.000000e-01 : f32
    %39 = vector.broadcast %cst_12 : f32 to vector<16x64xf32>
    %40 = arith.mulf %39, %31 : vector<16x64xf32>
    %41 = arith.subf %40, %30 : vector<16x64xf32>
    %cst_13 = arith.constant 0.666666686 : f32
    %42 = vector.broadcast %cst_13 : f32 to vector<16x64xf32>
    %43 = arith.addf %41, %42 : vector<16x64xf32>
    %44 = arith.mulf %43, %29 : vector<16x64xf32>
    %cst_14 = arith.constant -5.000000e-01 : f32
    %45 = vector.broadcast %cst_14 : f32 to vector<16x64xf32>
    %46 = arith.mulf %45, %31 : vector<16x64xf32>
    %cst_15 = arith.constant 5.000000e-01 : f32
    %47 = vector.broadcast %cst_15 : f32 to vector<16x64xf32>
    %48 = arith.mulf %47, %30 : vector<16x64xf32>
    %49 = arith.addf %46, %48 : vector<16x64xf32>
    %cst_16 = arith.constant 5.000000e-01 : f32
    %50 = vector.broadcast %cst_16 : f32 to vector<16x64xf32>
    %51 = arith.mulf %50, %22 : vector<16x64xf32>
    %52 = arith.addf %49, %51 : vector<16x64xf32>
    %cst_17 = arith.constant 0.166666672 : f32
    %53 = vector.broadcast %cst_17 : f32 to vector<16x64xf32>
    %54 = arith.addf %52, %53 : vector<16x64xf32>
    %55 = arith.mulf %54, %29 : vector<16x64xf32>
    %cst_18 = arith.constant 0.166666672 : f32
    %56 = vector.broadcast %cst_18 : f32 to vector<16x64xf32>
    %57 = arith.mulf %31, %56 : vector<16x64xf32>
    %58 = arith.mulf %57, %29 : vector<16x64xf32>
    %cst_19 = arith.constant 0.000000e+00 : f32
    %59 = vector.broadcast %cst_19 : f32 to vector<16x64xf32>
    %60 = arith.cmpf oeq, %21, %59 : vector<16x64xf32>
    %cst_20 = arith.constant 0.000000e+00 : f32
    %61 = vector.broadcast %cst_20 : f32 to vector<16x64xf32>
    %62 = arith.select %60, %38, %61 : vector<16x64xi1>, vector<16x64xf32>
    %cst_21 = arith.constant 1.000000e+00 : f32
    %63 = vector.broadcast %cst_21 : f32 to vector<16x64xf32>
    %64 = arith.cmpf oeq, %21, %63 : vector<16x64xf32>
    %cst_22 = arith.constant 0.000000e+00 : f32
    %65 = vector.broadcast %cst_22 : f32 to vector<16x64xf32>
    %66 = arith.select %64, %38, %65 : vector<16x64xi1>, vector<16x64xf32>
    %cst_23 = arith.constant 0.000000e+00 : f32
    %67 = vector.broadcast %cst_23 : f32 to vector<16x64xf32>
    %68 = arith.cmpf oeq, %21, %67 : vector<16x64xf32>
    %cst_24 = arith.constant 0.000000e+00 : f32
    %69 = vector.broadcast %cst_24 : f32 to vector<16x64xf32>
    %70 = arith.select %68, %44, %69 : vector<16x64xi1>, vector<16x64xf32>
    %71 = arith.addf %66, %70 : vector<16x64xf32>
    %cst_25 = arith.constant 2.000000e+00 : f32
    %72 = vector.broadcast %cst_25 : f32 to vector<16x64xf32>
    %73 = arith.cmpf oeq, %21, %72 : vector<16x64xf32>
    %cst_26 = arith.constant 0.000000e+00 : f32
    %74 = vector.broadcast %cst_26 : f32 to vector<16x64xf32>
    %75 = arith.select %73, %38, %74 : vector<16x64xi1>, vector<16x64xf32>
    %cst_27 = arith.constant 1.000000e+00 : f32
    %76 = vector.broadcast %cst_27 : f32 to vector<16x64xf32>
    %77 = arith.cmpf oeq, %21, %76 : vector<16x64xf32>
    %cst_28 = arith.constant 0.000000e+00 : f32
    %78 = vector.broadcast %cst_28 : f32 to vector<16x64xf32>
    %79 = arith.select %77, %44, %78 : vector<16x64xi1>, vector<16x64xf32>
    %80 = arith.addf %75, %79 : vector<16x64xf32>
    %cst_29 = arith.constant 0.000000e+00 : f32
    %81 = vector.broadcast %cst_29 : f32 to vector<16x64xf32>
    %82 = arith.cmpf oeq, %21, %81 : vector<16x64xf32>
    %cst_30 = arith.constant 0.000000e+00 : f32
    %83 = vector.broadcast %cst_30 : f32 to vector<16x64xf32>
    %84 = arith.select %82, %55, %83 : vector<16x64xi1>, vector<16x64xf32>
    %85 = arith.addf %80, %84 : vector<16x64xf32>
    %cst_31 = arith.constant 3.000000e+00 : f32
    %86 = vector.broadcast %cst_31 : f32 to vector<16x64xf32>
    %87 = arith.cmpf oeq, %21, %86 : vector<16x64xf32>
    %cst_32 = arith.constant 0.000000e+00 : f32
    %88 = vector.broadcast %cst_32 : f32 to vector<16x64xf32>
    %89 = arith.select %87, %38, %88 : vector<16x64xi1>, vector<16x64xf32>
    %cst_33 = arith.constant 2.000000e+00 : f32
    %90 = vector.broadcast %cst_33 : f32 to vector<16x64xf32>
    %91 = arith.cmpf oeq, %21, %90 : vector<16x64xf32>
    %cst_34 = arith.constant 0.000000e+00 : f32
    %92 = vector.broadcast %cst_34 : f32 to vector<16x64xf32>
    %93 = arith.select %91, %44, %92 : vector<16x64xi1>, vector<16x64xf32>
    %94 = arith.addf %89, %93 : vector<16x64xf32>
    %cst_35 = arith.constant 1.000000e+00 : f32
    %95 = vector.broadcast %cst_35 : f32 to vector<16x64xf32>
    %96 = arith.cmpf oeq, %21, %95 : vector<16x64xf32>
    %cst_36 = arith.constant 0.000000e+00 : f32
    %97 = vector.broadcast %cst_36 : f32 to vector<16x64xf32>
    %98 = arith.select %96, %55, %97 : vector<16x64xi1>, vector<16x64xf32>
    %99 = arith.addf %94, %98 : vector<16x64xf32>
    %cst_37 = arith.constant 0.000000e+00 : f32
    %100 = vector.broadcast %cst_37 : f32 to vector<16x64xf32>
    %101 = arith.cmpf oeq, %21, %100 : vector<16x64xf32>
    %cst_38 = arith.constant 0.000000e+00 : f32
    %102 = vector.broadcast %cst_38 : f32 to vector<16x64xf32>
    %103 = arith.select %101, %58, %102 : vector<16x64xi1>, vector<16x64xf32>
    %104 = arith.addf %99, %103 : vector<16x64xf32>
    %cst_39 = arith.constant 4.000000e+00 : f32
    %105 = vector.broadcast %cst_39 : f32 to vector<16x64xf32>
    %106 = arith.cmpf oeq, %21, %105 : vector<16x64xf32>
    %cst_40 = arith.constant 0.000000e+00 : f32
    %107 = vector.broadcast %cst_40 : f32 to vector<16x64xf32>
    %108 = arith.select %106, %38, %107 : vector<16x64xi1>, vector<16x64xf32>
    %cst_41 = arith.constant 3.000000e+00 : f32
    %109 = vector.broadcast %cst_41 : f32 to vector<16x64xf32>
    %110 = arith.cmpf oeq, %21, %109 : vector<16x64xf32>
    %cst_42 = arith.constant 0.000000e+00 : f32
    %111 = vector.broadcast %cst_42 : f32 to vector<16x64xf32>
    %112 = arith.select %110, %44, %111 : vector<16x64xi1>, vector<16x64xf32>
    %113 = arith.addf %108, %112 : vector<16x64xf32>
    %cst_43 = arith.constant 2.000000e+00 : f32
    %114 = vector.broadcast %cst_43 : f32 to vector<16x64xf32>
    %115 = arith.cmpf oeq, %21, %114 : vector<16x64xf32>
    %cst_44 = arith.constant 0.000000e+00 : f32
    %116 = vector.broadcast %cst_44 : f32 to vector<16x64xf32>
    %117 = arith.select %115, %55, %116 : vector<16x64xi1>, vector<16x64xf32>
    %118 = arith.addf %113, %117 : vector<16x64xf32>
    %cst_45 = arith.constant 1.000000e+00 : f32
    %119 = vector.broadcast %cst_45 : f32 to vector<16x64xf32>
    %120 = arith.cmpf oeq, %21, %119 : vector<16x64xf32>
    %cst_46 = arith.constant 0.000000e+00 : f32
    %121 = vector.broadcast %cst_46 : f32 to vector<16x64xf32>
    %122 = arith.select %120, %58, %121 : vector<16x64xi1>, vector<16x64xf32>
    %123 = arith.addf %118, %122 : vector<16x64xf32>
    %cst_47 = arith.constant 4.000000e+00 : f32
    %124 = vector.broadcast %cst_47 : f32 to vector<16x64xf32>
    %125 = arith.cmpf oeq, %21, %124 : vector<16x64xf32>
    %cst_48 = arith.constant 0.000000e+00 : f32
    %126 = vector.broadcast %cst_48 : f32 to vector<16x64xf32>
    %127 = arith.select %125, %44, %126 : vector<16x64xi1>, vector<16x64xf32>
    %cst_49 = arith.constant 3.000000e+00 : f32
    %128 = vector.broadcast %cst_49 : f32 to vector<16x64xf32>
    %129 = arith.cmpf oeq, %21, %128 : vector<16x64xf32>
    %cst_50 = arith.constant 0.000000e+00 : f32
    %130 = vector.broadcast %cst_50 : f32 to vector<16x64xf32>
    %131 = arith.select %129, %55, %130 : vector<16x64xi1>, vector<16x64xf32>
    %132 = arith.addf %127, %131 : vector<16x64xf32>
    %cst_51 = arith.constant 2.000000e+00 : f32
    %133 = vector.broadcast %cst_51 : f32 to vector<16x64xf32>
    %134 = arith.cmpf oeq, %21, %133 : vector<16x64xf32>
    %cst_52 = arith.constant 0.000000e+00 : f32
    %135 = vector.broadcast %cst_52 : f32 to vector<16x64xf32>
    %136 = arith.select %134, %58, %135 : vector<16x64xi1>, vector<16x64xf32>
    %137 = arith.addf %132, %136 : vector<16x64xf32>
    %cst_53 = arith.constant 4.000000e+00 : f32
    %138 = vector.broadcast %cst_53 : f32 to vector<16x64xf32>
    %139 = arith.cmpf oeq, %21, %138 : vector<16x64xf32>
    %cst_54 = arith.constant 0.000000e+00 : f32
    %140 = vector.broadcast %cst_54 : f32 to vector<16x64xf32>
    %141 = arith.select %139, %55, %140 : vector<16x64xi1>, vector<16x64xf32>
    %cst_55 = arith.constant 3.000000e+00 : f32
    %142 = vector.broadcast %cst_55 : f32 to vector<16x64xf32>
    %143 = arith.cmpf oeq, %21, %142 : vector<16x64xf32>
    %cst_56 = arith.constant 0.000000e+00 : f32
    %144 = vector.broadcast %cst_56 : f32 to vector<16x64xf32>
    %145 = arith.select %143, %58, %144 : vector<16x64xi1>, vector<16x64xf32>
    %146 = arith.addf %141, %145 : vector<16x64xf32>
    %cst_57 = arith.constant 4.000000e+00 : f32
    %147 = vector.broadcast %cst_57 : f32 to vector<16x64xf32>
    %148 = arith.cmpf oeq, %21, %147 : vector<16x64xf32>
    %cst_58 = arith.constant 0.000000e+00 : f32
    %149 = vector.broadcast %cst_58 : f32 to vector<16x64xf32>
    %150 = arith.select %148, %58, %149 : vector<16x64xi1>, vector<16x64xf32>
    %151 = tpu.concatenate %8, %62, %71, %85, %104, %123, %137, %146, %150 in 1 : vector<16x64xf32>, vector<16x64xf32>, vector<16x64xf32>, vector<16x64xf32>, vector<16x64xf32>, vector<16x64xf32>, vector<16x64xf32>, vector<16x64xf32>, vector<16x64xf32> -> vector<16x576xf32>
    %152 = arith.truncf %151 : vector<16x576xf32> to vector<16x576xbf16>
    %c0_59 = arith.constant 0 : index
    %c0_60 = arith.constant 0 : index
    %153 = vector.load %arg5[%c0_59, %c0_60] : memref<576x64xbf16, #tpu.memory_space<vmem>>, vector<576x64xbf16>
    %cst_61 = arith.constant dense<0.000000e+00> : vector<16x64xf32>
    %154 = tpu.matmul %152, %153, %cst_61 {dimension_numbers = #tpu.dot_dimension_numbers<[1], [0], [0], [1], [0, 0, 1, 1], [], []>} : vector<16x576xbf16>, vector<576x64xbf16>, vector<16x64xf32> -> vector<16x64xf32>
    %c0_62 = arith.constant 0 : index
    %c0_63 = arith.constant 0 : index
    %155 = vector.load %arg6[%c0_62, %c0_63] : memref<576x64xbf16, #tpu.memory_space<vmem>>, vector<576x64xbf16>
    %cst_64 = arith.constant dense<0.000000e+00> : vector<16x64xf32>
    %156 = tpu.matmul %152, %155, %cst_64 {dimension_numbers = #tpu.dot_dimension_numbers<[1], [0], [0], [1], [0, 0, 1, 1], [], []>} : vector<16x576xbf16>, vector<576x64xbf16>, vector<16x64xf32> -> vector<16x64xf32>
    %c0_65 = arith.constant 0 : index
    %c0_66 = arith.constant 0 : index
    %157 = vector.load %arg7[%c0_65, %c0_66] : memref<576x64xbf16, #tpu.memory_space<vmem>>, vector<576x64xbf16>
    %cst_67 = arith.constant dense<0.000000e+00> : vector<16x64xf32>
    %158 = tpu.matmul %152, %157, %cst_67 {dimension_numbers = #tpu.dot_dimension_numbers<[1], [0], [0], [1], [0, 0, 1, 1], [], []>} : vector<16x576xbf16>, vector<576x64xbf16>, vector<16x64xf32> -> vector<16x64xf32>
    %159 = vector.extract_strided_slice %154 {offsets = [0, 0], sizes = [16, 16], strides = [1, 1]} : vector<16x64xf32> to vector<16x16xf32>
    %c0_68 = arith.constant 0 : index
    %c0_69 = arith.constant 0 : index
    %c0_70 = arith.constant 0 : index
    %160 = vector.load %arg3[%c0_68, %c0_69, %c0_70] : memref<4x64x16xf32, #tpu.memory_space<vmem>>, vector<1x64x16xf32>
    %161 = vector.shape_cast %160 : vector<1x64x16xf32> to vector<64x16xf32>
    %cst_71 = arith.constant dense<0.000000e+00> : vector<64x16xf32>
    %162 = tpu.matmul %161, %159, %cst_71 {dimension_numbers = #tpu.dot_dimension_numbers<[1], [0], [0], [1], [0, 0, 1, 1], [], []>} : vector<64x16xf32>, vector<16x16xf32>, vector<64x16xf32> -> vector<64x16xf32>
    %163 = vector.extract_strided_slice %154 {offsets = [0, 16], sizes = [16, 16], strides = [1, 1]} : vector<16x64xf32> to vector<16x16xf32>
    %c1 = arith.constant 1 : index
    %c0_72 = arith.constant 0 : index
    %c0_73 = arith.constant 0 : index
    %164 = vector.load %arg3[%c1, %c0_72, %c0_73] : memref<4x64x16xf32, #tpu.memory_space<vmem>>, vector<1x64x16xf32>
    %165 = vector.shape_cast %164 : vector<1x64x16xf32> to vector<64x16xf32>
    %cst_74 = arith.constant dense<0.000000e+00> : vector<64x16xf32>
    %166 = tpu.matmul %165, %163, %cst_74 {dimension_numbers = #tpu.dot_dimension_numbers<[1], [0], [0], [1], [0, 0, 1, 1], [], []>} : vector<64x16xf32>, vector<16x16xf32>, vector<64x16xf32> -> vector<64x16xf32>
    %167 = arith.addf %162, %166 : vector<64x16xf32>
    %168 = vector.extract_strided_slice %154 {offsets = [0, 32], sizes = [16, 16], strides = [1, 1]} : vector<16x64xf32> to vector<16x16xf32>
    %c2 = arith.constant 2 : index
    %c0_75 = arith.constant 0 : index
    %c0_76 = arith.constant 0 : index
    %169 = vector.load %arg3[%c2, %c0_75, %c0_76] : memref<4x64x16xf32, #tpu.memory_space<vmem>>, vector<1x64x16xf32>
    %170 = vector.shape_cast %169 : vector<1x64x16xf32> to vector<64x16xf32>
    %cst_77 = arith.constant dense<0.000000e+00> : vector<64x16xf32>
    %171 = tpu.matmul %170, %168, %cst_77 {dimension_numbers = #tpu.dot_dimension_numbers<[1], [0], [0], [1], [0, 0, 1, 1], [], []>} : vector<64x16xf32>, vector<16x16xf32>, vector<64x16xf32> -> vector<64x16xf32>
    %172 = arith.addf %167, %171 : vector<64x16xf32>
    %173 = vector.extract_strided_slice %154 {offsets = [0, 48], sizes = [16, 16], strides = [1, 1]} : vector<16x64xf32> to vector<16x16xf32>
    %c3 = arith.constant 3 : index
    %c0_78 = arith.constant 0 : index
    %c0_79 = arith.constant 0 : index
    %174 = vector.load %arg3[%c3, %c0_78, %c0_79] : memref<4x64x16xf32, #tpu.memory_space<vmem>>, vector<1x64x16xf32>
    %175 = vector.shape_cast %174 : vector<1x64x16xf32> to vector<64x16xf32>
    %cst_80 = arith.constant dense<0.000000e+00> : vector<64x16xf32>
    %176 = tpu.matmul %175, %173, %cst_80 {dimension_numbers = #tpu.dot_dimension_numbers<[1], [0], [0], [1], [0, 0, 1, 1], [], []>} : vector<64x16xf32>, vector<16x16xf32>, vector<64x16xf32> -> vector<64x16xf32>
    %177 = arith.addf %172, %176 : vector<64x16xf32>
    %178 = vector.shape_cast %177 : vector<64x16xf32> to vector<4x16x16xf32>
    %179 = vector.extract_strided_slice %156 {offsets = [0, 0], sizes = [16, 16], strides = [1, 1]} : vector<16x64xf32> to vector<16x16xf32>
    %c0_81 = arith.constant 0 : index
    %c0_82 = arith.constant 0 : index
    %c0_83 = arith.constant 0 : index
    %180 = vector.load %arg3[%c0_81, %c0_82, %c0_83] : memref<4x64x16xf32, #tpu.memory_space<vmem>>, vector<1x64x16xf32>
    %181 = vector.shape_cast %180 : vector<1x64x16xf32> to vector<64x16xf32>
    %cst_84 = arith.constant dense<0.000000e+00> : vector<64x16xf32>
    %182 = tpu.matmul %181, %179, %cst_84 {dimension_numbers = #tpu.dot_dimension_numbers<[1], [0], [0], [1], [0, 0, 1, 1], [], []>} : vector<64x16xf32>, vector<16x16xf32>, vector<64x16xf32> -> vector<64x16xf32>
    %183 = vector.extract_strided_slice %156 {offsets = [0, 16], sizes = [16, 16], strides = [1, 1]} : vector<16x64xf32> to vector<16x16xf32>
    %c1_85 = arith.constant 1 : index
    %c0_86 = arith.constant 0 : index
    %c0_87 = arith.constant 0 : index
    %184 = vector.load %arg3[%c1_85, %c0_86, %c0_87] : memref<4x64x16xf32, #tpu.memory_space<vmem>>, vector<1x64x16xf32>
    %185 = vector.shape_cast %184 : vector<1x64x16xf32> to vector<64x16xf32>
    %cst_88 = arith.constant dense<0.000000e+00> : vector<64x16xf32>
    %186 = tpu.matmul %185, %183, %cst_88 {dimension_numbers = #tpu.dot_dimension_numbers<[1], [0], [0], [1], [0, 0, 1, 1], [], []>} : vector<64x16xf32>, vector<16x16xf32>, vector<64x16xf32> -> vector<64x16xf32>
    %187 = arith.addf %182, %186 : vector<64x16xf32>
    %188 = vector.extract_strided_slice %156 {offsets = [0, 32], sizes = [16, 16], strides = [1, 1]} : vector<16x64xf32> to vector<16x16xf32>
    %c2_89 = arith.constant 2 : index
    %c0_90 = arith.constant 0 : index
    %c0_91 = arith.constant 0 : index
    %189 = vector.load %arg3[%c2_89, %c0_90, %c0_91] : memref<4x64x16xf32, #tpu.memory_space<vmem>>, vector<1x64x16xf32>
    %190 = vector.shape_cast %189 : vector<1x64x16xf32> to vector<64x16xf32>
    %cst_92 = arith.constant dense<0.000000e+00> : vector<64x16xf32>
    %191 = tpu.matmul %190, %188, %cst_92 {dimension_numbers = #tpu.dot_dimension_numbers<[1], [0], [0], [1], [0, 0, 1, 1], [], []>} : vector<64x16xf32>, vector<16x16xf32>, vector<64x16xf32> -> vector<64x16xf32>
    %192 = arith.addf %187, %191 : vector<64x16xf32>
    %193 = vector.extract_strided_slice %156 {offsets = [0, 48], sizes = [16, 16], strides = [1, 1]} : vector<16x64xf32> to vector<16x16xf32>
    %c3_93 = arith.constant 3 : index
    %c0_94 = arith.constant 0 : index
    %c0_95 = arith.constant 0 : index
    %194 = vector.load %arg3[%c3_93, %c0_94, %c0_95] : memref<4x64x16xf32, #tpu.memory_space<vmem>>, vector<1x64x16xf32>
    %195 = vector.shape_cast %194 : vector<1x64x16xf32> to vector<64x16xf32>
    %cst_96 = arith.constant dense<0.000000e+00> : vector<64x16xf32>
    %196 = tpu.matmul %195, %193, %cst_96 {dimension_numbers = #tpu.dot_dimension_numbers<[1], [0], [0], [1], [0, 0, 1, 1], [], []>} : vector<64x16xf32>, vector<16x16xf32>, vector<64x16xf32> -> vector<64x16xf32>
    %197 = arith.addf %192, %196 : vector<64x16xf32>
    %198 = vector.shape_cast %197 : vector<64x16xf32> to vector<4x16x16xf32>
    %199 = vector.extract_strided_slice %158 {offsets = [0, 0], sizes = [16, 16], strides = [1, 1]} : vector<16x64xf32> to vector<16x16xf32>
    %c0_97 = arith.constant 0 : index
    %c0_98 = arith.constant 0 : index
    %c0_99 = arith.constant 0 : index
    %200 = vector.load %arg3[%c0_97, %c0_98, %c0_99] : memref<4x64x16xf32, #tpu.memory_space<vmem>>, vector<1x64x16xf32>
    %201 = vector.shape_cast %200 : vector<1x64x16xf32> to vector<64x16xf32>
    %cst_100 = arith.constant dense<0.000000e+00> : vector<64x16xf32>
    %202 = tpu.matmul %201, %199, %cst_100 {dimension_numbers = #tpu.dot_dimension_numbers<[1], [0], [0], [1], [0, 0, 1, 1], [], []>} : vector<64x16xf32>, vector<16x16xf32>, vector<64x16xf32> -> vector<64x16xf32>
    %203 = vector.extract_strided_slice %158 {offsets = [0, 16], sizes = [16, 16], strides = [1, 1]} : vector<16x64xf32> to vector<16x16xf32>
    %c1_101 = arith.constant 1 : index
    %c0_102 = arith.constant 0 : index
    %c0_103 = arith.constant 0 : index
    %204 = vector.load %arg3[%c1_101, %c0_102, %c0_103] : memref<4x64x16xf32, #tpu.memory_space<vmem>>, vector<1x64x16xf32>
    %205 = vector.shape_cast %204 : vector<1x64x16xf32> to vector<64x16xf32>
    %cst_104 = arith.constant dense<0.000000e+00> : vector<64x16xf32>
    %206 = tpu.matmul %205, %203, %cst_104 {dimension_numbers = #tpu.dot_dimension_numbers<[1], [0], [0], [1], [0, 0, 1, 1], [], []>} : vector<64x16xf32>, vector<16x16xf32>, vector<64x16xf32> -> vector<64x16xf32>
    %207 = arith.addf %202, %206 : vector<64x16xf32>
    %208 = vector.extract_strided_slice %158 {offsets = [0, 32], sizes = [16, 16], strides = [1, 1]} : vector<16x64xf32> to vector<16x16xf32>
    %c2_105 = arith.constant 2 : index
    %c0_106 = arith.constant 0 : index
    %c0_107 = arith.constant 0 : index
    %209 = vector.load %arg3[%c2_105, %c0_106, %c0_107] : memref<4x64x16xf32, #tpu.memory_space<vmem>>, vector<1x64x16xf32>
    %210 = vector.shape_cast %209 : vector<1x64x16xf32> to vector<64x16xf32>
    %cst_108 = arith.constant dense<0.000000e+00> : vector<64x16xf32>
    %211 = tpu.matmul %210, %208, %cst_108 {dimension_numbers = #tpu.dot_dimension_numbers<[1], [0], [0], [1], [0, 0, 1, 1], [], []>} : vector<64x16xf32>, vector<16x16xf32>, vector<64x16xf32> -> vector<64x16xf32>
    %212 = arith.addf %207, %211 : vector<64x16xf32>
    %213 = vector.extract_strided_slice %158 {offsets = [0, 48], sizes = [16, 16], strides = [1, 1]} : vector<16x64xf32> to vector<16x16xf32>
    %c3_109 = arith.constant 3 : index
    %c0_110 = arith.constant 0 : index
    %c0_111 = arith.constant 0 : index
    %214 = vector.load %arg3[%c3_109, %c0_110, %c0_111] : memref<4x64x16xf32, #tpu.memory_space<vmem>>, vector<1x64x16xf32>
    %215 = vector.shape_cast %214 : vector<1x64x16xf32> to vector<64x16xf32>
    %cst_112 = arith.constant dense<0.000000e+00> : vector<64x16xf32>
    %216 = tpu.matmul %215, %213, %cst_112 {dimension_numbers = #tpu.dot_dimension_numbers<[1], [0], [0], [1], [0, 0, 1, 1], [], []>} : vector<64x16xf32>, vector<16x16xf32>, vector<64x16xf32> -> vector<64x16xf32>
    %217 = arith.addf %212, %216 : vector<64x16xf32>
    %218 = vector.shape_cast %217 : vector<64x16xf32> to vector<4x16x16xf32>
    "tpu.trace_start"() <{level = 10 : i32, message = "hld,hmd->hlm"}> : () -> ()
    %cst_113 = arith.constant dense<0.000000e+00> : vector<4x16x16xf32>
    %219 = tpu.matmul %178, %198, %cst_113 {dimension_numbers = #tpu.dot_dimension_numbers<[2], [2], [1], [1], [0, 0, 0, 1, 1, 1], [0], [0]>} : vector<4x16x16xf32>, vector<4x16x16xf32>, vector<4x16x16xf32> -> vector<4x16x16xf32>
    "tpu.trace_stop"() : () -> ()
    %cst_114 = arith.constant 2.500000e-01 : f32
    %220 = vector.broadcast %cst_114 : f32 to vector<4x16x16xf32>
    %221 = arith.mulf %219, %220 : vector<4x16x16xf32>
    %c0_115 = arith.constant 0 : index
    %c0_116 = arith.constant 0 : index
    %c0_117 = arith.constant 0 : index
    %222 = vector.load %arg2[%c0_115, %c0_116, %c0_117] : memref<1x1x16xf32, #tpu.memory_space<vmem>>, vector<1x1x16xf32>
    %223 = vector.broadcast %222 : vector<1x1x16xf32> to vector<4x16x16xf32>
    %224 = arith.addf %221, %223 : vector<4x16x16xf32>
    %cst_118 = arith.constant dense<0xFF800000> : vector<4x16xf32>
    %225 = vector.multi_reduction <maximumf>, %224, %cst_118 [2] : vector<4x16x16xf32> to vector<4x16xf32>
    %226 = vector.shape_cast %225 : vector<4x16xf32> to vector<4x16x1xf32>
    %227 = vector.broadcast %226 : vector<4x16x1xf32> to vector<4x16x16xf32>
    %228 = arith.subf %224, %227 : vector<4x16x16xf32>
    %229 = math.exp %228 : vector<4x16x16xf32>
    %cst_119 = arith.constant dense<0.000000e+00> : vector<4x16xf32>
    %230 = vector.multi_reduction <add>, %229, %cst_119 [2] : vector<4x16x16xf32> to vector<4x16xf32>
    %231 = vector.shape_cast %230 : vector<4x16xf32> to vector<4x16x1xf32>
    %232 = vector.broadcast %231 : vector<4x16x1xf32> to vector<4x16x16xf32>
    %233 = arith.divf %229, %232 : vector<4x16x16xf32>
    "tpu.trace_start"() <{level = 10 : i32, message = "hlm,hmd->hld"}> : () -> ()
    %cst_120 = arith.constant dense<0.000000e+00> : vector<4x16x16xf32>
    %234 = tpu.matmul %233, %218, %cst_120 {dimension_numbers = #tpu.dot_dimension_numbers<[2], [1], [1], [2], [0, 0, 0, 1, 1, 2], [0], [0]>} : vector<4x16x16xf32>, vector<4x16x16xf32>, vector<4x16x16xf32> -> vector<4x16x16xf32>
    "tpu.trace_stop"() : () -> ()
    %235 = vector.extract_strided_slice %234 {offsets = [0, 0, 0], sizes = [1, 16, 16], strides = [1, 1, 1]} : vector<4x16x16xf32> to vector<1x16x16xf32>
    %236 = vector.shape_cast %235 : vector<1x16x16xf32> to vector<16x16xf32>
    %c0_121 = arith.constant 0 : index
    %c0_122 = arith.constant 0 : index
    %c0_123 = arith.constant 0 : index
    %237 = vector.load %arg4[%c0_121, %c0_122, %c0_123] : memref<4x16x64xf32, #tpu.memory_space<vmem>>, vector<1x16x64xf32>
    %238 = vector.shape_cast %237 : vector<1x16x64xf32> to vector<16x64xf32>
    %cst_124 = arith.constant dense<0.000000e+00> : vector<16x64xf32>
    %239 = tpu.matmul %236, %238, %cst_124 {dimension_numbers = #tpu.dot_dimension_numbers<[1], [0], [0], [1], [0, 0, 1, 1], [], []>} : vector<16x16xf32>, vector<16x64xf32>, vector<16x64xf32> -> vector<16x64xf32>
    %240 = vector.extract_strided_slice %234 {offsets = [1, 0, 0], sizes = [1, 16, 16], strides = [1, 1, 1]} : vector<4x16x16xf32> to vector<1x16x16xf32>
    %241 = vector.shape_cast %240 : vector<1x16x16xf32> to vector<16x16xf32>
    %c1_125 = arith.constant 1 : index
    %c0_126 = arith.constant 0 : index
    %c0_127 = arith.constant 0 : index
    %242 = vector.load %arg4[%c1_125, %c0_126, %c0_127] : memref<4x16x64xf32, #tpu.memory_space<vmem>>, vector<1x16x64xf32>
    %243 = vector.shape_cast %242 : vector<1x16x64xf32> to vector<16x64xf32>
    %cst_128 = arith.constant dense<0.000000e+00> : vector<16x64xf32>
    %244 = tpu.matmul %241, %243, %cst_128 {dimension_numbers = #tpu.dot_dimension_numbers<[1], [0], [0], [1], [0, 0, 1, 1], [], []>} : vector<16x16xf32>, vector<16x64xf32>, vector<16x64xf32> -> vector<16x64xf32>
    %245 = arith.addf %239, %244 : vector<16x64xf32>
    %246 = vector.extract_strided_slice %234 {offsets = [2, 0, 0], sizes = [1, 16, 16], strides = [1, 1, 1]} : vector<4x16x16xf32> to vector<1x16x16xf32>
    %247 = vector.shape_cast %246 : vector<1x16x16xf32> to vector<16x16xf32>
    %c2_129 = arith.constant 2 : index
    %c0_130 = arith.constant 0 : index
    %c0_131 = arith.constant 0 : index
    %248 = vector.load %arg4[%c2_129, %c0_130, %c0_131] : memref<4x16x64xf32, #tpu.memory_space<vmem>>, vector<1x16x64xf32>
    %249 = vector.shape_cast %248 : vector<1x16x64xf32> to vector<16x64xf32>
    %cst_132 = arith.constant dense<0.000000e+00> : vector<16x64xf32>
    %250 = tpu.matmul %247, %249, %cst_132 {dimension_numbers = #tpu.dot_dimension_numbers<[1], [0], [0], [1], [0, 0, 1, 1], [], []>} : vector<16x16xf32>, vector<16x64xf32>, vector<16x64xf32> -> vector<16x64xf32>
    %251 = arith.addf %245, %250 : vector<16x64xf32>
    %252 = vector.extract_strided_slice %234 {offsets = [3, 0, 0], sizes = [1, 16, 16], strides = [1, 1, 1]} : vector<4x16x16xf32> to vector<1x16x16xf32>
    %253 = vector.shape_cast %252 : vector<1x16x16xf32> to vector<16x16xf32>
    %c3_133 = arith.constant 3 : index
    %c0_134 = arith.constant 0 : index
    %c0_135 = arith.constant 0 : index
    %254 = vector.load %arg4[%c3_133, %c0_134, %c0_135] : memref<4x16x64xf32, #tpu.memory_space<vmem>>, vector<1x16x64xf32>
    %255 = vector.shape_cast %254 : vector<1x16x64xf32> to vector<16x64xf32>
    %cst_136 = arith.constant dense<0.000000e+00> : vector<16x64xf32>
    %256 = tpu.matmul %253, %255, %cst_136 {dimension_numbers = #tpu.dot_dimension_numbers<[1], [0], [0], [1], [0, 0, 1, 1], [], []>} : vector<16x16xf32>, vector<16x64xf32>, vector<16x64xf32> -> vector<16x64xf32>
    %257 = arith.addf %251, %256 : vector<16x64xf32>
    %258 = arith.negf %257 : vector<16x64xf32>
    %259 = math.exp %258 : vector<16x64xf32>
    %cst_137 = arith.constant 1.000000e+00 : f32
    %260 = vector.broadcast %cst_137 : f32 to vector<16x64xf32>
    %261 = arith.addf %260, %259 : vector<16x64xf32>
    %262 = arith.divf %260, %261 : vector<16x64xf32>
    %263 = arith.mulf %257, %262 : vector<16x64xf32>
    %cst_138 = arith.constant 1.000000e+00 : f32
    %264 = vector.broadcast %cst_138 : f32 to vector<16x64xf32>
    %265 = arith.addf %257, %264 : vector<16x64xf32>
    %cst_139 = arith.constant 2.500000e+00 : f32
    %266 = vector.broadcast %cst_139 : f32 to vector<16x64xf32>
    %267 = arith.mulf %265, %266 : vector<16x64xf32>
    %cst_140 = arith.constant 0.000000e+00 : f32
    %cst_141 = arith.constant 5.000000e+00 : f32
    %268 = vector.broadcast %cst_140 : f32 to vector<16x64xf32>
    %269 = arith.maximumf %268, %267 : vector<16x64xf32>
    %270 = vector.broadcast %cst_141 : f32 to vector<16x64xf32>
    %271 = arith.minimumf %270, %269 : vector<16x64xf32>
    %272 = math.floor %271 : vector<16x64xf32>
    %cst_142 = arith.constant 0.000000e+00 : f32
    %cst_143 = arith.constant 4.000000e+00 : f32
    %273 = vector.broadcast %cst_142 : f32 to vector<16x64xf32>
    %274 = arith.maximumf %273, %272 : vector<16x64xf32>
    %275 = vector.broadcast %cst_143 : f32 to vector<16x64xf32>
    %276 = arith.minimumf %275, %274 : vector<16x64xf32>
    %277 = arith.subf %271, %276 : vector<16x64xf32>
    %cst_144 = arith.constant -1.000000e+00 : f32
    %278 = vector.broadcast %cst_144 : f32 to vector<16x64xf32>
    %279 = arith.cmpf oge, %257, %278 : vector<16x64xf32>
    %cst_145 = arith.constant 1.000000e+00 : f32
    %280 = vector.broadcast %cst_145 : f32 to vector<16x64xf32>
    %281 = arith.cmpf olt, %257, %280 : vector<16x64xf32>
    %282 = arith.andi %279, %281 : vector<16x64xi1>
    %283 = arith.extui %282 : vector<16x64xi1> to vector<16x64xi32>
    %284 = arith.sitofp %283 : vector<16x64xi32> to vector<16x64xf32>
    %285 = arith.mulf %277, %277 : vector<16x64xf32>
    %286 = arith.mulf %285, %277 : vector<16x64xf32>
    %cst_146 = arith.constant 1.000000e+00 : f32
    %287 = vector.broadcast %cst_146 : f32 to vector<16x64xf32>
    %288 = arith.subf %287, %277 : vector<16x64xf32>
    %289 = arith.mulf %288, %288 : vector<16x64xf32>
    %290 = arith.mulf %289, %288 : vector<16x64xf32>
    %cst_147 = arith.constant 0.166666672 : f32
    %291 = vector.broadcast %cst_147 : f32 to vector<16x64xf32>
    %292 = arith.mulf %290, %291 : vector<16x64xf32>
    %293 = arith.mulf %292, %284 : vector<16x64xf32>
    %cst_148 = arith.constant 5.000000e-01 : f32
    %294 = vector.broadcast %cst_148 : f32 to vector<16x64xf32>
    %295 = arith.mulf %294, %286 : vector<16x64xf32>
    %296 = arith.subf %295, %285 : vector<16x64xf32>
    %cst_149 = arith.constant 0.666666686 : f32
    %297 = vector.broadcast %cst_149 : f32 to vector<16x64xf32>
    %298 = arith.addf %296, %297 : vector<16x64xf32>
    %299 = arith.mulf %298, %284 : vector<16x64xf32>
    %cst_150 = arith.constant -5.000000e-01 : f32
    %300 = vector.broadcast %cst_150 : f32 to vector<16x64xf32>
    %301 = arith.mulf %300, %286 : vector<16x64xf32>
    %cst_151 = arith.constant 5.000000e-01 : f32
    %302 = vector.broadcast %cst_151 : f32 to vector<16x64xf32>
    %303 = arith.mulf %302, %285 : vector<16x64xf32>
    %304 = arith.addf %301, %303 : vector<16x64xf32>
    %cst_152 = arith.constant 5.000000e-01 : f32
    %305 = vector.broadcast %cst_152 : f32 to vector<16x64xf32>
    %306 = arith.mulf %305, %277 : vector<16x64xf32>
    %307 = arith.addf %304, %306 : vector<16x64xf32>
    %cst_153 = arith.constant 0.166666672 : f32
    %308 = vector.broadcast %cst_153 : f32 to vector<16x64xf32>
    %309 = arith.addf %307, %308 : vector<16x64xf32>
    %310 = arith.mulf %309, %284 : vector<16x64xf32>
    %cst_154 = arith.constant 0.166666672 : f32
    %311 = vector.broadcast %cst_154 : f32 to vector<16x64xf32>
    %312 = arith.mulf %286, %311 : vector<16x64xf32>
    %313 = arith.mulf %312, %284 : vector<16x64xf32>
    %cst_155 = arith.constant 0.000000e+00 : f32
    %314 = vector.broadcast %cst_155 : f32 to vector<16x64xf32>
    %315 = arith.cmpf oeq, %276, %314 : vector<16x64xf32>
    %cst_156 = arith.constant 0.000000e+00 : f32
    %316 = vector.broadcast %cst_156 : f32 to vector<16x64xf32>
    %317 = arith.select %315, %293, %316 : vector<16x64xi1>, vector<16x64xf32>
    %cst_157 = arith.constant 1.000000e+00 : f32
    %318 = vector.broadcast %cst_157 : f32 to vector<16x64xf32>
    %319 = arith.cmpf oeq, %276, %318 : vector<16x64xf32>
    %cst_158 = arith.constant 0.000000e+00 : f32
    %320 = vector.broadcast %cst_158 : f32 to vector<16x64xf32>
    %321 = arith.select %319, %293, %320 : vector<16x64xi1>, vector<16x64xf32>
    %cst_159 = arith.constant 0.000000e+00 : f32
    %322 = vector.broadcast %cst_159 : f32 to vector<16x64xf32>
    %323 = arith.cmpf oeq, %276, %322 : vector<16x64xf32>
    %cst_160 = arith.constant 0.000000e+00 : f32
    %324 = vector.broadcast %cst_160 : f32 to vector<16x64xf32>
    %325 = arith.select %323, %299, %324 : vector<16x64xi1>, vector<16x64xf32>
    %326 = arith.addf %321, %325 : vector<16x64xf32>
    %cst_161 = arith.constant 2.000000e+00 : f32
    %327 = vector.broadcast %cst_161 : f32 to vector<16x64xf32>
    %328 = arith.cmpf oeq, %276, %327 : vector<16x64xf32>
    %cst_162 = arith.constant 0.000000e+00 : f32
    %329 = vector.broadcast %cst_162 : f32 to vector<16x64xf32>
    %330 = arith.select %328, %293, %329 : vector<16x64xi1>, vector<16x64xf32>
    %cst_163 = arith.constant 1.000000e+00 : f32
    %331 = vector.broadcast %cst_163 : f32 to vector<16x64xf32>
    %332 = arith.cmpf oeq, %276, %331 : vector<16x64xf32>
    %cst_164 = arith.constant 0.000000e+00 : f32
    %333 = vector.broadcast %cst_164 : f32 to vector<16x64xf32>
    %334 = arith.select %332, %299, %333 : vector<16x64xi1>, vector<16x64xf32>
    %335 = arith.addf %330, %334 : vector<16x64xf32>
    %cst_165 = arith.constant 0.000000e+00 : f32
    %336 = vector.broadcast %cst_165 : f32 to vector<16x64xf32>
    %337 = arith.cmpf oeq, %276, %336 : vector<16x64xf32>
    %cst_166 = arith.constant 0.000000e+00 : f32
    %338 = vector.broadcast %cst_166 : f32 to vector<16x64xf32>
    %339 = arith.select %337, %310, %338 : vector<16x64xi1>, vector<16x64xf32>
    %340 = arith.addf %335, %339 : vector<16x64xf32>
    %cst_167 = arith.constant 3.000000e+00 : f32
    %341 = vector.broadcast %cst_167 : f32 to vector<16x64xf32>
    %342 = arith.cmpf oeq, %276, %341 : vector<16x64xf32>
    %cst_168 = arith.constant 0.000000e+00 : f32
    %343 = vector.broadcast %cst_168 : f32 to vector<16x64xf32>
    %344 = arith.select %342, %293, %343 : vector<16x64xi1>, vector<16x64xf32>
    %cst_169 = arith.constant 2.000000e+00 : f32
    %345 = vector.broadcast %cst_169 : f32 to vector<16x64xf32>
    %346 = arith.cmpf oeq, %276, %345 : vector<16x64xf32>
    %cst_170 = arith.constant 0.000000e+00 : f32
    %347 = vector.broadcast %cst_170 : f32 to vector<16x64xf32>
    %348 = arith.select %346, %299, %347 : vector<16x64xi1>, vector<16x64xf32>
    %349 = arith.addf %344, %348 : vector<16x64xf32>
    %cst_171 = arith.constant 1.000000e+00 : f32
    %350 = vector.broadcast %cst_171 : f32 to vector<16x64xf32>
    %351 = arith.cmpf oeq, %276, %350 : vector<16x64xf32>
    %cst_172 = arith.constant 0.000000e+00 : f32
    %352 = vector.broadcast %cst_172 : f32 to vector<16x64xf32>
    %353 = arith.select %351, %310, %352 : vector<16x64xi1>, vector<16x64xf32>
    %354 = arith.addf %349, %353 : vector<16x64xf32>
    %cst_173 = arith.constant 0.000000e+00 : f32
    %355 = vector.broadcast %cst_173 : f32 to vector<16x64xf32>
    %356 = arith.cmpf oeq, %276, %355 : vector<16x64xf32>
    %cst_174 = arith.constant 0.000000e+00 : f32
    %357 = vector.broadcast %cst_174 : f32 to vector<16x64xf32>
    %358 = arith.select %356, %313, %357 : vector<16x64xi1>, vector<16x64xf32>
    %359 = arith.addf %354, %358 : vector<16x64xf32>
    %cst_175 = arith.constant 4.000000e+00 : f32
    %360 = vector.broadcast %cst_175 : f32 to vector<16x64xf32>
    %361 = arith.cmpf oeq, %276, %360 : vector<16x64xf32>
    %cst_176 = arith.constant 0.000000e+00 : f32
    %362 = vector.broadcast %cst_176 : f32 to vector<16x64xf32>
    %363 = arith.select %361, %293, %362 : vector<16x64xi1>, vector<16x64xf32>
    %cst_177 = arith.constant 3.000000e+00 : f32
    %364 = vector.broadcast %cst_177 : f32 to vector<16x64xf32>
    %365 = arith.cmpf oeq, %276, %364 : vector<16x64xf32>
    %cst_178 = arith.constant 0.000000e+00 : f32
    %366 = vector.broadcast %cst_178 : f32 to vector<16x64xf32>
    %367 = arith.select %365, %299, %366 : vector<16x64xi1>, vector<16x64xf32>
    %368 = arith.addf %363, %367 : vector<16x64xf32>
    %cst_179 = arith.constant 2.000000e+00 : f32
    %369 = vector.broadcast %cst_179 : f32 to vector<16x64xf32>
    %370 = arith.cmpf oeq, %276, %369 : vector<16x64xf32>
    %cst_180 = arith.constant 0.000000e+00 : f32
    %371 = vector.broadcast %cst_180 : f32 to vector<16x64xf32>
    %372 = arith.select %370, %310, %371 : vector<16x64xi1>, vector<16x64xf32>
    %373 = arith.addf %368, %372 : vector<16x64xf32>
    %cst_181 = arith.constant 1.000000e+00 : f32
    %374 = vector.broadcast %cst_181 : f32 to vector<16x64xf32>
    %375 = arith.cmpf oeq, %276, %374 : vector<16x64xf32>
    %cst_182 = arith.constant 0.000000e+00 : f32
    %376 = vector.broadcast %cst_182 : f32 to vector<16x64xf32>
    %377 = arith.select %375, %313, %376 : vector<16x64xi1>, vector<16x64xf32>
    %378 = arith.addf %373, %377 : vector<16x64xf32>
    %cst_183 = arith.constant 4.000000e+00 : f32
    %379 = vector.broadcast %cst_183 : f32 to vector<16x64xf32>
    %380 = arith.cmpf oeq, %276, %379 : vector<16x64xf32>
    %cst_184 = arith.constant 0.000000e+00 : f32
    %381 = vector.broadcast %cst_184 : f32 to vector<16x64xf32>
    %382 = arith.select %380, %299, %381 : vector<16x64xi1>, vector<16x64xf32>
    %cst_185 = arith.constant 3.000000e+00 : f32
    %383 = vector.broadcast %cst_185 : f32 to vector<16x64xf32>
    %384 = arith.cmpf oeq, %276, %383 : vector<16x64xf32>
    %cst_186 = arith.constant 0.000000e+00 : f32
    %385 = vector.broadcast %cst_186 : f32 to vector<16x64xf32>
    %386 = arith.select %384, %310, %385 : vector<16x64xi1>, vector<16x64xf32>
    %387 = arith.addf %382, %386 : vector<16x64xf32>
    %cst_187 = arith.constant 2.000000e+00 : f32
    %388 = vector.broadcast %cst_187 : f32 to vector<16x64xf32>
    %389 = arith.cmpf oeq, %276, %388 : vector<16x64xf32>
    %cst_188 = arith.constant 0.000000e+00 : f32
    %390 = vector.broadcast %cst_188 : f32 to vector<16x64xf32>
    %391 = arith.select %389, %313, %390 : vector<16x64xi1>, vector<16x64xf32>
    %392 = arith.addf %387, %391 : vector<16x64xf32>
    %cst_189 = arith.constant 4.000000e+00 : f32
    %393 = vector.broadcast %cst_189 : f32 to vector<16x64xf32>
    %394 = arith.cmpf oeq, %276, %393 : vector<16x64xf32>
    %cst_190 = arith.constant 0.000000e+00 : f32
    %395 = vector.broadcast %cst_190 : f32 to vector<16x64xf32>
    %396 = arith.select %394, %310, %395 : vector<16x64xi1>, vector<16x64xf32>
    %cst_191 = arith.constant 3.000000e+00 : f32
    %397 = vector.broadcast %cst_191 : f32 to vector<16x64xf32>
    %398 = arith.cmpf oeq, %276, %397 : vector<16x64xf32>
    %cst_192 = arith.constant 0.000000e+00 : f32
    %399 = vector.broadcast %cst_192 : f32 to vector<16x64xf32>
    %400 = arith.select %398, %313, %399 : vector<16x64xi1>, vector<16x64xf32>
    %401 = arith.addf %396, %400 : vector<16x64xf32>
    %cst_193 = arith.constant 4.000000e+00 : f32
    %402 = vector.broadcast %cst_193 : f32 to vector<16x64xf32>
    %403 = arith.cmpf oeq, %276, %402 : vector<16x64xf32>
    %cst_194 = arith.constant 0.000000e+00 : f32
    %404 = vector.broadcast %cst_194 : f32 to vector<16x64xf32>
    %405 = arith.select %403, %313, %404 : vector<16x64xi1>, vector<16x64xf32>
    %406 = tpu.concatenate %263, %317, %326, %340, %359, %378, %392, %401, %405 in 1 : vector<16x64xf32>, vector<16x64xf32>, vector<16x64xf32>, vector<16x64xf32>, vector<16x64xf32>, vector<16x64xf32>, vector<16x64xf32>, vector<16x64xf32>, vector<16x64xf32> -> vector<16x576xf32>
    %407 = arith.truncf %406 : vector<16x576xf32> to vector<16x576xbf16>
    %c0_195 = arith.constant 0 : index
    %c0_196 = arith.constant 0 : index
    %408 = vector.load %arg8[%c0_195, %c0_196] : memref<576x64xbf16, #tpu.memory_space<vmem>>, vector<576x64xbf16>
    %cst_197 = arith.constant dense<0.000000e+00> : vector<16x64xf32>
    %409 = tpu.matmul %407, %408, %cst_197 {dimension_numbers = #tpu.dot_dimension_numbers<[1], [0], [0], [1], [0, 0, 1, 1], [], []>} : vector<16x576xbf16>, vector<576x64xbf16>, vector<16x64xf32> -> vector<16x64xf32>
    %c0_198 = arith.constant 0 : index
    %c0_199 = arith.constant 0 : index
    %410 = vector.load %arg9[%c0_198, %c0_199] : memref<1x64xf32, #tpu.memory_space<vmem>>, vector<1x64xf32>
    %c0_200 = arith.constant 0 : index
    %c0_201 = arith.constant 0 : index
    %411 = vector.load %arg10[%c0_200, %c0_201] : memref<1x64xf32, #tpu.memory_space<vmem>>, vector<1x64xf32>
    %412 = arith.addf %2, %409 : vector<16x64xf32>
    %cst_202 = arith.constant dense<0.000000e+00> : vector<16xf32>
    %413 = vector.multi_reduction <add>, %412, %cst_202 [1] : vector<16x64xf32> to vector<16xf32>
    %414 = vector.shape_cast %413 : vector<16xf32> to vector<16x1xf32>
    %cst_203 = arith.constant 6.400000e+01 : f32
    %415 = vector.broadcast %cst_203 : f32 to vector<16x1xf32>
    %416 = arith.divf %414, %415 : vector<16x1xf32>
    %417 = vector.broadcast %416 : vector<16x1xf32> to vector<16x64xf32>
    %418 = arith.subf %412, %417 : vector<16x64xf32>
    %419 = arith.mulf %418, %418 : vector<16x64xf32>
    %cst_204 = arith.constant dense<0.000000e+00> : vector<16xf32>
    %420 = vector.multi_reduction <add>, %419, %cst_204 [1] : vector<16x64xf32> to vector<16xf32>
    %421 = vector.shape_cast %420 : vector<16xf32> to vector<16x1xf32>
    %cst_205 = arith.constant 6.400000e+01 : f32
    %422 = vector.broadcast %cst_205 : f32 to vector<16x1xf32>
    %423 = arith.divf %421, %422 : vector<16x1xf32>
    %cst_206 = arith.constant 9.99999974E-6 : f32
    %424 = vector.broadcast %cst_206 : f32 to vector<16x1xf32>
    %425 = arith.addf %423, %424 : vector<16x1xf32>
    %426 = math.rsqrt %425 : vector<16x1xf32>
    %427 = vector.broadcast %426 : vector<16x1xf32> to vector<16x64xf32>
    %428 = arith.mulf %418, %427 : vector<16x64xf32>
    %429 = vector.broadcast %410 : vector<1x64xf32> to vector<16x64xf32>
    %430 = arith.mulf %428, %429 : vector<16x64xf32>
    %431 = vector.broadcast %411 : vector<1x64xf32> to vector<16x64xf32>
    %432 = arith.addf %430, %431 : vector<16x64xf32>
    %433 = arith.truncf %409 : vector<16x64xf32> to vector<16x64xbf16>
    %c0_207 = arith.constant 0 : index
    %c0_208 = arith.constant 0 : index
    %434 = vector.load %arg11[%c0_207, %c0_208] : memref<64x128xbf16, #tpu.memory_space<vmem>>, vector<64x128xbf16>
    %cst_209 = arith.constant dense<0.000000e+00> : vector<16x128xf32>
    %435 = tpu.matmul %433, %434, %cst_209 {dimension_numbers = #tpu.dot_dimension_numbers<[1], [0], [0], [1], [0, 0, 1, 1], [], []>} : vector<16x64xbf16>, vector<64x128xbf16>, vector<16x128xf32> -> vector<16x128xf32>
    %c0_210 = arith.constant 0 : index
    %c0_211 = arith.constant 0 : index
    %436 = vector.load %arg12[%c0_210, %c0_211] : memref<1x128xf32, #tpu.memory_space<vmem>>, vector<1x128xf32>
    %437 = vector.broadcast %436 : vector<1x128xf32> to vector<16x128xf32>
    %438 = arith.addf %435, %437 : vector<16x128xf32>
    %cst_212 = arith.constant 0.000000e+00 : f32
    %439 = vector.broadcast %cst_212 : f32 to vector<16x128xf32>
    %440 = arith.maximumf %438, %439 : vector<16x128xf32>
    %441 = arith.truncf %440 : vector<16x128xf32> to vector<16x128xbf16>
    %c0_213 = arith.constant 0 : index
    %c0_214 = arith.constant 0 : index
    %442 = vector.load %arg13[%c0_213, %c0_214] : memref<128x64xbf16, #tpu.memory_space<vmem>>, vector<128x64xbf16>
    %cst_215 = arith.constant dense<0.000000e+00> : vector<16x64xf32>
    %443 = tpu.matmul %441, %442, %cst_215 {dimension_numbers = #tpu.dot_dimension_numbers<[1], [0], [0], [1], [0, 0, 1, 1], [], []>} : vector<16x128xbf16>, vector<128x64xbf16>, vector<16x64xf32> -> vector<16x64xf32>
    %c0_216 = arith.constant 0 : index
    %c0_217 = arith.constant 0 : index
    %444 = vector.load %arg14[%c0_216, %c0_217] : memref<1x64xf32, #tpu.memory_space<vmem>>, vector<1x64xf32>
    %445 = vector.broadcast %444 : vector<1x64xf32> to vector<16x64xf32>
    %446 = arith.addf %443, %445 : vector<16x64xf32>
    %c0_218 = arith.constant 0 : index
    %c0_219 = arith.constant 0 : index
    %447 = vector.load %arg15[%c0_218, %c0_219] : memref<1x64xf32, #tpu.memory_space<vmem>>, vector<1x64xf32>
    %c0_220 = arith.constant 0 : index
    %c0_221 = arith.constant 0 : index
    %448 = vector.load %arg16[%c0_220, %c0_221] : memref<1x64xf32, #tpu.memory_space<vmem>>, vector<1x64xf32>
    %449 = arith.addf %432, %446 : vector<16x64xf32>
    %cst_222 = arith.constant dense<0.000000e+00> : vector<16xf32>
    %450 = vector.multi_reduction <add>, %449, %cst_222 [1] : vector<16x64xf32> to vector<16xf32>
    %451 = vector.shape_cast %450 : vector<16xf32> to vector<16x1xf32>
    %cst_223 = arith.constant 6.400000e+01 : f32
    %452 = vector.broadcast %cst_223 : f32 to vector<16x1xf32>
    %453 = arith.divf %451, %452 : vector<16x1xf32>
    %454 = vector.broadcast %453 : vector<16x1xf32> to vector<16x64xf32>
    %455 = arith.subf %449, %454 : vector<16x64xf32>
    %456 = arith.mulf %455, %455 : vector<16x64xf32>
    %cst_224 = arith.constant dense<0.000000e+00> : vector<16xf32>
    %457 = vector.multi_reduction <add>, %456, %cst_224 [1] : vector<16x64xf32> to vector<16xf32>
    %458 = vector.shape_cast %457 : vector<16xf32> to vector<16x1xf32>
    %cst_225 = arith.constant 6.400000e+01 : f32
    %459 = vector.broadcast %cst_225 : f32 to vector<16x1xf32>
    %460 = arith.divf %458, %459 : vector<16x1xf32>
    %cst_226 = arith.constant 9.99999974E-6 : f32
    %461 = vector.broadcast %cst_226 : f32 to vector<16x1xf32>
    %462 = arith.addf %460, %461 : vector<16x1xf32>
    %463 = math.rsqrt %462 : vector<16x1xf32>
    %464 = vector.broadcast %463 : vector<16x1xf32> to vector<16x64xf32>
    %465 = arith.mulf %455, %464 : vector<16x64xf32>
    %466 = vector.broadcast %447 : vector<1x64xf32> to vector<16x64xf32>
    %467 = arith.mulf %465, %466 : vector<16x64xf32>
    %468 = vector.broadcast %448 : vector<1x64xf32> to vector<16x64xf32>
    %469 = arith.addf %467, %468 : vector<16x64xf32>
    %470 = arith.truncf %469 : vector<16x64xf32> to vector<16x64xbf16>
    %c0_227 = arith.constant 0 : index
    %c0_228 = arith.constant 0 : index
    %c0_229 = arith.constant 0 : index
    %471 = vector.load %arg17[%c0_227, %c0_228, %c0_229] : memref<1x16x64xbf16, #tpu.memory_space<vmem>>, vector<1x16x64xbf16>
    %472 = vector.shape_cast %471 : vector<1x16x64xbf16> to vector<16x64xbf16>
    %473 = vector.shape_cast %470 : vector<16x64xbf16> to vector<1x16x64xbf16>
    tpu.vector_store %arg17[%c0_227, %c0_228, %c0_229], %473 {strides = array<i32>} : memref<1x16x64xbf16, #tpu.memory_space<vmem>>, vector<1x16x64xbf16>,
    return
  }
  func.func @transform_0(%arg0: i32) -> (i32, i32, i32) {
    %c0_i32 = arith.constant 0 : i32
    %c0_i32_0 = arith.constant 0 : i32
    %c0_i32_1 = arith.constant 0 : i32
    return %arg0, %c0_i32, %c0_i32_0 : i32, i32, i32
  }
  func.func @transform_1(%arg0: i32) -> (i32, i32, i32) {
    %c0_i32 = arith.constant 0 : i32
    %c0_i32_0 = arith.constant 0 : i32
    %c0_i32_1 = arith.constant 0 : i32
    return %arg0, %c0_i32, %c0_i32_0 : i32, i32, i32
  }
  func.func @transform_2(%arg0: i32) -> (i32, i32, i32) {
    %c0_i32 = arith.constant 0 : i32
    %c0_i32_0 = arith.constant 0 : i32
    %c0_i32_1 = arith.constant 0 : i32
    %c0_i32_2 = arith.constant 0 : i32
    return %c0_i32, %c0_i32_0, %c0_i32_1 : i32, i32, i32
  }
  func.func @transform_3(%arg0: i32) -> (i32, i32, i32) {
    %c0_i32 = arith.constant 0 : i32
    %c0_i32_0 = arith.constant 0 : i32
    %c0_i32_1 = arith.constant 0 : i32
    %c0_i32_2 = arith.constant 0 : i32
    return %c0_i32, %c0_i32_0, %c0_i32_1 : i32, i32, i32
  }
  func.func @transform_4(%arg0: i32) -> (i32, i32) {
    %c0_i32 = arith.constant 0 : i32
    %c0_i32_0 = arith.constant 0 : i32
    %c0_i32_1 = arith.constant 0 : i32
    return %c0_i32, %c0_i32_0 : i32, i32
  }
  func.func @transform_5(%arg0: i32) -> (i32, i32) {
    %c0_i32 = arith.constant 0 : i32
    %c0_i32_0 = arith.constant 0 : i32
    %c0_i32_1 = arith.constant 0 : i32
    return %c0_i32, %c0_i32_0 : i32, i32
  }
  func.func @transform_6(%arg0: i32) -> (i32, i32) {
    %c0_i32 = arith.constant 0 : i32
    %c0_i32_0 = arith.constant 0 : i32
    %c0_i32_1 = arith.constant 0 : i32
    return %c0_i32, %c0_i32_0 : i32, i32
  }
  func.func @transform_7(%arg0: i32) -> (i32, i32) {
    %c0_i32 = arith.constant 0 : i32
    %c0_i32_0 = arith.constant 0 : i32
    %c0_i32_1 = arith.constant 0 : i32
    return %c0_i32, %c0_i32_0 : i32, i32
  }
  func.func @transform_8(%arg0: i32) -> (i32, i32) {
    %c0_i32 = arith.constant 0 : i32
    %c0_i32_0 = arith.constant 0 : i32
    %c0_i32_1 = arith.constant 0 : i32
    return %c0_i32, %c0_i32_0 : i32, i32
  }
  func.func @transform_9(%arg0: i32) -> (i32, i32) {
    %c0_i32 = arith.constant 0 : i32
    %c0_i32_0 = arith.constant 0 : i32
    %c0_i32_1 = arith.constant 0 : i32
    return %c0_i32, %c0_i32_0 : i32, i32
  }
  func.func @transform_10(%arg0: i32) -> (i32, i32) {
    %c0_i32 = arith.constant 0 : i32
    %c0_i32_0 = arith.constant 0 : i32
    %c0_i32_1 = arith.constant 0 : i32
    return %c0_i32, %c0_i32_0 : i32, i32
  }
  func.func @transform_11(%arg0: i32) -> (i32, i32) {
    %c0_i32 = arith.constant 0 : i32
    %c0_i32_0 = arith.constant 0 : i32
    %c0_i32_1 = arith.constant 0 : i32
    return %c0_i32, %c0_i32_0 : i32, i32
  }
  func.func @transform_12(%arg0: i32) -> (i32, i32) {
    %c0_i32 = arith.constant 0 : i32
    %c0_i32_0 = arith.constant 0 : i32
    %c0_i32_1 = arith.constant 0 : i32
    return %c0_i32, %c0_i32_0 : i32, i32
  }
  func.func @transform_13(%arg0: i32) -> (i32, i32) {
    %c0_i32 = arith.constant 0 : i32
    %c0_i32_0 = arith.constant 0 : i32
    %c0_i32_1 = arith.constant 0 : i32
    return %c0_i32, %c0_i32_0 : i32, i32
  }
  func.func @transform_14(%arg0: i32) -> (i32, i32) {
    %c0_i32 = arith.constant 0 : i32
    %c0_i32_0 = arith.constant 0 : i32
    %c0_i32_1 = arith.constant 0 : i32
    return %c0_i32, %c0_i32_0 : i32, i32
  }
  func.func @transform_15(%arg0: i32) -> (i32, i32) {
    %c0_i32 = arith.constant 0 : i32
    %c0_i32_0 = arith.constant 0 : i32
    %c0_i32_1 = arith.constant 0 : i32
    return %c0_i32, %c0_i32_0 : i32, i32
  }
  func.func @transform_16(%arg0: i32) -> (i32, i32, i32) {
    %c0_i32 = arith.constant 0 : i32
    %c0_i32_0 = arith.constant 0 : i32
    %c0_i32_1 = arith.constant 0 : i32
    return %arg0, %c0_i32, %c0_i32_0 : i32, i32, i32
  }
}

</mosaic_0001>

<bundles_post_ra>
// kernel: electra_generator_forward.7
= control target key start
LH: loop header
LB: loop body
LE: loop exit
PB: predicated region body
PF: predicated region fallthrough
CT: control target
= control target key end

     0   :  { %9 = vsyncpa [#allocation3], 0  ;;  %s848_s0 = inlined_call_operand.vmem [shape: bf16[32,64], index: 0, kind: input, shape index: {}]   ;;  %s849_s1 = inlined_call_operand.vmem [shape: bf16[64,128], index: 1, kind: input, shape index: {}]   ;;  %s850_s2 = inlined_call_operand.vmem [shape: f32[1,128], index: 2, kind: input, shape index: {}]   ;;  %s851_s3 = inlined_call_operand.vmem [shape: f32[32,1], index: 3, kind: input, shape index: {}]   ;;  %s852_s4 = inlined_call_operand.hbm [shape: f32[32,128], index: 4, kind: output, shape index: {}]  }
   0x1   :  { %11 = vsyncpa [#allocation3 + $0x1], 0  ;;  %s717_s15 = smov 0   ;;  %s719_s16 = smov 0  }
   0x2   :  { %s721_s17 = smov 0   ;;  %s723_s18 = smov 0  }
   0x3   :  { %s725_s19 = smov 0   ;;  %s727_s20 = smov 0  }
   0x4 LB: > { %s500_s21 = sadd.s32 4294967295, %s684_s20   ;;  %s501_s22 = sadd.s32 4294967294, %s684_s20   ;;  %s684_s20 = sphi %s727_s20, %s17_s20   ;;  %s680_s19 = sphi %s725_s19, %s859_s19   ;;  %s676_s18 = sphi %s723_s18, %s858_s18   ;;  %s672_s17 = sphi %s721_s17, %s857_s17   ;;  %s668_s16 = sphi %s719_s16, %s856_s16   ;;  %s664_s15 = sphi %s717_s15, %s855_s15  }
   0x5   : > { %s29_s23 = sadd.s32 1, %s680_s19  ;;  %s142_s24 = sadd.s32 1, %s672_s17 }
   0x6   : > { %p31_p0 = scmp.ge.s32.totalorder %s29_s23, 2  ;;  %p152_p1 = scmp.ne.s32.totalorder %s672_s17, %s668_s16 }
   0x7   : > { %p153_p2 = scmp.eq.s32.totalorder %s500_s21, 1  ;;  %p158_p3 = scmp.ne.s32.totalorder %s668_s16, %s664_s15 }
   0x8   : > { %s861_s23 = smov (%p31_p0, %s29_s23), 0  ;;  %p159_p5 = scmp.eq.s32.totalorder %s501_s22, 1 }
   0x9   : > { %p757_p4 = por %p153_p2, %p152_p1  ;;  %s137_s26 = ssub.s32 %s680_s19, %s861_s23 }
   0xa   : > { %p506_p6 = scmp.ge.s32.totalorder %s684_s20, 1  ;;  %p140_p7 = scmp.eq.s32.totalorder %s137_s26, 0 }
   0xb   : > { %p764_p8 = por %p159_p5, %p158_p3  ;;  %p208_p9 = scmp.lt.s32.totalorder %s684_s20, 3 }
   0xc   : > { %s770_s28 = scalar_select %p140_p7, %s672_s17, %s142_s24  }
   0xd   : > { %p209_p10 = pnand %p506_p6, %p208_p9 }
   0xe   : > { %s508_s7 = sshll.u32 (!%p209_p10), %s676_s18, 1  ;;  %s243_s30 = sand.u32 (!%p209_p10), 1, %s668_s16  }
   0xf   : > { %212 = sbr.rel (%p209_p10) target bundleno = 252 (0xfc), region = 36  ;;  %p247_p11 = scmp.lt.s32.totalorder (!%p209_p10), %s508_s7, 3 }
  0x10   : > { %s689_s21 = smov (!%p209_p10), [#allocation2]  }
  0x11   : > { %s612_s22 = sshll.u32 (!%p209_p10), %s689_s21, 4  ;;  %s613_s22 = int_to_ptr.vmem [resolvable:$false] %s612_s22 }
  0x14   : > { %v603_v0 = vld [vmem:[%s849_s1 + $0x18] sm:$0xff]   ;;  %v686_v1 = vmov 0.0   ;;  %v604_v2 = vld [vmem:[%s849_s1 + $0x10] sm:$0xff]   ;;  %vm687_vm0 = vmmov 0   ;;  %s863_s7 = smov (!%p247_p11, %s508_s7), 3  ;;  %v688_v3 = vmov 0  }
  0x15   : > { %530 = vmatprep.subr.bf16.mxu0 %v686_v1  ;;  %538 = vmatprep.mubr.msk.bf16.mxu0 %vm687_vm0, %v686_v1  ;;  %v605_v4 = vld [vmem:[%s849_s1 + $0x8] sm:$0xff]   ;;  %s509_s10 = sshll.u32 %s863_s7, 2  ;;  %s511_s11 = sshll.u32 %s863_s7, 3  ;;  %v606_v5 = vld [vmem:[%s849_s1] sm:$0xff]   ;;  %vm313_vm1 = vcmask 523264  }
  0x16   : > { %531 = vmatpush3.bf16.msra.mxu0 %v603_v0  ;;  %602 = vset.pattern.permute.xlu0 %v688_v3  ;;  %s250_s14 = scalar_lea.vmem %s848_s0, %s509_s10  ;;  %s263_s24 = scalar_lea.vmem %s851_s3, %s511_s11  ;;  %v512_v9 = vld [vmem:[%s850_s2] ss:$0 sm:$0xff] }
  0x17   : > { %532 = vmatprep.subr.bf16.mxu0 %v686_v1  ;;  %v358_v6 = vld [vmem:[%s263_s24] sm:$0xff]  ;;  %v359_v7 = vld [vmem:[%s263_s24 + $0x8] sm:$0xff]  ;;  %s507_s7 = sshll.u32 %s243_s30, 4  ;;  %s524_s10 = sshll.u32 %s676_s18, 8 }
  0x18   : > { %362 = vperm.xlu0 %602, %v358_v6   ;;  %v607_v8 = vld [vmem:[%s250_s14] sm:$0xff]   ;;  %s245_s8 = scalar_lea.vmem [#allocation2], %s507_s7  ;;  %s801_s13 = scalar_lea.hbm %s852_s4, %s524_s10 }
  0x19   : > { %s389_s9 = sshll.u32 %s245_s8, 4  ;;  %s803_s14 = scalar_lea.sflag [#allocation3], %s243_s30  ;;  %s796_s9 = int_to_ptr.vmem [resolvable:$true] %s389_s9 }
  0x1a   : > { %533 = vmatpush3.bf16.msra.mxu0 %v604_v2  ;;  %s608_s18 = scalar_lea.vmem %s796_s9, 256  ;;  %s614_s24 = scalar_lea.vmem %s613_s22, 512 }
  0x1b   : > { %534 = vmatprep.subr.bf16.mxu0 %v686_v1  ;;  %p609_p12 = scmp.ne.s32.totalorder %s796_s9, %s608_s18  ;;  %p615_p1 = scmp.lt.s32.totalorder %s796_s9, %s613_s22 }
  0x1c   : > { %367 = vperm.xlu0 %602, %v359_v7   ;;  %p616_p2 = scmp.lt.s32.totalorder %s614_s24, %s608_s18 }
  0x1d   : > { %p610_p13 = pnand %p609_p12, %p757_p4 }
  0x1e   : > { %535 = vmatpush3.bf16.msra.mxu0 %v605_v4  ;;  %p617_p3 = por %p616_p2, %p615_p1 }
  0x1f   : > { %536 = vmatprep.subr.bf16.mxu0 %v686_v1  ;;  %p611_p0 = pneg %p610_p13 }
  0x21   : > { %p618_p5 = pnand %p617_p3, %p611_p0 }
  0x22   : > { %537 = vmatpush3.bf16.msra.mxu0 %v606_v5 }
  0x25   : > { %539 = vmatmul.mubr.msk.bf16.vlgmr.msra.gmra.mxu0 %vm313_vm1, %v607_v8 }
  0x93   : > { %v363_v10 = vpop.permute.xlu0 %362 }
  0x97   : > { %v368_v17 = vpop.permute.xlu0 %367 }
  0xe5   : > { %v351_v11 = vpop.f32.mrf.mxu0 }
  0xe6   : > { %v352_v12 = vadd.f32 %v512_v9, %v351_v11 }
  0xe7   : > { %v540_v13 = vpop.f32.mrf.mxu0 }
  0xe8   : > { %v370_v14 = vsub.f32 %v352_v12, %v363_v10 }
  0xe9   : > { %v354_v15 = vpop.f32.mrf.mxu0 }
  0xea   : > { %372 = vst [vmem:[%s245_s8] sm:$0xff] %v370_v14  ;;  %v355_v16 = vadd.f32 %v512_v9, %v354_v15 }
  0xeb   : > { %v541_v18 = vpop.f32.mrf.mxu0 }
  0xec   : > { %v371_v19 = vsub.f32 %v355_v16, %v368_v17 }
  0xee   : > { %373 = vst [vmem:[%s245_s8 + $0x8] sm:$0xff] %v371_v19 }
  0xef   : > { %621 = shalt.err (!%p618_p5)
}
  0xf0   : > { %s622_s26 = scalar_lea.hbm %s801_s13, 256  ;;  %s626_s5 = scalar_lea.hbm %s852_s4, 512 }
  0xf1   : > { %p623_p6 = scmp.ne.s32.totalorder %s801_s13, %s622_s26  ;;  %p627_p10 = scmp.lt.s32.totalorder %s801_s13, %s852_s4 }
  0xf2   : > { %p628_p11 = scmp.lt.s32.totalorder %s626_s5, %s622_s26 }
  0xf3   : > { %p624_p7 = pnand %p623_p6, %p757_p4 }
  0xf4   : > { %p629_p12 = por %p628_p11, %p627_p10 }
  0xf5   : > { %p625_p9 = pneg %p624_p7 }
  0xf7   : > { %p630_p13 = pnand %p629_p12, %p625_p9 }
  0xf9   : > { %633 = shalt.err (!%p630_p13)
}
  0xfa   : > { %s690_s8 = smov 128   ;;  %s691_s10 = smov 8  }
  0xfb   : > { %542 = dma.vmem_to_hbm [thread:$0]  (%p757_p4), %s796_s9, 256, %s801_s13, %s803_s14, %s690_s8, %s690_s8, %s691_s10  }
  0xfc PF: > { %p548_p0 = scmp.ge.s32.totalorder %s684_s20, 2  ;;  %s404_s11 = sand.u32 1, %s664_s15  }
  0xfd   : > { %s405_s12 = scalar_lea.sflag [#allocation3], %s404_s11 }
  0xfe   : > { %p545_p1 = pnand %p548_p0, %p764_p8 }
 0x100   : > { %p546_p2 = pneg %p545_p1 }
 0x102   : > { %659 = dma.done.wait (%p546_p2), %s405_s12, 256  }
 0x103   : > { %661 = vsyncadd (%p546_p2), %s405_s12, 4294967040  ;;  %s17_s20 = sadd.s32 1, %s684_s20   ;;  %s855_s15 = smov %s668_s16 }
 0x104   : > { %p14_p3 = scmp.ge.s32.totalorder %s17_s20, 4   ;;  %s856_s16 = smov %s672_s17 }
 0x105   : > { %s857_s17 = smov %s770_s28  ;;  %s858_s18 = smov %s680_s19 }
 0x106   : > { %s859_s19 = smov %s861_s23  ;;  %16 = sbr.rel (!%p14_p3) target bundleno = 4 (0x4), region = 80 }
 0x10b   :  { %410 = vsyncpa [#allocation3], 1 }
 0x10c   :  { %412 = vsyncpa [#allocation3 + $0x1], 1 }

// kernel: electra_generator_forward.6
= control target key start
LH: loop header
LB: loop body
LE: loop exit
PB: predicated region body
PF: predicated region fallthrough
CT: control target
= control target key end

     0   :  { %s602_s12 = smov 0   ;;  %s604_s13 = smov 0   ;;  %s664_s0 = inlined_call_operand.vmem [shape: bf16[32,64], index: 0, kind: input, shape index: {}]   ;;  %s665_s1 = inlined_call_operand.vmem [shape: bf16[64,128], index: 1, kind: input, shape index: {}]   ;;  %s666_s2 = inlined_call_operand.vmem [shape: f32[1,128], index: 2, kind: input, shape index: {}]   ;;  %s667_s3 = inlined_call_operand.vmem [shape: f32[32,1], index: 3, kind: output, shape index: {}]  }
   0x1   :  { %s606_s14 = smov 0  }
   0x2 LB: > { %s25_s15 = sadd.s32 1, %s572_s13  ;;  %p476_p0 = scmp.ge.s32.totalorder %s576_s14, 1  ;;  %s576_s14 = sphi %s606_s14, %s13_s14   ;;  %s572_s13 = sphi %s604_s13, %s669_s13   ;;  %s568_s12 = sphi %s602_s12, %s668_s12  }
   0x3   : > { %p27_p1 = scmp.ge.s32.totalorder %s25_s15, 2  ;;  %p167_p2 = scmp.lt.s32.totalorder %s576_s14, 3 }
   0x5   : > { %s671_s15 = smov (%p27_p1, %s25_s15), 0  ;;  %p168_p3 = pnand %p476_p0, %p167_p2 }
   0x6   : > { %s477_s20 = sshll.u32 (!%p168_p3), %s568_s12, 1 }
   0x7   : > { %171 = sbr.rel (%p168_p3) target bundleno = 677 (0x2a5), region = 32  ;;  %p199_p4 = scmp.lt.s32.totalorder (!%p168_p3), %s477_s20, 3 }
   0xc   : > { %v537_v0 = vld [vmem:[%s665_s1 + $0x18] sm:$0xff]   ;;  %v578_v1 = vmov 0.0   ;;  %v538_v2 = vld [vmem:[%s665_s1 + $0x10] sm:$0xff]   ;;  %vm579_vm0 = vmmov 0   ;;  %s673_s20 = smov (!%p199_p4, %s477_s20), 3  ;;  %v539_v3 = vld [vmem:[%s665_s1 + $0x8] sm:$0xff]  }
   0xd   : > { %495 = vmatprep.subr.bf16.mxu0 %v578_v1  ;;  %503 = vmatprep.mubr.msk.bf16.mxu0 %vm579_vm0, %v578_v1  ;;  %s478_s23 = sshll.u32 %s673_s20, 2  ;;  %v540_v4 = vld [vmem:[%s665_s1] sm:$0xff]   ;;  %vm264_vm1 = vcmask 523264   ;;  %vm313_vm2 = vcmask 7168   ;;  %v580_v6 = vmov -inf   ;;  %v581_v14 = vmov 0  }
   0xe   : > { %496 = vmatpush3.bf16.msra.mxu0 %v537_v0  ;;  %s202_s26 = scalar_lea.vmem %s664_s0, %s478_s23  ;;  %314 = vst.msk [vmem:[#allocation2] sm:$0xff] %vm313_vm2, %v580_v6  ;;  %315 = vst.msk [vmem:[#allocation2 + $0x8] sm:$0xff] %vm313_vm2, %v580_v6  ;;  %v481_v7 = vld [vmem:[%s666_s2] ss:$0 sm:$0xff]  ;;  %535 = vset.pattern.permute.xlu1 %v581_v14  ;;  %s480_s4 = sshll.u32 %s673_s20, 3 }
   0xf   : > { %497 = vmatprep.subr.bf16.mxu0 %v578_v1  ;;  %v541_v5 = vld [vmem:[%s202_s26] sm:$0xff]   ;;  %316 = vst.msk [vmem:[#allocation3] sm:$0xff] %vm313_vm2, %v578_v1  ;;  %317 = vst.msk [vmem:[#allocation3 + $0x8] sm:$0xff] %vm313_vm2, %v578_v1  ;;  %536 = vset.pattern.permute.xlu0 %v581_v14  ;;  %s215_s7 = scalar_lea.vmem %s667_s3, %s480_s4 }
  0x12   : > { %498 = vmatpush3.bf16.msra.mxu0 %v538_v2 }
  0x13   : > { %499 = vmatprep.subr.bf16.mxu0 %v578_v1 }
  0x15   : > { %v318_v15 = vld [vmem:[#allocation2] sm:$0xff]  ;;  %v319_v18 = vld [vmem:[#allocation2 + $0x8] sm:$0xff] }
  0x16   : > { %500 = vmatpush3.bf16.msra.mxu0 %v539_v3  ;;  %v326_v34 = vld [vmem:[#allocation3] sm:$0xff]  ;;  %v327_v38 = vld [vmem:[#allocation3 + $0x8] sm:$0xff] }
  0x17   : > { %501 = vmatprep.subr.bf16.mxu0 %v578_v1 }
  0x1a   : > { %502 = vmatpush3.bf16.msra.mxu0 %v540_v4 }
  0x1d   : > { %504 = vmatmul.mubr.msk.bf16.vlgmr.msra.gmra.mxu0 %vm264_vm1, %v541_v5 }
  0xdd   : > { %v302_v8 = vpop.f32.mrf.mxu0 }
  0xde   : > { %v303_v9 = vadd.f32 %v481_v7, %v302_v8 }
  0xdf   : > { %v505_v10 = vpop.f32.mrf.mxu0 }
  0xe0   : > { %320 = vmax.xlane.f32.xlu0 %v303_v9 }
  0xe1   : > { %v305_v11 = vpop.f32.mrf.mxu0 }
  0xe2   : > { %v306_v12 = vadd.f32 %v481_v7, %v305_v11 }
  0xe3   : > { %v506_v13 = vpop.f32.mrf.mxu0 }
  0xe4   : > { %322 = vmax.xlane.f32.xlu0 %v306_v12 }
 0x169   : > { %v321_v16 = vpop.xlane.xlu0 %320 }
 0x16a   : > { %v324_v17 = vmax.f32 %v318_v15, %v321_v16 }
 0x16c   : > { %v328_v19 = vsub.f32 %v318_v15, %v324_v17  ;;  %361 = vst.msk [vmem:[#allocation2] sm:$0xff] %vm313_vm2, %v324_v17  ;;  %338 = vperm.xlu1 %535, %v324_v17  }
 0x16d   : > { %v323_v20 = vpop.xlane.xlu0 %322 }
 0x16e   : > { %v325_v21 = vmax.f32 %v319_v18, %v323_v20  ;;  %v330_v31 = vmul.f32 1.442695, %v328_v19 }
 0x170   : > { %v329_v22 = vsub.f32 %v319_v18, %v325_v21  ;;  %362 = vst.msk [vmem:[#allocation2 + $0x8] sm:$0xff] %vm313_vm2, %v325_v21  ;;  %343 = vperm.xlu1 %535, %v325_v21  }
 0x172   : > { %v332_v32 = vmul.f32 1.442695, %v329_v22 }
 0x173   : > { %v366_v47 = vld [vmem:[#allocation2] sm:$0xff] }
 0x177   : > { %v367_v51 = vld [vmem:[#allocation2 + $0x8] sm:$0xff] }
 0x1e7   : > { %v339_v23 = vpop.permute.xlu1 %338 }
 0x1e8   : > { %v346_v24 = vsub.f32 %v303_v9, %v339_v23 }
 0x1ea   : > { %v348_v25 = vmul.f32 1.442695, %v346_v24 }
 0x1eb   : > { %v344_v26 = vpop.permute.xlu1 %343 }
 0x1ec   : > { %542 = vpow2.f32 %v348_v25  ;;  %v347_v27 = vsub.f32 %v306_v12, %v344_v26 }
 0x1ee   : > { %v350_v28 = vmul.f32 1.442695, %v347_v27 }
 0x1f0   : > { %544 = vpow2.f32 %v350_v28 }
 0x1f1   : > { %546 = vpow2.f32 %v330_v31 }
 0x1f2   : > { %548 = vpow2.f32 %v332_v32 }
 0x1f9   : > { %v543_v29 = vpop.eup %542 }
 0x1fa   : > { %352 = vadd.xlane.f32.xlu0 %v543_v29 }
 0x1fd   : > { %v545_v30 = vpop.eup %544 }
 0x1fe   : > { %354 = vadd.xlane.f32.xlu1 %v545_v30  ;;  %v547_v33 = vpop.eup %546 }
 0x1ff   : > { %v334_v35 = vmul.f32 %v547_v33, %v326_v34  ;;  %v549_v36 = vpop.eup %548 }
 0x200   : > { %v335_v40 = vmul.f32 %v549_v36, %v327_v38 }
 0x283   : > { %v353_v37 = vpop.xlane.xlu0 %352 }
 0x284   : > { %v356_v39 = vadd.f32 %v353_v37, %v334_v35 }
 0x286   : > { %359 = vst.msk [vmem:[#allocation3] sm:$0xff] %vm313_vm2, %v356_v39 }
 0x287   : > { %v355_v41 = vpop.xlane.xlu1 %354 }
 0x288   : > { %v357_v42 = vadd.f32 %v355_v41, %v335_v40 }
 0x28a   : > { %360 = vst.msk [vmem:[#allocation3 + $0x8] sm:$0xff] %vm313_vm2, %v357_v42 }
 0x28d   : > { %v368_v43 = vld [vmem:[#allocation3] sm:$0xff] }
 0x28e   : > { %550 = vlog2.f32 %v368_v43 }
 0x291   : > { %v369_v44 = vld [vmem:[#allocation3 + $0x8] sm:$0xff] }
 0x292   : > { %552 = vlog2.f32 %v369_v44 }
 0x29b   : > { %v551_v45 = vpop.eup %550 }
 0x29c   : > { %v371_v46 = vmul.f32 0.6931472, %v551_v45 }
 0x29e   : > { %v374_v48 = vadd.f32 %v371_v46, %v366_v47 }
 0x29f   : > { %v553_v49 = vpop.eup %552 }
 0x2a0   : > { %376 = vst.msk [vmem:[%s215_s7] sm:$0xff] %vm313_vm2, %v374_v48  ;;  %v373_v50 = vmul.f32 0.6931472, %v553_v49 }
 0x2a2   : > { %v375_v52 = vadd.f32 %v373_v50, %v367_v51 }
 0x2a4   : > { %377 = vst.msk [vmem:[%s215_s7 + $0x8] sm:$0xff] %vm313_vm2, %v375_v52 }
 0x2a5 PF: > { %s13_s14 = sadd.s32 1, %s576_s14   ;;  %s668_s12 = smov %s572_s13 }
 0x2a6   : > { %p10_p5 = scmp.ge.s32.totalorder %s13_s14, 4   ;;  %s669_s13 = smov %s671_s15 }
 0x2a8   :  { %12 = sbr.rel (!%p10_p5) target bundleno = 2 (0x2), region = 76 }

// kernel: electra_generator_forward.4
= control target key start
LH: loop header
LB: loop body
LE: loop exit
PB: predicated region body
PF: predicated region fallthrough
CT: control target
= control target key end

     0   :  { %s7033_s21 = smov 0   ;;  %s8590_s0 = inlined_call_operand.vmem [shape: bf16[2,16,64], index: 0, kind: input, shape index: {}]   ;;  %s8591_s1 = inlined_call_operand.vmem [shape: f32[2,1,16], index: 1, kind: input, shape index: {}]   ;;  %s8592_s2 = inlined_call_operand.vmem [shape: f32[4,64,16], index: 2, kind: input, shape index: {}]   ;;  %s8593_s3 = inlined_call_operand.vmem [shape: f32[4,16,64], index: 3, kind: input, shape index: {}]   ;;  %s8594_s4 = inlined_call_operand.vmem [shape: bf16[576,64], index: 4, kind: input, shape index: {}]   ;;  %s8595_s5 = inlined_call_operand.vmem [shape: bf16[576,64], index: 5, kind: input, shape index: {}]   ;;  %s8596_s6 = inlined_call_operand.vmem [shape: bf16[576,64], index: 6, kind: input, shape index: {}]   ;;  %s8597_s7 = inlined_call_operand.vmem [shape: bf16[576,64], index: 7, kind: input, shape index: {}]   ;;  %s8598_s8 = inlined_call_operand.vmem [shape: f32[1,64], index: 8, kind: input, shape index: {}]   ;;  %s8599_s9 = inlined_call_operand.vmem [shape: f32[1,64], index: 9, kind: input, shape index: {}]   ;;  %s8600_s10 = inlined_call_operand.vmem [shape: bf16[64,128], index: 10, kind: input, shape index: {}]   ;;  %s8601_s11 = inlined_call_operand.vmem [shape: f32[1,128], index: 11, kind: input, shape index: {}]   ;;  %s8602_s12 = inlined_call_operand.vmem [shape: bf16[128,64], index: 12, kind: input, shape index: {}]   ;;  %s8603_s13 = inlined_call_operand.vmem [shape: f32[1,64], index: 13, kind: input, shape index: {}]   ;;  %s8604_s14 = inlined_call_operand.vmem [shape: f32[1,64], index: 14, kind: input, shape index: {}]   ;;  %s8605_s15 = inlined_call_operand.vmem [shape: f32[1,64], index: 15, kind: input, shape index: {}]   ;;  %s8606_s16 = inlined_call_operand.vmem [shape: bf16[2,16,64], index: 16, kind: output, shape index: {}]  }
   0x1   :  { %8607 = sst [smem:[#allocation2_spill]] %s8590_s0 }
   0x2 LB: > { %s5579_s22 = sadd.s32 4294967295, %s6940_s21   ;;  %p5583_p0 = scmp.ge.s32.totalorder %s6940_s21, 1  ;;  %s6940_s21 = sphi %s7033_s21, %s26_s21  }
   0x3   : > { %p470_p1 = scmp.lt.s32.totalorder %s6940_s21, 3 }
   0x5   : > { %p471_p2 = pnand %p5583_p0, %p470_p1 }
   0x6   : > { %p523_p3 = scmp.lt.s32.totalorder (!%p471_p2), %s5579_s22, 1  ;;  %s8608_s19 = sld [smem:[#allocation2_spill]] (!%p471_p2) }
   0x7   : > { %474 = sbr.rel (%p471_p2) target bundleno = 2793 (0xae9), region = 84  ;;  %s6946_s23 = smov (!%p471_p2), 96  }
   0x8   : > { %s6947_s28 = smov (!%p471_p2), 80  }
   0xc   : > { %v6722_v0 = vld [vmem:[%s8594_s4 + $0x78] sm:$0xff]   ;;  %s8614_s22 = smov (!%p523_p3, %s5579_s22), 1  ;;  %v6726_v4 = vld [vmem:[%s8594_s4 + $0x70] sm:$0xff]   ;;  %v6730_v13 = vld [vmem:[%s8594_s4 + $0x68] sm:$0xff]   ;;  %v6942_v43 = vmov 0.0  }
   0xd   : > { %5934 = vmatprep.subr.bf16.mxu0 %v6722_v0  ;;  %v6723_v1 = vld [vmem:[%s8594_s4 + $0xf8] sm:$0xff]   ;;  %s5926_s29 = sshll.u32 %s8614_s22, 3  ;;  %v6727_v6 = vld [vmem:[%s8594_s4 + $0xf0] sm:$0xff]   ;;  %v6731_v14 = vld [vmem:[%s8594_s4 + $0xe8] sm:$0xff]  }
   0xe   : > { %v6724_v2 = vld [vmem:[%s8594_s4 + $0x38] sm:$0xff]   ;;  %5956 = vmatprep.subr.bf16.mxu1 %v6723_v1  ;;  %s527_s20 = scalar_lea.vmem %s8608_s19, %s5926_s29  ;;  %v6728_v9 = vld [vmem:[%s8594_s4 + $0x30] sm:$0xff]   ;;  %v6732_v17 = vld [vmem:[%s8594_s4 + $0x28] sm:$0xff]   ;;  %s6943_s19 = smov 64  }
   0xf   : > { %v6725_v3 = vld [vmem:[%s8594_s4 + $0xb8] sm:$0xff]   ;;  %5935 = vmatpush3.bf16.msra.mxu0 %v6724_v2  ;;  %v5931_v5 = vld [vmem:[%s527_s20] sm:$0xff]   ;;  %v6729_v10 = vld [vmem:[%s8594_s4 + $0xb0] sm:$0xff]   ;;  %s6945_s20 = smov 112  }
  0x10   : > { %5957 = vmatpush3.bf16.msra.mxu1 %v6725_v3  ;;  %v7067_v7 = vunpack.c.l.bf16 %v5931_v5  ;;  %v7069_v8 = vunpack.c.h.bf16 %v5931_v5  ;;  %5936 = vmatprep.subr.bf16.mxu0 %v6726_v4  ;;  %v6733_v22 = vld [vmem:[%s8594_s4 + $0xa8] sm:$0xff]   ;;  %v6734_v25 = vld [vmem:[%s8594_s4 + $0x60] sm:$0xff]   ;;  %v6738_v33 = vld [vmem:[%s8594_s4 + $0x58] sm:$0xff]  }
  0x11   : > { %5958 = vmatprep.subr.bf16.mxu1 %v6727_v6  ;;  %v6735_v26 = vld [vmem:[%s8594_s4 + $0xe0] sm:$0xff]   ;;  %v6739_v34 = vld [vmem:[%s8594_s4 + $0xd8] sm:$0xff]   ;;  %v6742_v41 = vld [vmem:[%s8594_s4 + $0x50] sm:$0xff]  }
  0x12   : > { %v555_v11 = vadd.f32 1.0, %v7067_v7  ;;  %v556_v12 = vadd.f32 1.0, %v7069_v8  ;;  %vm571_vm0 = vcmp.ge.f32.partialorder %v7067_v7, -1.0  ;;  %vm572_vm1 = vcmp.ge.f32.partialorder %v7069_v8, -1.0  ;;  %v6736_v29 = vld [vmem:[%s8594_s4 + $0x20] sm:$0xff]   ;;  %v6740_v37 = vld [vmem:[%s8594_s4 + $0x18] sm:$0xff]  }
  0x13   : > { %5937 = vmatpush3.bf16.msra.mxu0 %v6728_v9  ;;  %vm573_vm2 = vcmp.lt.f32.partialorder %v7067_v7, 1.0  ;;  %vm574_vm3 = vcmp.lt.f32.partialorder %v7069_v8, 1.0  ;;  %v6737_v30 = vld [vmem:[%s8594_s4 + $0xa0] sm:$0xff]   ;;  %v6741_v38 = vld [vmem:[%s8594_s4 + $0x98] sm:$0xff]   ;;  %v6743_v42 = vld [vmem:[%s8594_s4 + $0xd0] sm:$0xff]  }
  0x14   : > { %5959 = vmatpush3.bf16.msra.mxu1 %v6729_v10  ;;  %v557_v15 = vmul.f32 2.5, %v555_v11  ;;  %v558_v16 = vmul.f32 2.5, %v556_v12  ;;  %5938 = vmatprep.subr.bf16.mxu0 %v6730_v13  ;;  %vm7094_vm4 = vmand %vm571_vm0, %vm573_vm2  ;;  %v6744_v52 = vld [vmem:[%s8594_s4 + $0x10] sm:$0xff]   ;;  %v6748_v20 = vld [vmem:[%s8594_s4 + $0x8] sm:$0xff]   ;;  %vm727_vm0 = vcmask 523264   ;;  %vm2002_vm2 = vcmask 130048  }
  0x15   : > { %5960 = vmatprep.subr.bf16.mxu1 %v6731_v14  ;;  %vm7100_vm5 = vmand %vm572_vm1, %vm574_vm3  ;;  %v7146_v44 = vsel %vm7094_vm4, 1.0, %v6942_v43  ;;  %v6745_v53 = vld [vmem:[%s8594_s4 + $0x90] sm:$0xff]   ;;  %v6746_v14 = vld [vmem:[%s8594_s4 + $0x48] sm:$0xff]   ;;  %vm6944_vm1 = vmmov 0  }
  0x16   : > { %v559_v18 = vmax.f32 %v557_v15, 0.0  ;;  %v560_v19 = vmax.f32 %v558_v16, 0.0  ;;  %v7151_v45 = vsel %vm7100_vm5, 1.0, %v6942_v43  ;;  %v6747_v15 = vld [vmem:[%s8594_s4 + $0xc8] sm:$0xff]  }
  0x17   : > { %5939 = vmatpush3.bf16.msra.mxu0 %v6732_v17 }
  0x18   : > { %v561_v23 = vmin.f32 %v559_v18, 5.0  ;;  %v562_v24 = vmin.f32 %v560_v19, 5.0  ;;  %5961 = vmatpush3.bf16.msra.mxu1 %v6733_v22  ;;  %5940 = vmatprep.subr.bf16.mxu0 %v6734_v25  ;;  %v6749_v25 = vld [vmem:[%s8594_s4 + $0x88] sm:$0xff]  }
  0x19   : > { %5962 = vmatprep.subr.bf16.mxu1 %v6735_v26 }
  0x1a   : > { %v563_v27 = vfloor.f32 %v561_v23  ;;  %v564_v28 = vfloor.f32 %v562_v24 }
  0x1b   : > { %5941 = vmatpush3.bf16.msra.mxu0 %v6736_v29 }
  0x1c   : > { %v565_v31 = vmax.f32 %v563_v27, 0.0  ;;  %v566_v32 = vmax.f32 %v564_v28, 0.0  ;;  %5963 = vmatpush3.bf16.msra.mxu1 %v6737_v30  ;;  %5942 = vmatprep.subr.bf16.mxu0 %v6738_v33 }
  0x1d   : > { %5964 = vmatprep.subr.bf16.mxu1 %v6739_v34 }
  0x1e   : > { %v7125_v35 = vmin.f32 %v565_v31, 4.0  ;;  %v7127_v36 = vmin.f32 %v566_v32, 4.0 }
  0x1f   : > { %5943 = vmatpush3.bf16.msra.mxu0 %v6740_v37 }
  0x20   : > { %v569_v39 = vsub.f32 %v561_v23, %v7125_v35  ;;  %v570_v40 = vsub.f32 %v562_v24, %v7127_v36  ;;  %vm645_vm6 = vcmp.eq.f32.partialorder %v7125_v35, 3.0  ;;  %vm646_vm7 = vcmp.eq.f32.partialorder %v7127_v36, 3.0  ;;  %5965 = vmatpush3.bf16.msra.mxu1 %v6741_v38  ;;  %5944 = vmatprep.subr.bf16.mxu0 %v6742_v41 }
  0x21   : > { %5966 = vmatprep.subr.bf16.mxu1 %v6743_v42  ;;  %vm661_vm8 = vcmp.eq.f32.partialorder %v7125_v35, 4.0  ;;  %vm662_vm9 = vcmp.eq.f32.partialorder %v7127_v36, 4.0  ;;  %vm621_vm10 = vcmp.eq.f32.partialorder %v7125_v35, 0.0  ;;  %vm622_vm11 = vcmp.eq.f32.partialorder %v7127_v36, 0.0 }
  0x22   : > { %v581_v46 = vmul.f32 %v569_v39, %v569_v39  ;;  %v582_v47 = vmul.f32 %v570_v40, %v570_v40  ;;  %v585_v48 = vsub.f32 1.0, %v569_v39  ;;  %v586_v49 = vsub.f32 1.0, %v570_v40 }
  0x23   : > { %v609_v50 = vmul.f32 0.5, %v569_v39  ;;  %v610_v51 = vmul.f32 0.5, %v570_v40  ;;  %vm633_vm12 = vcmp.eq.f32.partialorder %v7125_v35, 2.0  ;;  %vm634_vm13 = vcmp.eq.f32.partialorder %v7127_v36, 2.0  ;;  %5945 = vmatpush3.bf16.msra.mxu0 %v6744_v52 }
  0x24   : > { %v583_v54 = vmul.f32 %v581_v46, %v569_v39  ;;  %v584_v55 = vmul.f32 %v582_v47, %v570_v40  ;;  %v587_v56 = vmul.f32 %v585_v48, %v585_v48  ;;  %v588_v57 = vmul.f32 %v586_v49, %v586_v49  ;;  %5967 = vmatpush3.bf16.msra.mxu1 %v6745_v53 }
  0x25   : > { %v605_v58 = vmul.f32 0.5, %v581_v46  ;;  %v606_v59 = vmul.f32 0.5, %v582_v47  ;;  %vm625_vm14 = vcmp.eq.f32.partialorder %v7125_v35, 1.0  ;;  %vm626_vm15 = vcmp.eq.f32.partialorder %v7127_v36, 1.0  ;;  %5946 = vmatprep.subr.bf16.mxu0 %v6746_v14  ;;  %5968 = vmatprep.subr.bf16.mxu1 %v6747_v15 }
  0x26   : > { %v589_v60 = vmul.f32 %v587_v56, %v585_v48  ;;  %v590_v61 = vmul.f32 %v588_v57, %v586_v49  ;;  %v603_v62 = vmul.f32 -0.5, %v583_v54  ;;  %v604_v63 = vmul.f32 -0.5, %v584_v55 }
  0x27   : > { %v617_v0 = vmul.f32 0.16666667, %v583_v54  ;;  %v618_v1 = vmul.f32 0.16666667, %v584_v55  ;;  %v595_v2 = vmul.f32 0.5, %v583_v54  ;;  %v596_v3 = vmul.f32 0.5, %v584_v55  ;;  %5947 = vmatpush3.bf16.msra.mxu0 %v6748_v20 }
  0x28   : > { %v591_v4 = vmul.f32 0.16666667, %v589_v60  ;;  %v592_v5 = vmul.f32 0.16666667, %v590_v61  ;;  %v607_v6 = vadd.f32 %v605_v58, %v603_v62  ;;  %v608_v9 = vadd.f32 %v606_v59, %v604_v63  ;;  %5969 = vmatpush3.bf16.msra.mxu1 %v6749_v25  ;;  %v6752_v59 = vld [vmem:[%s8594_s4] sm:$0xff]  }
  0x29   : > { %v7170_v10 = vmul.f32 %v7146_v44, %v617_v0  ;;  %v7173_v11 = vmul.f32 %v7151_v45, %v618_v1  ;;  %v597_v12 = vsub.f32 %v595_v2, %v581_v46  ;;  %v598_v13 = vsub.f32 %v596_v3, %v582_v47  ;;  %v6750_v47 = vld [vmem:[%s8594_s4 + $0x40] sm:$0xff]   ;;  %v6754_v1 = vld [vmem:[%s8595_s5 + $0xf8] sm:$0xff]  }
  0x2a   : > { %v7182_v16 = vmul.f32 %v7146_v44, %v591_v4  ;;  %v7185_v17 = vmul.f32 %v7151_v45, %v592_v5  ;;  %v611_v18 = vadd.f32 %v609_v50, %v607_v6  ;;  %v612_v19 = vadd.f32 %v610_v51, %v608_v9  ;;  %5948 = vmatprep.subr.bf16.mxu0 %v6750_v47  ;;  %v6753_v60 = vld [vmem:[%s8594_s4 + $0x80] sm:$0xff]  }
  0x2b   : > { %v689_v21 = vsel %vm645_vm6, %v7170_v10, 0.0  ;;  %v690_v22 = vsel %vm646_vm7, %v7173_v11, 0.0  ;;  %v7199_v23 = vsel %vm661_vm8, %v7170_v10, 0.0  ;;  %v7204_v24 = vsel %vm662_vm9, %v7173_v11, 0.0  ;;  %5949 = vmatpush3.bf16.msra.mxu0 %v6752_v59 }
  0x2c   : > { %v613_v26 = vadd.f32 0.16666667, %v611_v18  ;;  %v614_v27 = vadd.f32 0.16666667, %v612_v19  ;;  %v7212_v28 = vsel %vm645_vm6, %v7182_v16, 0.0  ;;  %v7217_v29 = vsel %vm646_vm7, %v7185_v17, 0.0  ;;  %6005 = vmatprep.subr.bf16.mxu0 %v6754_v1 }
  0x2d   : > { %v599_v30 = vadd.f32 0.6666667, %v597_v12  ;;  %v600_v31 = vadd.f32 0.6666667, %v598_v13  ;;  %v635_v32 = vsel %vm633_vm12, %v7182_v16, 0.0  ;;  %v636_v33 = vsel %vm634_vm13, %v7185_v17, 0.0 }
  0x2e   : > { %v7226_v34 = vmul.f32 %v7146_v44, %v613_v26  ;;  %v7229_v37 = vmul.f32 %v7151_v45, %v614_v27  ;;  %v663_v38 = vsel %vm661_vm8, %v7182_v16, 0.0  ;;  %v664_v39 = vsel %vm662_vm9, %v7185_v17, 0.0 }
  0x2f   : > { %v7238_v40 = vmul.f32 %v7146_v44, %v599_v30  ;;  %v7241_v41 = vmul.f32 %v7151_v45, %v600_v31  ;;  %v673_v42 = vsel %vm625_vm14, %v7170_v10, 0.0  ;;  %v674_v46 = vsel %vm626_vm15, %v7173_v11, 0.0  ;;  %v6751_v44 = vld [vmem:[%s8594_s4 + $0xc0] sm:$0xff]  }
  0x30   : > { %v687_v45 = vsel %vm661_vm8, %v7226_v34, 0.0  ;;  %v688_v48 = vsel %vm662_vm9, %v7229_v37, 0.0  ;;  %v641_v49 = vsel %vm621_vm10, %v7226_v34, 0.0  ;;  %v642_v50 = vsel %vm622_vm11, %v7229_v37, 0.0  ;;  %5970 = vmatprep.subr.bf16.mxu1 %v6751_v44 }
  0x31   : > { %v691_v51 = vadd.f32 %v689_v21, %v687_v45  ;;  %v692_v52 = vadd.f32 %v690_v22, %v688_v48  ;;  %v637_v53 = vsel %vm625_vm14, %v7238_v40, 0.0  ;;  %v638_v54 = vsel %vm626_vm15, %v7241_v41, 0.0  ;;  %5971 = vmatpush3.bf16.msra.mxu1 %v6753_v60 }
  0x32   : > { %v639_v55 = vadd.f32 %v637_v53, %v635_v32  ;;  %v640_v56 = vadd.f32 %v638_v54, %v636_v33  ;;  %v665_v57 = vsel %vm645_vm6, %v7238_v40, 0.0  ;;  %v666_v58 = vsel %vm646_vm7, %v7241_v41, 0.0  ;;  %6312 = vmatprep.subr.bf16.mxu1 %v6942_v43 }
  0x33   : > { %v6682_v61 = vpack.i.bf16 %v692_v52, %v691_v51  ;;  %v667_v62 = vadd.f32 %v665_v57, %v663_v38  ;;  %v668_v63 = vadd.f32 %v666_v58, %v664_v39  ;;  %v669_v0 = vsel %vm633_vm12, %v7226_v34, 0.0 }
  0x34   : > { %v643_v2 = vadd.f32 %v641_v49, %v639_v55  ;;  %v644_v3 = vadd.f32 %v642_v50, %v640_v56  ;;  %v670_v4 = vsel %vm634_vm13, %v7229_v37, 0.0  ;;  %v623_v5 = vsel %vm621_vm10, %v7182_v16, 0.0 }
  0x35   : > { %6683 = vrot.lane.b32.xlu0 %v6682_v61, %s6943_s19  ;;  %v671_v6 = vadd.f32 %v669_v0, %v667_v62  ;;  %v672_v9 = vadd.f32 %v670_v4, %v668_v63  ;;  %v624_v12 = vsel %vm622_vm11, %v7185_v17, 0.0  ;;  %v677_v13 = vsel %vm661_vm8, %v7238_v40, 0.0 }
  0x36   : > { %v6692_v14 = vpack.i.bf16 %v644_v3, %v643_v2  ;;  %v678_v15 = vsel %vm662_vm9, %v7241_v41, 0.0  ;;  %v679_v18 = vsel %vm645_vm6, %v7226_v34, 0.0  ;;  %v680_v21 = vsel %vm646_vm7, %v7229_v37, 0.0 }
  0x37   : > { %v675_v19 = vadd.f32 %v673_v42, %v671_v6  ;;  %v676_v20 = vadd.f32 %v674_v46, %v672_v9  ;;  %v681_v22 = vadd.f32 %v679_v18, %v677_v13  ;;  %v6697_v25 = vpack.i.bf16 %v624_v12, %v623_v5  ;;  %v6755_v18 = vld [vmem:[%s8594_s4 + $0x118] sm:$0xff]  }
  0x38   : > { %6693 = vrot.lane.b32.xlu1 %v6692_v14, %s6943_s19  ;;  %v682_v26 = vadd.f32 %v680_v21, %v678_v15  ;;  %v683_v27 = vsel %vm633_vm12, %v7170_v10, 0.0  ;;  %v684_v30 = vsel %vm634_vm13, %v7173_v11, 0.0  ;;  %v627_v33 = vsel %vm625_vm14, %v7182_v16, 0.0 }
  0x39   : > { %v6687_v31 = vpack.i.bf16 %v676_v20, %v675_v19  ;;  %v685_v32 = vadd.f32 %v683_v27, %v681_v22  ;;  %v628_v38 = vsel %vm626_vm15, %v7185_v17, 0.0  ;;  %v629_v42 = vsel %vm621_vm10, %v7238_v40, 0.0  ;;  %v6756_v22 = vld [vmem:[%s8595_s5 + $0xb8] sm:$0xff]   ;;  %v6758_v27 = vld [vmem:[%s8594_s4 + $0x110] sm:$0xff]  }
  0x3a   : > { %v686_v39 = vadd.f32 %v684_v30, %v682_v26  ;;  %v630_v46 = vsel %vm622_vm11, %v7241_v41, 0.0  ;;  %v631_v47 = vadd.f32 %v629_v42, %v627_v33  ;;  %v649_v16 = vsel %vm633_vm12, %v7238_v40, 0.0  ;;  %v6757_v26 = vld [vmem:[%s8595_s5 + $0xf0] sm:$0xff]   ;;  %v6762_v33 = vld [vmem:[%s8595_s5 + $0xa8] sm:$0xff]   ;;  %v6765_v42 = vld [vmem:[%s8595_s5 + $0xa0] sm:$0xff]  }
  0x3b   : > { %6688 = vrot.lane.b32.xlu0 %v6687_v31, %s6943_s19  ;;  %v632_v44 = vadd.f32 %v630_v46, %v628_v38  ;;  %v650_v17 = vsel %vm634_vm13, %v7241_v41, 0.0  ;;  %v651_v45 = vadd.f32 %v649_v16, %v7212_v28  ;;  %v653_v48 = vsel %vm625_vm14, %v7226_v34, 0.0  ;;  %v6759_v30 = vld [vmem:[%s8595_s5 + $0xb0] sm:$0xff]   ;;  %v6760_v31 = vld [vmem:[%s8595_s5 + $0xe8] sm:$0xff]   ;;  %v6763_v38 = vld [vmem:[%s8595_s5 + $0xe0] sm:$0xff]  }
  0x3c   : > { %6698 = vrot.lane.b32.xlu1 %v6697_v25, %s6943_s19  ;;  %v652_v49 = vadd.f32 %v650_v17, %v7217_v29  ;;  %v654_v50 = vsel %vm626_vm15, %v7229_v37, 0.0  ;;  %v657_v40 = vsel %vm621_vm10, %v7170_v10, 0.0  ;;  %v658_v41 = vsel %vm622_vm11, %v7173_v11, 0.0  ;;  %v6766_v46 = vld [vmem:[%s8595_s5 + $0x78] sm:$0xff]   ;;  %v6770_v17 = vld [vmem:[%s8595_s5 + $0x70] sm:$0xff]  }
  0x3d   : > { %v655_v51 = vadd.f32 %v653_v48, %v651_v45  ;;  %v7357_v34 = vpack.c.bf16 %v7204_v24, %v7199_v23  ;;  %v5588_v29 = vmul.f32 -1.442695, %v7067_v7  ;;  %v5589_v37 = vmul.f32 -1.442695, %v7069_v8  ;;  %v6769_v16 = vld [vmem:[%s8595_s5 + $0x98] sm:$0xff]   ;;  %v6771_v45 = vld [vmem:[%s8595_s5 + $0xd0] sm:$0xff]  }
  0x3e   : > { %v656_v28 = vadd.f32 %v654_v50, %v652_v49  ;;  %v6772_v48 = vld [vmem:[%s8595_s5 + $0x30] sm:$0xff]   ;;  %v6774_v50 = vld [vmem:[%s8595_s5 + $0x68] sm:$0xff]  }
  0x3f   : > { %v659_v52 = vadd.f32 %v657_v40, %v655_v51  ;;  %6878 = vpow2.f32 %v5588_v29  ;;  %v6773_v49 = vld [vmem:[%s8595_s5 + $0x90] sm:$0xff]   ;;  %v6775_v40 = vld [vmem:[%s8595_s5 + $0xc8] sm:$0xff]   ;;  %v6781_v29 = vld [vmem:[%s8595_s5 + $0x80] sm:$0xff]  }
  0x40   : > { %v660_v53 = vadd.f32 %v658_v41, %v656_v28  ;;  %6880 = vpow2.f32 %v5589_v37  ;;  %v6776_v51 = vld [vmem:[%s8595_s5 + $0x28] sm:$0xff]   ;;  %v6778_v28 = vld [vmem:[%s8595_s5 + $0x60] sm:$0xff]   ;;  %v6782_v37 = vld [vmem:[%s8595_s5 + $0x58] sm:$0xff]  }
  0x41   : > { %v6777_v41 = vld [vmem:[%s8595_s5 + $0x88] sm:$0xff]  }
  0x4c   : > { %v6879_v35 = vpop.eup %6878 }
  0x4d   : > { %v6881_v10 = vpop.eup %6880  ;;  %v547_v54 = vadd.f32 1.0, %v6879_v35  ;;  %v6783_v35 = vld [vmem:[%s8596_s6 + $0x78] sm:$0xff]  }
  0x4e   : > { %v548_v55 = vadd.f32 1.0, %v6881_v10  ;;  %v6784_v10 = vld [vmem:[%s8595_s5 + $0x18] sm:$0xff]  }
  0x4f   : > { %6882 = vrcp.f32 %v547_v54  ;;  %v6785_v54 = vld [vmem:[%s8596_s6 + $0x38] sm:$0xff]  }
  0x50   : > { %6884 = vrcp.f32 %v548_v55  ;;  %v6786_v55 = vld [vmem:[%s8595_s5 + $0x50] sm:$0xff]  }
  0x5c   : > { %v6883_v57 = vpop.eup %6882 }
  0x5d   : > { %v6885_v58 = vpop.eup %6884  ;;  %v553_v2 = vmul.f32 %v6883_v57, %v7067_v7  ;;  %v6790_v57 = vld [vmem:[%s8595_s5 + $0x48] sm:$0xff]  }
  0x5e   : > { %v554_v3 = vmul.f32 %v6885_v58, %v7069_v8  ;;  %v6791_v58 = vld [vmem:[%s8596_s6 + $0x68] sm:$0xff]  }
  0xa7   : > { %v6684_v36 = vpop.permute.xlu0 %6683 }
  0xa8   : > { %v6686_v11 = vunpack.i.h.bf16 %v6684_v36  ;;  %v6685_v56 = vunpack.i.l.bf16 %v6684_v36  ;;  %v6787_v36 = vld [vmem:[%s8596_s6 + $0x70] sm:$0xff]  }
  0xaa   : > { %v6694_v23 = vpop.permute.xlu1 %6693  ;;  %v734_v24 = vsel %vm727_vm0, %v685_v32, %v6685_v56  ;;  %v735_v59 = vsel %vm727_vm0, %v686_v39, %v6686_v11  ;;  %v6761_v32 = vld [vmem:[%s8594_s4 + $0x108] sm:$0xff]   ;;  %v6764_v39 = vld [vmem:[%s8594_s4 + $0x100] sm:$0xff]   ;;  %v6788_v11 = vld [vmem:[%s8595_s5 + $0x10] sm:$0xff]  }
  0xab   : > { %v6696_v60 = vunpack.i.h.bf16 %v6694_v23  ;;  %v6695_v61 = vunpack.i.l.bf16 %v6694_v23  ;;  %v7363_v62 = vpack.c.bf16 %v735_v59, %v734_v24  ;;  %v6789_v56 = vld [vmem:[%s8596_s6 + $0x30] sm:$0xff]   ;;  %v6792_v23 = vld [vmem:[%s8595_s5 + $0x8] sm:$0xff]   ;;  %v6794_v59 = vld [vmem:[%s8595_s5 + $0x40] sm:$0xff]  }
  0xac   : > { %v6793_v24 = vld [vmem:[%s8596_s6 + $0x28] sm:$0xff]  }
  0xad   : > { %v6689_v63 = vpop.permute.xlu0 %6688  ;;  %1105 = vmatprep.mubr.bf16.mxu1 %v7363_v62  ;;  %v730_v0 = vsel %vm727_vm0, %v631_v47, %v6695_v61  ;;  %v731_v1 = vsel %vm727_vm0, %v632_v44, %v6696_v60  ;;  %v6767_v47 = vld [vmem:[%s8595_s5 + $0xd8] sm:$0xff]   ;;  %v6795_v60 = vld [vmem:[%s8596_s6 + $0x60] sm:$0xff]  }
  0xae   : > { %v6691_v4 = vunpack.i.h.bf16 %v6689_v63  ;;  %v6690_v5 = vunpack.i.l.bf16 %v6689_v63  ;;  %v6699_v6 = vpop.permute.xlu1 %6698  ;;  %v7370_v9 = vpack.c.bf16 %v731_v1, %v730_v0  ;;  %v6768_v44 = vld [vmem:[%s8595_s5 + $0x38] sm:$0xff]   ;;  %v6796_v61 = vld [vmem:[%s8595_s5] sm:$0xff]  }
  0xaf   : > { %v6701_v12 = vunpack.i.h.bf16 %v6699_v6  ;;  %v6700_v13 = vunpack.i.l.bf16 %v6699_v6  ;;  %v6797_v63 = vld [vmem:[%s8596_s6 + $0x20] sm:$0xff]   ;;  %v6798_v0 = vld [vmem:[%s8596_s6 + $0x58] sm:$0xff]   ;;  %v6804_v6 = vld [vmem:[%s8596_s6 + $0x48] sm:$0xff]  }
  0xb0   : > { %1064 = vmatprep.mubr.bf16.mxu0 %v7370_v9  ;;  %v732_v14 = vsel %vm727_vm0, %v659_v52, %v6690_v5  ;;  %v733_v15 = vsel %vm727_vm0, %v660_v53, %v6691_v4  ;;  %v6779_v52 = vld [vmem:[%s8595_s5 + $0xc0] sm:$0xff]   ;;  %v6799_v1 = vld [vmem:[%s8595_s5 + $0x118] sm:$0xff]   ;;  %v6802_v4 = vld [vmem:[%s8595_s5 + $0x110] sm:$0xff]  }
  0xb1   : > { %v728_v19 = vsel %vm727_vm0, %v553_v2, %v6700_v13  ;;  %v729_v20 = vsel %vm727_vm0, %v554_v3, %v6701_v12  ;;  %v7380_v21 = vpack.c.bf16 %v733_v15, %v732_v14  ;;  %v6780_v53 = vld [vmem:[%s8595_s5 + $0x20] sm:$0xff]   ;;  %v6800_v2 = vld [vmem:[%s8596_s6 + $0x18] sm:$0xff]   ;;  %v6801_v3 = vld [vmem:[%s8596_s6 + $0x50] sm:$0xff]  }
  0xb2   : > { %v7385_v25 = vpack.c.bf16 %v729_v20, %v728_v19  ;;  %v6803_v5 = vld [vmem:[%s8596_s6 + $0x10] sm:$0xff]   ;;  %v6806_v12 = vld [vmem:[%s8596_s6 + $0x8] sm:$0xff]   ;;  %v6807_v13 = vld [vmem:[%s8596_s6 + $0x40] sm:$0xff]  }
  0xb3   : > { %1106 = vmatmul.mubr.bf16.vlgmr.msra.gmra.mxu1 %v7380_v21  ;;  %v6808_v14 = vld [vmem:[%s8595_s5 + $0x100] sm:$0xff]   ;;  %v6811_v19 = vld [vmem:[%s8596_s6 + $0xb8] sm:$0xff]   ;;  %v6812_v20 = vld [vmem:[%s8596_s6 + $0xf0] sm:$0xff]  }
  0xb4   : > { %1065 = vmatmul.mubr.bf16.vlgmr.msra.gmra.mxu0 %v7385_v25  ;;  %6313 = vmatpush3.bf16.msra.mxu1 %v6755_v18  ;;  %v6809_v15 = vld [vmem:[%s8596_s6] sm:$0xff]   ;;  %v6810_v18 = vld [vmem:[%s8596_s6 + $0xf8] sm:$0xff]  }
  0xb5   : > { %6006 = vmatpush3.bf16.msra.mxu0 %v6756_v22  ;;  %1516 = vmatprep.mubr.bf16.mxu0 %v7363_v62  ;;  %v6822_v22 = vld [vmem:[%s8596_s6 + $0x118] sm:$0xff]  }
  0xb6   : > { %6314 = vmatprep.subr.bf16.mxu1 %v6942_v43  ;;  %6007 = vmatprep.subr.bf16.mxu0 %v6757_v26  ;;  %v6813_v26 = vld [vmem:[%s8596_s6 + $0xb0] sm:$0xff]  }
  0xb7   : > { %6320 = vmatprep.mubr.msk.bf16.mxu1 %vm6944_vm1, %v6942_v43 }
  0xb8   : > { %6315 = vmatpush3.bf16.msra.mxu1 %v6758_v27  ;;  %v6814_v27 = vld [vmem:[%s8596_s6 + $0xe8] sm:$0xff]  }
  0xb9   : > { %6008 = vmatpush3.bf16.msra.mxu0 %v6759_v30  ;;  %6316 = vmatprep.subr.bf16.mxu1 %v6942_v43  ;;  %v6825_v30 = vld [vmem:[%s8596_s6 + $0x110] sm:$0xff]  }
  0xba   : > { %6009 = vmatprep.subr.bf16.mxu0 %v6760_v31  ;;  %v6828_v31 = vld [vmem:[%s8596_s6 + $0x108] sm:$0xff]  }
  0xbc   : > { %6317 = vmatpush3.bf16.msra.mxu1 %v6761_v32  ;;  %v6817_v32 = vld [vmem:[%s8596_s6 + $0xa0] sm:$0xff]  }
  0xbd   : > { %6010 = vmatpush3.bf16.msra.mxu0 %v6762_v33  ;;  %6318 = vmatprep.subr.bf16.mxu1 %v6942_v43  ;;  %v6818_v33 = vld [vmem:[%s8596_s6 + $0xd8] sm:$0xff]  }
  0xbe   : > { %6011 = vmatprep.subr.bf16.mxu0 %v6763_v38  ;;  %v6829_v38 = vld [vmem:[%s8596_s6 + $0x100] sm:$0xff]  }
  0xc0   : > { %6319 = vmatpush3.bf16.msra.mxu1 %v6764_v39  ;;  %v6819_v39 = vld [vmem:[%s8596_s6 + $0x98] sm:$0xff]  }
  0xc1   : > { %6012 = vmatpush3.bf16.msra.mxu0 %v6765_v42  ;;  %5983 = vmatprep.subr.bf16.mxu1 %v6766_v46  ;;  %v6820_v42 = vld [vmem:[%s8596_s6 + $0xd0] sm:$0xff]  }
  0xc2   : > { %6013 = vmatprep.subr.bf16.mxu0 %v6767_v47  ;;  %v6821_v46 = vld [vmem:[%s8596_s6 + $0x90] sm:$0xff]   ;;  %v6823_v47 = vld [vmem:[%s8596_s6 + $0xc8] sm:$0xff]  }
  0xc3   : > { %6321 = vmatmul.mubr.msk.bf16.vlgmr.msra.gmra.mxu1 %vm727_vm0, %v7357_v34 }
  0xc4   : > { %5984 = vmatpush3.bf16.msra.mxu1 %v6768_v44  ;;  %1475 = vmatprep.mubr.bf16.mxu1 %v7370_v9  ;;  %v6824_v44 = vld [vmem:[%s8596_s6 + $0x88] sm:$0xff]  }
  0xc5   : > { %6014 = vmatpush3.bf16.msra.mxu0 %v6769_v16  ;;  %5985 = vmatprep.subr.bf16.mxu1 %v6770_v17  ;;  %v6826_v16 = vld [vmem:[%s8596_s6 + $0xc0] sm:$0xff]  }
  0xc6   : > { %6015 = vmatprep.subr.bf16.mxu0 %v6771_v45  ;;  %v6827_v17 = vld [vmem:[%s8596_s6 + $0x80] sm:$0xff]  }
  0xc8   : > { %5986 = vmatpush3.bf16.msra.mxu1 %v6772_v48 }
  0xc9   : > { %6016 = vmatpush3.bf16.msra.mxu0 %v6773_v49  ;;  %5987 = vmatprep.subr.bf16.mxu1 %v6774_v50  ;;  %v7642_v50 = vld [vmem:[%s8592_s2] sm:$0xff] }
  0xca   : > { %6017 = vmatprep.subr.bf16.mxu0 %v6775_v40 }
  0xcc   : > { %5988 = vmatpush3.bf16.msra.mxu1 %v6776_v51 }
  0xcd   : > { %6018 = vmatpush3.bf16.msra.mxu0 %v6777_v41  ;;  %5989 = vmatprep.subr.bf16.mxu1 %v6778_v28 }
  0xce   : > { %6019 = vmatprep.subr.bf16.mxu0 %v6779_v52 }
  0xd0   : > { %5990 = vmatpush3.bf16.msra.mxu1 %v6780_v53 }
  0xd1   : > { %6020 = vmatpush3.bf16.msra.mxu0 %v6781_v29  ;;  %5991 = vmatprep.subr.bf16.mxu1 %v6782_v37 }
  0xd2   : > { %6032 = vmatprep.subr.bf16.mxu0 %v6783_v35 }
  0xd4   : > { %1517 = vmatmul.mubr.bf16.vlgmr.msra.gmra.mxu0 %v7380_v21  ;;  %5992 = vmatpush3.bf16.msra.mxu1 %v6784_v10 }
  0xd5   : > { %6033 = vmatpush3.bf16.msra.mxu0 %v6785_v54  ;;  %1886 = vmatprep.mubr.bf16.mxu0 %v7370_v9  ;;  %v6805_v9 = vld [vmem:[%s8595_s5 + $0x108] sm:$0xff]  }
  0xd6   : > { %5993 = vmatprep.subr.bf16.mxu1 %v6786_v55  ;;  %6034 = vmatprep.subr.bf16.mxu0 %v6787_v36 }
  0xd8   : > { %5994 = vmatpush3.bf16.msra.mxu1 %v6788_v11 }
  0xd9   : > { %6035 = vmatpush3.bf16.msra.mxu0 %v6789_v56  ;;  %5995 = vmatprep.subr.bf16.mxu1 %v6790_v57 }
  0xda   : > { %6036 = vmatprep.subr.bf16.mxu0 %v6791_v58  ;;  %v7659_v58 = vld [vmem:[%s8592_s2 + $0x8] sm:$0xff] }
  0xdc   : > { %5996 = vmatpush3.bf16.msra.mxu1 %v6792_v23  ;;  %v7664_v23 = vld [vmem:[%s8592_s2 + $0x10] sm:$0xff] }
  0xdd   : > { %6037 = vmatpush3.bf16.msra.mxu0 %v6793_v24  ;;  %5997 = vmatprep.subr.bf16.mxu1 %v6794_v59  ;;  %v7675_v24 = vld [vmem:[%s8592_s2 + $0x18] sm:$0xff]  ;;  %v7680_v59 = vld [vmem:[%s8592_s2 + $0x20] sm:$0xff] }
  0xde   : > { %6038 = vmatprep.subr.bf16.mxu0 %v6795_v60  ;;  %v7690_v60 = vld [vmem:[%s8592_s2 + $0x28] sm:$0xff] }
  0xe0   : > { %5998 = vmatpush3.bf16.msra.mxu1 %v6796_v61  ;;  %v7695_v61 = vld [vmem:[%s8592_s2 + $0x30] sm:$0xff] }
  0xe1   : > { %6039 = vmatpush3.bf16.msra.mxu0 %v6797_v63  ;;  %6324 = vmatprep.subr.bf16.mxu1 %v6942_v43  ;;  %v7704_v63 = vld [vmem:[%s8592_s2 + $0x38] sm:$0xff] }
  0xe2   : > { %6040 = vmatprep.subr.bf16.mxu0 %v6798_v0  ;;  %v7709_v0 = vld [vmem:[%s8592_s2 + $0xc0] sm:$0xff] }
  0xe3   : > { %1476 = vmatmul.mubr.bf16.vlgmr.msra.gmra.mxu1 %v7385_v25 }
  0xe4   : > { %6325 = vmatpush3.bf16.msra.mxu1 %v6799_v1  ;;  %6332 = vmatprep.mubr.msk.bf16.mxu1 %vm6944_vm1, %v6942_v43 }
  0xe5   : > { %6041 = vmatpush3.bf16.msra.mxu0 %v6800_v2  ;;  %6326 = vmatprep.subr.bf16.mxu1 %v6942_v43 }
  0xe6   : > { %6042 = vmatprep.subr.bf16.mxu0 %v6801_v3 }
  0xe8   : > { %6327 = vmatpush3.bf16.msra.mxu1 %v6802_v4 }
  0xe9   : > { %6043 = vmatpush3.bf16.msra.mxu0 %v6803_v5  ;;  %6328 = vmatprep.subr.bf16.mxu1 %v6942_v43 }
  0xea   : > { %6044 = vmatprep.subr.bf16.mxu0 %v6804_v6 }
  0xec   : > { %6329 = vmatpush3.bf16.msra.mxu1 %v6805_v9 }
  0xed   : > { %6045 = vmatpush3.bf16.msra.mxu0 %v6806_v12  ;;  %6330 = vmatprep.subr.bf16.mxu1 %v6942_v43 }
  0xee   : > { %6046 = vmatprep.subr.bf16.mxu0 %v6807_v13 }
  0xf0   : > { %6331 = vmatpush3.bf16.msra.mxu1 %v6808_v14 }
  0xf1   : > { %6047 = vmatpush3.bf16.msra.mxu0 %v6809_v15  ;;  %6054 = vmatprep.subr.bf16.mxu1 %v6810_v18 }
  0xf2   : > { %6336 = vmatprep.subr.bf16.mxu0 %v6942_v43 }
  0xf3   : > { %6333 = vmatmul.mubr.msk.bf16.vlgmr.msra.gmra.mxu1 %vm727_vm0, %v7357_v34 }
  0xf4   : > { %1887 = vmatmul.mubr.bf16.vlgmr.msra.gmra.mxu0 %v7385_v25  ;;  %6055 = vmatpush3.bf16.msra.mxu1 %v6811_v19  ;;  %v6816_v25 = vld [vmem:[%s8596_s6 + $0xe0] sm:$0xff]  }
  0xf5   : > { %1927 = vmatprep.mubr.bf16.mxu1 %v7363_v62  ;;  %6056 = vmatprep.subr.bf16.mxu1 %v6812_v20  ;;  %v6815_v62 = vld [vmem:[%s8596_s6 + $0xa8] sm:$0xff]  }
  0xf6   : > { %6337 = vmatpush3.bf16.msra.mxu0 %v6822_v22  ;;  %6344 = vmatprep.mubr.msk.bf16.mxu0 %vm6944_vm1, %v6942_v43 }
  0xf7   : > { %6338 = vmatprep.subr.bf16.mxu0 %v6942_v43 }
  0xf8   : > { %6057 = vmatpush3.bf16.msra.mxu1 %v6813_v26 }
  0xf9   : > { %6058 = vmatprep.subr.bf16.mxu1 %v6814_v27 }
  0xfa   : > { %6339 = vmatpush3.bf16.msra.mxu0 %v6825_v30 }
  0xfb   : > { %6340 = vmatprep.subr.bf16.mxu0 %v6942_v43 }
  0xfc   : > { %6059 = vmatpush3.bf16.msra.mxu1 %v6815_v62 }
  0xfd   : > { %6060 = vmatprep.subr.bf16.mxu1 %v6816_v25 }
  0xfe   : > { %6341 = vmatpush3.bf16.msra.mxu0 %v6828_v31 }
  0xff   : > { %6342 = vmatprep.subr.bf16.mxu0 %v6942_v43 }
 0x100   : > { %6061 = vmatpush3.bf16.msra.mxu1 %v6817_v32 }
 0x101   : > { %6062 = vmatprep.subr.bf16.mxu1 %v6818_v33 }
 0x102   : > { %6343 = vmatpush3.bf16.msra.mxu0 %v6829_v38 }
 0x104   : > { %6063 = vmatpush3.bf16.msra.mxu1 %v6819_v39 }
 0x105   : > { %6064 = vmatprep.subr.bf16.mxu1 %v6820_v42  ;;  %6345 = vmatmul.mubr.msk.bf16.vlgmr.msra.gmra.mxu0 %vm727_vm0, %v7357_v34 }
 0x106   : > { %6368 = vmatprep.mubr.msk.f32.mxu0 %vm2002_vm2, %v7642_v50 }
 0x108   : > { %6065 = vmatpush3.bf16.msra.mxu1 %v6821_v46 }
 0x109   : > { %6066 = vmatprep.subr.bf16.mxu1 %v6823_v47 }
 0x10c   : > { %6067 = vmatpush3.bf16.msra.mxu1 %v6824_v44 }
 0x10d   : > { %6068 = vmatprep.subr.bf16.mxu1 %v6826_v16 }
 0x110   : > { %6069 = vmatpush3.bf16.msra.mxu1 %v6827_v17 }
 0x113   : > { %1928 = vmatmul.mubr.bf16.vlgmr.msra.gmra.mxu1 %v7380_v21  ;;  %v7649_v21 = vld [vmem:[%s8592_s2 + $0x40] sm:$0xff] }
 0x114   : > { %6352 = vmatprep.mubr.msk.f32.mxu1 %vm2002_vm2, %v7649_v21 }
 0x173   : > { %v5972_v34 = vpop.f32.mrf.mxu1 }
 0x174   : > { %v5950_v45 = vpop.f32.mrf.mxu0 }
 0x175   : > { %v5973_v49 = vpop.f32.mrf.mxu1 }
 0x176   : > { %v5951_v48 = vpop.f32.mrf.mxu0  ;;  %v5974_v28 = vadd.f32 %v5973_v49, %v5972_v34 }
 0x177   : > { %v5975_v51 = vpop.f32.mrf.mxu1  ;;  %v5952_v41 = vadd.f32 %v5951_v48, %v5950_v45 }
 0x178   : > { %v5953_v40 = vpop.f32.mrf.mxu0 }
 0x179   : > { %v5976_v53 = vpop.f32.mrf.mxu1  ;;  %v1108_v35 = vadd.f32 %v5974_v28, %v5952_v41 }
 0x17a   : > { %v5954_v52 = vpop.f32.mrf.mxu0  ;;  %v5977_v37 = vadd.f32 %v5976_v53, %v5975_v51 }
 0x17b   : > { %v5955_v29 = vadd.f32 %v5954_v52, %v5953_v40 }
 0x17d   : > { %v1111_v36 = vadd.f32 %v5977_v37, %v5955_v29  ;;  %v7750_v37 = vld [vmem:[%s8592_s2 + $0x48] sm:$0xff] }
 0x183   : > { %v1148_v10 = vpop.f32.mrf.mxu1 }
 0x184   : > { %v1149_v54 = vadd.f32 %v1148_v10, %v1108_v35  ;;  %v7755_v35 = vld [vmem:[%s8592_s2 + $0x50] sm:$0xff] }
 0x185   : > { %v6322_v55 = vpop.f32.mrf.mxu1 }
 0x186   : > { %1996 = vrot.lane.b32.xlu1 %v1149_v54, %s6945_s20  ;;  %v7764_v55 = vld [vmem:[%s8592_s2 + $0x58] sm:$0xff] }
 0x187   : > { %v1151_v11 = vpop.f32.mrf.mxu1 }
 0x188   : > { %v1152_v56 = vadd.f32 %v1151_v11, %v1111_v36  ;;  %v7769_v36 = vld [vmem:[%s8592_s2 + $0x60] sm:$0xff] }
 0x189   : > { %v6323_v57 = vpop.f32.mrf.mxu1 }
 0x18a   : > { %1998 = vrot.lane.b32.xlu0 %v1152_v56, %s6945_s20  ;;  %6364 = vmatprep.subr.mxu0 %v1152_v56  ;;  %v7776_v57 = vld [vmem:[%s8592_s2 + $0xc8] sm:$0xff] }
 0x18b   : > { %2270 = vrot.lane.b32.xlu1 %v1149_v54, %s6946_s23  ;;  %6365 = vmatpush3.msra.mxu0 %v1152_v56 }
 0x18c   : > { %6366 = vmatprep.subr.mxu0 %v1149_v54 }
 0x18d   : > { %6367 = vmatpush3.msra.mxu0 %v1149_v54 }
 0x18e   : > { %2272 = vrot.lane.b32.xlu0 %v1152_v56, %s6946_s23  ;;  %6369 = vmatmul.mubr.msk.f32.vlgmr.msra.gmra.mxu0 %vm2002_vm2, %v7659_v58 }
 0x18f   : > { %2422 = vrot.lane.b32.xlu1 %v1149_v54, %s6947_s28  ;;  %6371 = vmatprep.mubr.msk.f32.mxu0 %vm2002_vm2, %v7664_v23 }
 0x192   : > { %2424 = vrot.lane.b32.xlu0 %v1152_v56, %s6947_s28  ;;  %6372 = vmatmul.mubr.msk.f32.gmra.mxu0 %vm2002_vm2, %v7675_v24 }
 0x193   : > { %6374 = vmatprep.mubr.msk.f32.mxu0 %vm2002_vm2, %v7680_v59 }
 0x194   : > { %v6021_v2 = vpop.f32.mrf.mxu0 }
 0x196   : > { %6375 = vmatmul.mubr.msk.f32.gmra.mxu0 %vm2002_vm2, %v7690_v60  ;;  %v6022_v4 = vpop.f32.mrf.mxu0 }
 0x197   : > { %6377 = vmatprep.mubr.msk.f32.mxu0 %vm2002_vm2, %v7695_v61  ;;  %v6023_v13 = vadd.f32 %v6022_v4, %v6021_v2  ;;  %v7788_v2 = vld [vmem:[%s8592_s2 + $0x70] sm:$0xff]  ;;  %v7804_v4 = vld [vmem:[%s8592_s2 + $0xd8] sm:$0xff] }
 0x198   : > { %v6024_v6 = vpop.f32.mrf.mxu0 }
 0x19a   : > { %6378 = vmatmul.mubr.msk.f32.gmra.mxu0 %vm2002_vm2, %v7704_v63  ;;  %v6025_v14 = vpop.f32.mrf.mxu0 }
 0x19b   : > { %6400 = vmatprep.mubr.msk.f32.mxu0 %vm2002_vm2, %v7709_v0  ;;  %v6026_v20 = vadd.f32 %v6025_v14, %v6024_v6  ;;  %v7817_v6 = vld [vmem:[%s8592_s2 + $0xe0] sm:$0xff]  ;;  %v7848_v14 = vld [vmem:[%s8592_s2 + $0xf0] sm:$0xff] }
 0x1a3   : > { %v5999_v1 = vpop.f32.mrf.mxu1 }
 0x1a5   : > { %v6000_v3 = vpop.f32.mrf.mxu1 }
 0x1a6   : > { %v6001_v9 = vadd.f32 %v6000_v3, %v5999_v1  ;;  %v7783_v1 = vld [vmem:[%s8592_s2 + $0x68] sm:$0xff]  ;;  %v7796_v3 = vld [vmem:[%s8592_s2 + $0xd0] sm:$0xff] }
 0x1a7   : > { %v6002_v5 = vpop.f32.mrf.mxu1 }
 0x1a8   : > { %v1519_v18 = vadd.f32 %v6023_v13, %v6001_v9  ;;  %v7823_v9 = vld [vmem:[%s8592_s2 + $0x80] sm:$0xff]  ;;  %v7843_v13 = vld [vmem:[%s8592_s2 + $0x88] sm:$0xff] }
 0x1a9   : > { %v6003_v12 = vpop.f32.mrf.mxu1 }
 0x1aa   : > { %v6004_v15 = vadd.f32 %v6003_v12, %v6002_v5  ;;  %v7812_v5 = vld [vmem:[%s8592_s2 + $0x78] sm:$0xff]  ;;  %v7836_v12 = vld [vmem:[%s8592_s2 + $0xe8] sm:$0xff] }
 0x1ac   : > { %v1522_v27 = vadd.f32 %v6026_v20, %v6004_v15  ;;  %v7853_v15 = vld [vmem:[%s8592_s2 + $0x90] sm:$0xff]  ;;  %v7876_v20 = vld [vmem:[%s8592_s2 + $0xa0] sm:$0xff] }
 0x1b3   : > { %v1559_v19 = vpop.f32.mrf.mxu1 }
 0x1b4   : > { %v7715_v22 = vadd.f32 %v1559_v19, %v1519_v18  ;;  %v6048_v30 = vpop.f32.mrf.mxu0  ;;  %v7864_v18 = vld [vmem:[%s8592_s2 + $0xf8] sm:$0xff] }
 0x1b5   : > { %v6334_v26 = vpop.f32.mrf.mxu1  ;;  %v7871_v19 = vld [vmem:[%s8592_s2 + $0x98] sm:$0xff] }
 0x1b6   : > { %2567 = vrot.lane.b32.xlu1 %v7715_v22, %s6945_s20  ;;  %v6049_v32 = vpop.f32.mrf.mxu0  ;;  %v7894_v26 = vld [vmem:[%s8592_s2 + $0xb0] sm:$0xff] }
 0x1b7   : > { %v1562_v62 = vpop.f32.mrf.mxu1  ;;  %v6050_v17 = vadd.f32 %v6049_v32, %v6048_v30 }
 0x1b8   : > { %v7719_v25 = vadd.f32 %v1562_v62, %v1522_v27  ;;  %v6051_v33 = vpop.f32.mrf.mxu0  ;;  %v7907_v27 = vld [vmem:[%s8592_s2 + $0xb8] sm:$0xff] }
 0x1b9   : > { %v6335_v31 = vpop.f32.mrf.mxu1 }
 0x1ba   : > { %2569 = vrot.lane.b32.xlu0 %v7719_v25, %s6945_s20  ;;  %2783 = vrot.lane.b32.xlu1 %v7715_v22, %s6946_s23  ;;  %v6052_v38 = vpop.f32.mrf.mxu0 }
 0x1bb   : > { %v6053_v40 = vadd.f32 %v6052_v38, %v6051_v33 }
 0x1be   : > { %2785 = vrot.lane.b32.xlu0 %v7719_v25, %s6946_s23  ;;  %2902 = vrot.lane.b32.xlu1 %v7715_v22, %s6947_s28 }
 0x1c2   : > { %2904 = vrot.lane.b32.xlu0 %v7719_v25, %s6947_s28 }
 0x1c5   : > { %v1970_v39 = vpop.f32.mrf.mxu0 }
 0x1c7   : > { %v6346_v42 = vpop.f32.mrf.mxu0 }
 0x1c9   : > { %v1973_v46 = vpop.f32.mrf.mxu0 }
 0x1cb   : > { %v6347_v47 = vpop.f32.mrf.mxu0 }
 0x1d3   : > { %v6070_v44 = vpop.f32.mrf.mxu1 }
 0x1d5   : > { %v6071_v16 = vpop.f32.mrf.mxu1 }
 0x1d6   : > { %v6072_v34 = vadd.f32 %v6071_v16, %v6070_v44 }
 0x1d7   : > { %v6073_v45 = vpop.f32.mrf.mxu1 }
 0x1d8   : > { %v1930_v48 = vadd.f32 %v6072_v34, %v6050_v17 }
 0x1d9   : > { %v6074_v49 = vpop.f32.mrf.mxu1 }
 0x1da   : > { %v6075_v51 = vadd.f32 %v6074_v49, %v6073_v45  ;;  %v7731_v41 = vadd.f32 %v1970_v39, %v1930_v48 }
 0x1dc   : > { %3023 = vrot.lane.b32.xlu1 %v7731_v41, %s6945_s20  ;;  %v1933_v28 = vadd.f32 %v6075_v51, %v6053_v40 }
 0x1de   : > { %v7735_v52 = vadd.f32 %v1973_v46, %v1933_v28 }
 0x1e0   : > { %3025 = vrot.lane.b32.xlu0 %v7735_v52, %s6945_s20  ;;  %3239 = vrot.lane.b32.xlu1 %v7731_v41, %s6946_s23  ;;  %s530_s20 = scalar_lea.vmem %s8591_s1, %s8614_s22 }
 0x1e4   : > { %3241 = vrot.lane.b32.xlu0 %v7735_v52, %s6946_s23  ;;  %3358 = vrot.lane.b32.xlu1 %v7731_v41, %s6947_s28  ;;  %s535_s23 = scalar_lea.vmem %s8606_s16, %s5926_s29 }
 0x1e8   : > { %3360 = vrot.lane.b32.xlu0 %v7735_v52, %s6947_s28 }
 0x1f8   : > { %v1997_v53 = vpop.permute.xlu1 %1996 }
 0x1fc   : > { %v1999_v29 = vpop.permute.xlu0 %1998 }
 0x1fd   : > { %6348 = vmatprep.subr.mxu1 %v1999_v29  ;;  %v2271_v10 = vpop.permute.xlu1 %2270 }
 0x1fe   : > { %6349 = vmatpush3.msra.mxu1 %v1999_v29 }
 0x1ff   : > { %6350 = vmatprep.subr.mxu1 %v1997_v53 }
 0x200   : > { %v2273_v54 = vpop.permute.xlu0 %2272  ;;  %6351 = vmatpush3.msra.mxu1 %v1997_v53 }
 0x201   : > { %6380 = vmatprep.subr.mxu1 %v2273_v54  ;;  %6353 = vmatmul.mubr.msk.f32.vlgmr.msra.gmra.mxu1 %vm2002_vm2, %v7750_v37  ;;  %v2423_v56 = vpop.permute.xlu1 %2422 }
 0x202   : > { %6381 = vmatpush3.msra.mxu1 %v2273_v54  ;;  %6355 = vmatprep.mubr.msk.f32.mxu1 %vm2002_vm2, %v7755_v35 }
 0x203   : > { %6382 = vmatprep.subr.mxu1 %v2271_v10 }
 0x204   : > { %v2425_v11 = vpop.permute.xlu0 %2424  ;;  %6383 = vmatpush3.msra.mxu1 %v2271_v10 }
 0x205   : > { %6396 = vmatprep.subr.mxu0 %v2425_v11  ;;  %6356 = vmatmul.mubr.msk.f32.gmra.mxu1 %vm2002_vm2, %v7764_v55 }
 0x206   : > { %6397 = vmatpush3.msra.mxu0 %v2425_v11  ;;  %6358 = vmatprep.mubr.msk.f32.mxu1 %vm2002_vm2, %v7769_v36 }
 0x207   : > { %6398 = vmatprep.subr.mxu0 %v2423_v56 }
 0x208   : > { %6399 = vmatpush3.msra.mxu0 %v2423_v56 }
 0x209   : > { %6428 = vmatprep.subr.mxu0 %v7719_v25  ;;  %6401 = vmatmul.mubr.msk.f32.vlgmr.msra.gmra.mxu0 %vm2002_vm2, %v7776_v57 }
 0x20a   : > { %6429 = vmatpush3.msra.mxu0 %v7719_v25  ;;  %6359 = vmatmul.mubr.msk.f32.gmra.mxu1 %vm2002_vm2, %v7783_v1 }
 0x20b   : > { %6430 = vmatprep.subr.mxu0 %v7715_v22  ;;  %6361 = vmatprep.mubr.msk.f32.mxu1 %vm2002_vm2, %v7788_v2 }
 0x20c   : > { %6431 = vmatpush3.msra.mxu0 %v7715_v22  ;;  %6403 = vmatprep.mubr.msk.f32.mxu0 %vm2002_vm2, %v7796_v3  ;;  %v7889_v22 = vld [vmem:[%s8592_s2 + $0xa8] sm:$0xff] }
 0x20d   : > { %6404 = vmatmul.mubr.msk.f32.gmra.mxu0 %vm2002_vm2, %v7804_v4 }
 0x20e   : > { %6362 = vmatmul.mubr.msk.f32.gmra.mxu1 %vm2002_vm2, %v7812_v5  ;;  %6406 = vmatprep.mubr.msk.f32.mxu0 %vm2002_vm2, %v7817_v6 }
 0x20f   : > { %6384 = vmatprep.mubr.msk.f32.mxu1 %vm2002_vm2, %v7823_v9 }
 0x211   : > { %6407 = vmatmul.mubr.msk.f32.gmra.mxu0 %vm2002_vm2, %v7836_v12 }
 0x212   : > { %6385 = vmatmul.mubr.msk.f32.vlgmr.msra.gmra.mxu1 %vm2002_vm2, %v7843_v13  ;;  %6409 = vmatprep.mubr.msk.f32.mxu0 %vm2002_vm2, %v7848_v14 }
 0x213   : > { %6387 = vmatprep.mubr.msk.f32.mxu1 %vm2002_vm2, %v7853_v15 }
 0x215   : > { %6410 = vmatmul.mubr.msk.f32.gmra.mxu0 %vm2002_vm2, %v7864_v18 }
 0x216   : > { %6388 = vmatmul.mubr.msk.f32.gmra.mxu1 %vm2002_vm2, %v7871_v19  ;;  %6432 = vmatprep.mubr.msk.f32.mxu0 %vm2002_vm2, %v7642_v50 }
 0x217   : > { %6390 = vmatprep.mubr.msk.f32.mxu1 %vm2002_vm2, %v7876_v20 }
 0x219   : > { %6433 = vmatmul.mubr.msk.f32.vlgmr.msra.gmra.mxu0 %vm2002_vm2, %v7659_v58 }
 0x21a   : > { %6391 = vmatmul.mubr.msk.f32.gmra.mxu1 %vm2002_vm2, %v7889_v22  ;;  %6435 = vmatprep.mubr.msk.f32.mxu0 %vm2002_vm2, %v7664_v23 }
 0x21b   : > { %6393 = vmatprep.mubr.msk.f32.mxu1 %vm2002_vm2, %v7894_v26 }
 0x21d   : > { %6436 = vmatmul.mubr.msk.f32.gmra.mxu0 %vm2002_vm2, %v7675_v24 }
 0x21e   : > { %6394 = vmatmul.mubr.msk.f32.gmra.mxu1 %vm2002_vm2, %v7907_v27  ;;  %6438 = vmatprep.mubr.msk.f32.mxu0 %vm2002_vm2, %v7680_v59 }
 0x21f   : > { %6416 = vmatprep.mubr.msk.f32.mxu1 %vm2002_vm2, %v7649_v21 }
 0x221   : > { %6439 = vmatmul.mubr.msk.f32.gmra.mxu0 %vm2002_vm2, %v7690_v60 }
 0x222   : > { %6441 = vmatprep.mubr.msk.f32.mxu0 %vm2002_vm2, %v7695_v61 }
 0x225   : > { %6442 = vmatmul.mubr.msk.f32.gmra.mxu0 %vm2002_vm2, %v7704_v63 }
 0x226   : > { %6464 = vmatprep.mubr.msk.f32.mxu0 %vm2002_vm2, %v7709_v0 }
 0x228   : > { %v2568_v30 = vpop.permute.xlu1 %2567 }
 0x22c   : > { %v2570_v62 = vpop.permute.xlu0 %2569  ;;  %v2784_v25 = vpop.permute.xlu1 %2783 }
 0x22d   : > { %6412 = vmatprep.subr.mxu1 %v2570_v62 }
 0x22e   : > { %6413 = vmatpush3.msra.mxu1 %v2570_v62 }
 0x22f   : > { %6414 = vmatprep.subr.mxu1 %v2568_v30 }
 0x230   : > { %v2786_v31 = vpop.permute.xlu0 %2785  ;;  %6415 = vmatpush3.msra.mxu1 %v2568_v30  ;;  %v2903_v33 = vpop.permute.xlu1 %2902 }
 0x231   : > { %6417 = vmatmul.mubr.msk.f32.vlgmr.msra.gmra.mxu1 %vm2002_vm2, %v7750_v37  ;;  %6444 = vmatprep.subr.mxu1 %v2786_v31 }
 0x232   : > { %6445 = vmatpush3.msra.mxu1 %v2786_v31  ;;  %6419 = vmatprep.mubr.msk.f32.mxu1 %vm2002_vm2, %v7755_v35 }
 0x233   : > { %6446 = vmatprep.subr.mxu1 %v2784_v25 }
 0x234   : > { %v2905_v32 = vpop.permute.xlu0 %2904  ;;  %6447 = vmatpush3.msra.mxu1 %v2784_v25 }
 0x235   : > { %6420 = vmatmul.mubr.msk.f32.gmra.mxu1 %vm2002_vm2, %v7764_v55  ;;  %6460 = vmatprep.subr.mxu0 %v2905_v32 }
 0x236   : > { %6461 = vmatpush3.msra.mxu0 %v2905_v32  ;;  %6422 = vmatprep.mubr.msk.f32.mxu1 %vm2002_vm2, %v7769_v36 }
 0x237   : > { %6462 = vmatprep.subr.mxu0 %v2903_v33 }
 0x238   : > { %6463 = vmatpush3.msra.mxu0 %v2903_v33 }
 0x239   : > { %6423 = vmatmul.mubr.msk.f32.gmra.mxu1 %vm2002_vm2, %v7783_v1  ;;  %6492 = vmatprep.subr.mxu0 %v7735_v52 }
 0x23a   : > { %6465 = vmatmul.mubr.msk.f32.vlgmr.msra.gmra.mxu0 %vm2002_vm2, %v7776_v57  ;;  %6425 = vmatprep.mubr.msk.f32.mxu1 %vm2002_vm2, %v7788_v2 }
 0x23b   : > { %6493 = vmatpush3.msra.mxu0 %v7735_v52  ;;  %6467 = vmatprep.mubr.msk.f32.mxu0 %vm2002_vm2, %v7796_v3 }
 0x23c   : > { %6494 = vmatprep.subr.mxu0 %v7731_v41 }
 0x23d   : > { %6495 = vmatpush3.msra.mxu0 %v7731_v41  ;;  %6426 = vmatmul.mubr.msk.f32.gmra.mxu1 %vm2002_vm2, %v7812_v5 }
 0x23e   : > { %6448 = vmatprep.mubr.msk.f32.mxu1 %vm2002_vm2, %v7823_v9  ;;  %6468 = vmatmul.mubr.msk.f32.gmra.mxu0 %vm2002_vm2, %v7804_v4 }
 0x23f   : > { %6470 = vmatprep.mubr.msk.f32.mxu0 %vm2002_vm2, %v7817_v6 }
 0x241   : > { %6449 = vmatmul.mubr.msk.f32.vlgmr.msra.gmra.mxu1 %vm2002_vm2, %v7843_v13 }
 0x242   : > { %6451 = vmatprep.mubr.msk.f32.mxu1 %vm2002_vm2, %v7853_v15  ;;  %6471 = vmatmul.mubr.msk.f32.gmra.mxu0 %vm2002_vm2, %v7836_v12 }
 0x243   : > { %6473 = vmatprep.mubr.msk.f32.mxu0 %vm2002_vm2, %v7848_v14 }
 0x245   : > { %6452 = vmatmul.mubr.msk.f32.gmra.mxu1 %vm2002_vm2, %v7871_v19 }
 0x246   : > { %6454 = vmatprep.mubr.msk.f32.mxu1 %vm2002_vm2, %v7876_v20  ;;  %6474 = vmatmul.mubr.msk.f32.gmra.mxu0 %vm2002_vm2, %v7864_v18 }
 0x247   : > { %6496 = vmatprep.mubr.msk.f32.mxu0 %vm2002_vm2, %v7642_v50 }
 0x249   : > { %6455 = vmatmul.mubr.msk.f32.gmra.mxu1 %vm2002_vm2, %v7889_v22 }
 0x24a   : > { %6457 = vmatprep.mubr.msk.f32.mxu1 %vm2002_vm2, %v7894_v26  ;;  %6497 = vmatmul.mubr.msk.f32.vlgmr.msra.gmra.mxu0 %vm2002_vm2, %v7659_v58 }
 0x24b   : > { %6499 = vmatprep.mubr.msk.f32.mxu0 %vm2002_vm2, %v7664_v23 }
 0x24d   : > { %6458 = vmatmul.mubr.msk.f32.gmra.mxu1 %vm2002_vm2, %v7907_v27 }
 0x24e   : > { %6480 = vmatprep.mubr.msk.f32.mxu1 %vm2002_vm2, %v7649_v21  ;;  %6500 = vmatmul.mubr.msk.f32.gmra.mxu0 %vm2002_vm2, %v7675_v24  ;;  %v3024_v50 = vpop.permute.xlu1 %3023 }
 0x24f   : > { %6502 = vmatprep.mubr.msk.f32.mxu0 %vm2002_vm2, %v7680_v59  ;;  %v8037_v59 = vpop.f32.mrf.mxu0 }
 0x252   : > { %v3026_v38 = vpop.permute.xlu0 %3025  ;;  %6503 = vmatmul.mubr.msk.f32.gmra.mxu0 %vm2002_vm2, %v7690_v60  ;;  %v3240_v58 = vpop.permute.xlu1 %3239 }
 0x253   : > { %6476 = vmatprep.subr.mxu1 %v3026_v38  ;;  %6505 = vmatprep.mubr.msk.f32.mxu0 %vm2002_vm2, %v7695_v61  ;;  %v2222_v60 = vpop.f32.mrf.mxu0 }
 0x254   : > { %6477 = vmatpush3.msra.mxu1 %v3026_v38 }
 0x255   : > { %6478 = vmatprep.subr.mxu1 %v3024_v50  ;;  %v8039_v61 = vpop.f32.mrf.mxu0 }
 0x256   : > { %v3242_v23 = vpop.permute.xlu0 %3241  ;;  %6479 = vmatpush3.msra.mxu1 %v3024_v50  ;;  %6506 = vmatmul.mubr.msk.f32.gmra.mxu0 %vm2002_vm2, %v7704_v63  ;;  %v3359_v24 = vpop.permute.xlu1 %3358 }
 0x257   : > { %6508 = vmatprep.subr.mxu1 %v3242_v23  ;;  %6481 = vmatmul.mubr.msk.f32.vlgmr.msra.gmra.mxu1 %vm2002_vm2, %v7750_v37  ;;  %v8041_v63 = vpop.f32.mrf.mxu0 }
 0x258   : > { %6509 = vmatpush3.msra.mxu1 %v3242_v23  ;;  %6483 = vmatprep.mubr.msk.f32.mxu1 %vm2002_vm2, %v7755_v35 }
 0x259   : > { %6510 = vmatprep.subr.mxu1 %v3240_v58  ;;  %6528 = vmatprep.mubr.msk.f32.mxu0 %vm2002_vm2, %v7709_v0  ;;  %v8043_v0 = vpop.f32.mrf.mxu0 }
 0x25a   : > { %v3361_v21 = vpop.permute.xlu0 %3360  ;;  %6511 = vmatpush3.msra.mxu1 %v3240_v58 }
 0x25b   : > { %6524 = vmatprep.subr.mxu0 %v3361_v21  ;;  %6484 = vmatmul.mubr.msk.f32.gmra.mxu1 %vm2002_vm2, %v7764_v55  ;;  %v2242_v39 = vpop.f32.mrf.mxu0 }
 0x25c   : > { %6525 = vmatpush3.msra.mxu0 %v3361_v21  ;;  %6486 = vmatprep.mubr.msk.f32.mxu1 %vm2002_vm2, %v7769_v36 }
 0x25d   : > { %6526 = vmatprep.subr.mxu0 %v3359_v24  ;;  %v8045_v46 = vpop.f32.mrf.mxu0 }
 0x25e   : > { %6527 = vmatpush3.msra.mxu0 %v3359_v24 }
 0x25f   : > { %6487 = vmatmul.mubr.msk.f32.gmra.mxu1 %vm2002_vm2, %v7783_v1  ;;  %6529 = vmatmul.mubr.msk.f32.vlgmr.msra.gmra.mxu0 %vm2002_vm2, %v7776_v57  ;;  %v8049_v16 = vpop.f32.mrf.mxu0 }
 0x260   : > { %6489 = vmatprep.mubr.msk.f32.mxu1 %vm2002_vm2, %v7788_v2  ;;  %6531 = vmatprep.mubr.msk.f32.mxu0 %vm2002_vm2, %v7796_v3 }
 0x263   : > { %6490 = vmatmul.mubr.msk.f32.gmra.mxu1 %vm2002_vm2, %v7812_v5  ;;  %6532 = vmatmul.mubr.msk.f32.gmra.mxu0 %vm2002_vm2, %v7804_v4 }
 0x264   : > { %6512 = vmatprep.mubr.msk.f32.mxu1 %vm2002_vm2, %v7823_v9  ;;  %6534 = vmatprep.mubr.msk.f32.mxu0 %vm2002_vm2, %v7817_v6 }
 0x267   : > { %6513 = vmatmul.mubr.msk.f32.vlgmr.msra.gmra.mxu1 %vm2002_vm2, %v7843_v13  ;;  %6535 = vmatmul.mubr.msk.f32.gmra.mxu0 %vm2002_vm2, %v7836_v12 }
 0x268   : > { %6515 = vmatprep.mubr.msk.f32.mxu1 %vm2002_vm2, %v7853_v15  ;;  %6537 = vmatprep.mubr.msk.f32.mxu0 %vm2002_vm2, %v7848_v14 }
 0x26b   : > { %6516 = vmatmul.mubr.msk.f32.gmra.mxu1 %vm2002_vm2, %v7871_v19  ;;  %6538 = vmatmul.mubr.msk.f32.gmra.mxu0 %vm2002_vm2, %v7864_v18 }
 0x26c   : > { %6518 = vmatprep.mubr.msk.f32.mxu1 %vm2002_vm2, %v7876_v20 }
 0x26f   : > { %6519 = vmatmul.mubr.msk.f32.gmra.mxu1 %vm2002_vm2, %v7889_v22 }
 0x270   : > { %6521 = vmatprep.mubr.msk.f32.mxu1 %vm2002_vm2, %v7894_v26 }
 0x273   : > { %6522 = vmatmul.mubr.msk.f32.gmra.mxu1 %vm2002_vm2, %v7907_v27 }
 0x2c1   : > { %v6354_v42 = vpop.f32.mrf.mxu1 }
 0x2c3   : > { %v2093_v47 = vpop.f32.mrf.mxu1 }
 0x2c4   : > { %v2223_v52 = vadd.f32 %v2222_v60, %v2093_v47 }
 0x2c5   : > { %v8047_v44 = vpop.f32.mrf.mxu1 }
 0x2c7   : > { %v2103_v17 = vpop.f32.mrf.mxu1 }
 0x2c9   : > { %v8051_v34 = vpop.f32.mrf.mxu0 }
 0x2ca   : > { %v8053_v45 = vpop.f32.mrf.mxu1 }
 0x2cb   : > { %v2518_v48 = vpop.f32.mrf.mxu0 }
 0x2cc   : > { %v2113_v49 = vpop.f32.mrf.mxu1 }
 0x2cd   : > { %v8055_v40 = vpop.f32.mrf.mxu0  ;;  %v2243_v57 = vadd.f32 %v2242_v39, %v2113_v49 }
 0x2ce   : > { %v8057_v51 = vpop.f32.mrf.mxu1 }
 0x2cf   : > { %v8059_v41 = vpop.f32.mrf.mxu0 }
 0x2d0   : > { %v8061_v28 = vpop.f32.mrf.mxu1 }
 0x2d1   : > { %v8063_v53 = vpop.f32.mrf.mxu0 }
 0x2d2   : > { %v6386_v29 = vpop.f32.mrf.mxu1 }
 0x2d3   : > { %v2538_v37 = vpop.f32.mrf.mxu0 }
 0x2d4   : > { %v2366_v35 = vpop.f32.mrf.mxu1 }
 0x2d5   : > { %v2405_v10 = vadd.f32 %v2366_v35, %v2223_v52  ;;  %v8065_v54 = vpop.f32.mrf.mxu0 }
 0x2d6   : > { %v8067_v55 = vpop.f32.mrf.mxu1 }
 0x2d7   : > { %v2557_v36 = vadd.f32 %v2518_v48, %v2405_v10  ;;  %v8069_v56 = vpop.f32.mrf.mxu0  ;;  %v2228_v48 = vadd.f32 %v8037_v59, %v6354_v42  ;;  %v2233_v10 = vadd.f32 %v8041_v63, %v2103_v17 }
 0x2d8   : > { %v2376_v11 = vpop.f32.mrf.mxu1 }
 0x2d9   : > { %6544 = vmatprep.mubr.msk.f32.mxu1 %vm2002_vm2, %v2557_v36  ;;  %v6434_v2 = vpop.f32.mrf.mxu0  ;;  %v2407_v42 = vadd.f32 %v2376_v11, %v2233_v10 }
 0x2da   : > { %v8072_v1 = vpop.f32.mrf.mxu1 }
 0x2db   : > { %v2744_v5 = vpop.f32.mrf.mxu0 }
 0x2dc   : > { %v2386_v3 = vpop.f32.mrf.mxu1 }
 0x2dd   : > { %v2409_v4 = vadd.f32 %v2386_v3, %v2243_v57  ;;  %v6437_v9 = vpop.f32.mrf.mxu0 }
 0x2de   : > { %v8075_v14 = vpop.f32.mrf.mxu1 }
 0x2df   : > { %v2561_v6 = vadd.f32 %v2538_v37, %v2409_v4  ;;  %v2754_v12 = vpop.f32.mrf.mxu0 }
 0x2e0   : > { %v8077_v18 = vpop.f32.mrf.mxu1 }
 0x2e1   : > { %6558 = vmatprep.mubr.msk.f32.mxu0 %vm2002_vm2, %v2561_v6  ;;  %v6440_v13 = vpop.f32.mrf.mxu0 }
 0x2e3   : > { %v2764_v15 = vpop.f32.mrf.mxu0 }
 0x2e5   : > { %v6443_v20 = vpop.f32.mrf.mxu0 }
 0x2e7   : > { %v8079_v27 = vpop.f32.mrf.mxu0 }
 0x2f1   : > { %v6418_v19 = vpop.f32.mrf.mxu1 }
 0x2f2   : > { %v2750_v58 = vadd.f32 %v6434_v2, %v6418_v19 }
 0x2f3   : > { %v2639_v22 = vpop.f32.mrf.mxu1 }
 0x2f4   : > { %v2745_v24 = vadd.f32 %v2744_v5, %v2639_v22  ;;  %v2406_v5 = vadd.f32 %v6386_v29, %v2228_v48 }
 0x2f5   : > { %v6421_v26 = vpop.f32.mrf.mxu1 }
 0x2f6   : > { %v2760_v49 = vadd.f32 %v6437_v9, %v6421_v26  ;;  %v2558_v29 = vadd.f32 %v8051_v34, %v2406_v5 }
 0x2f7   : > { %v2649_v30 = vpop.f32.mrf.mxu1 }
 0x2f8   : > { %v2755_v6 = vadd.f32 %v2754_v12, %v2649_v30 }
 0x2f9   : > { %v6424_v62 = vpop.f32.mrf.mxu1 }
 0x2fa   : > { %v6466_v25 = vpop.f32.mrf.mxu0  ;;  %v2770_v19 = vadd.f32 %v6440_v13, %v6424_v62  ;;  %v2253_v62 = vadd.f32 %v8049_v16, %v8061_v28 }
 0x2fb   : > { %v2659_v31 = vpop.f32.mrf.mxu1 }
 0x2fc   : > { %v2974_v32 = vpop.f32.mrf.mxu0  ;;  %v2765_v22 = vadd.f32 %v2764_v15, %v2659_v31  ;;  %v2248_v15 = vadd.f32 %v8043_v0, %v8053_v45  ;;  %v2559_v31 = vadd.f32 %v8059_v41, %v2407_v42  ;;  %v2411_v28 = vadd.f32 %v8077_v18, %v2253_v62 }
 0x2fd   : > { %v6427_v33 = vpop.f32.mrf.mxu1 }
 0x2fe   : > { %v6469_v50 = vpop.f32.mrf.mxu0  ;;  %v2780_v12 = vadd.f32 %v6443_v20, %v6427_v33  ;;  %v2410_v41 = vadd.f32 %v8072_v1, %v2248_v15 }
 0x2ff   : > { %v2669_v38 = vpop.f32.mrf.mxu1 }
 0x300   : > { %v2984_v23 = vpop.f32.mrf.mxu0  ;;  %v2775_v16 = vadd.f32 %v8079_v27, %v2669_v38  ;;  %v2562_v1 = vadd.f32 %v8063_v53, %v2410_v41  ;;  %v5839_v41 = vld [vmem:[%s530_s20] ss:$0 sm:$0xff] }
 0x301   : > { %v6450_v21 = vpop.f32.mrf.mxu1 }
 0x302   : > { %v2895_v60 = vadd.f32 %v6450_v21, %v2750_v58  ;;  %v6472_v39 = vpop.f32.mrf.mxu0 }
 0x303   : > { %v2855_v47 = vpop.f32.mrf.mxu1 }
 0x304   : > { %v2894_v52 = vadd.f32 %v2855_v47, %v2745_v24  ;;  %v3014_v37 = vadd.f32 %v6466_v25, %v2895_v60  ;;  %v2994_v35 = vpop.f32.mrf.mxu0  ;;  %v2563_v60 = vadd.f32 %v8069_v56, %v2411_v28 }
 0x305   : > { %v6453_v36 = vpop.f32.mrf.mxu1 }
 0x306   : > { %v2897_v57 = vadd.f32 %v6453_v36, %v2760_v49  ;;  %v3013_v3 = vadd.f32 %v2974_v32, %v2894_v52  ;;  %6540 = vmatprep.subr.msk.mxu1 %vm2002_vm2, %v3014_v37  ;;  %v6475_v2 = vpop.f32.mrf.mxu0  ;;  %v2238_v32 = vadd.f32 %v8039_v61, %v8047_v44 }
 0x307   : > { %v2865_v4 = vpop.f32.mrf.mxu1  ;;  %6541 = vmatpush3.xpose.msk.msra.mxu1 %vm2002_vm2, %v3014_v37 }
 0x308   : > { %6542 = vmatprep.subr.msk.mxu1 %vm2002_vm2, %v3013_v3  ;;  %v3004_v59 = vpop.f32.mrf.mxu0  ;;  %v2896_v26 = vadd.f32 %v2865_v4, %v2755_v6  ;;  %v3016_v63 = vadd.f32 %v6469_v50, %v2897_v57  ;;  %v2408_v0 = vadd.f32 %v8067_v55, %v2238_v32  ;;  %v2258_v55 = vadd.f32 %v8045_v46, %v8057_v51 }
 0x309   : > { %v6456_v9 = vpop.f32.mrf.mxu1 }
 0x30a   : > { %v2899_v17 = vadd.f32 %v6456_v9, %v2770_v19  ;;  %v8086_v25 = vpop.f32.mrf.mxu0  ;;  %v3015_v44 = vadd.f32 %v2984_v23, %v2896_v26  ;;  %v2560_v27 = vadd.f32 %v8055_v40, %v2408_v0  ;;  %v2412_v40 = vadd.f32 %v8075_v14, %v2258_v55 }
 0x30b   : > { %v2875_v58 = vpop.f32.mrf.mxu1  ;;  %6543 = vmatpush3.xpose.msk.msra.mxu1 %vm2002_vm2, %v3013_v3 }
 0x30c   : > { %v2898_v13 = vadd.f32 %v2875_v58, %v2765_v22  ;;  %v3018_v30 = vadd.f32 %v6472_v39, %v2899_v17  ;;  %6547 = vmatprep.subr.msk.mxu1 %vm2002_vm2, %v3016_v63  ;;  %v3200_v11 = vpop.f32.mrf.mxu0  ;;  %v2564_v47 = vadd.f32 %v8065_v54, %v2412_v40 }
 0x30d   : > { %v6459_v61 = vpop.f32.mrf.mxu1 }
 0x30e   : > { %v2901_v50 = vadd.f32 %v6459_v61, %v2780_v12  ;;  %v3017_v21 = vadd.f32 %v2994_v35, %v2898_v13  ;;  %6545 = vmatmul.mubr.msk.f32.vlgmr.msra.gmra.mxu1 %vm2002_vm2, %v2558_v29  ;;  %6554 = vmatprep.subr.msk.mxu0 %vm2002_vm2, %v3018_v30  ;;  %v6501_v34 = vpop.f32.mrf.mxu0 }
 0x30f   : > { %v2885_v20 = vpop.f32.mrf.mxu1  ;;  %6548 = vmatpush3.xpose.msk.msra.mxu1 %vm2002_vm2, %v3016_v63  ;;  %6551 = vmatprep.mubr.msk.f32.mxu1 %vm2002_vm2, %v2559_v31 }
 0x310   : > { %6555 = vmatpush3.xpose.msk.msra.mxu0 %vm2002_vm2, %v3018_v30  ;;  %6549 = vmatprep.subr.msk.mxu1 %vm2002_vm2, %v3015_v44  ;;  %v3210_v45 = vpop.f32.mrf.mxu0  ;;  %v2900_v33 = vadd.f32 %v2885_v20, %v2775_v16  ;;  %v3020_v23 = vadd.f32 %v6475_v2, %v2901_v50 }
 0x311   : > { %6556 = vmatprep.subr.msk.mxu0 %vm2002_vm2, %v3017_v21 }
 0x312   : > { %v6504_v24 = vpop.f32.mrf.mxu0  ;;  %v3019_v18 = vadd.f32 %v3004_v59, %v2900_v33 }
 0x313   : > { %6550 = vmatpush3.xpose.msk.msra.mxu1 %vm2002_vm2, %v3015_v44 }
 0x314   : > { %6557 = vmatpush3.xpose.msk.msra.mxu0 %vm2002_vm2, %v3017_v21  ;;  %6561 = vmatprep.subr.msk.mxu1 %vm2002_vm2, %v3020_v23  ;;  %v3220_v38 = vpop.f32.mrf.mxu0 }
 0x316   : > { %6552 = vmatmul.mubr.msk.f32.vlgmr.msra.gmra.mxu1 %vm2002_vm2, %v2560_v27  ;;  %v6507_v46 = vpop.f32.mrf.mxu0 }
 0x317   : > { %6559 = vmatmul.mubr.msk.f32.vlgmr.msra.gmra.mxu0 %vm2002_vm2, %v2562_v1  ;;  %6562 = vmatpush3.xpose.msk.msra.mxu1 %vm2002_vm2, %v3020_v23  ;;  %v6482_v39 = vpop.f32.mrf.mxu1 }
 0x318   : > { %6565 = vmatprep.mubr.msk.f32.mxu1 %vm2002_vm2, %v2563_v60  ;;  %6563 = vmatprep.subr.msk.mxu1 %vm2002_vm2, %v3019_v18  ;;  %v3230_v56 = vpop.f32.mrf.mxu0  ;;  %v3206_v36 = vadd.f32 %v8086_v25, %v6482_v39 }
 0x319   : > { %v3095_v51 = vpop.f32.mrf.mxu1 }
 0x31a   : > { %v3201_v2 = vadd.f32 %v3200_v11, %v3095_v51 }
 0x31b   : > { %6564 = vmatpush3.xpose.msk.msra.mxu1 %vm2002_vm2, %v3019_v18  ;;  %v6485_v53 = vpop.f32.mrf.mxu1 }
 0x31c   : > { %v3216_v6 = vadd.f32 %v6501_v34, %v6485_v53 }
 0x31d   : > { %v3105_v48 = vpop.f32.mrf.mxu1 }
 0x31e   : > { %6566 = vmatmul.mubr.msk.f32.vlgmr.msra.gmra.mxu1 %vm2002_vm2, %v2564_v47  ;;  %v3211_v42 = vadd.f32 %v3210_v45, %v3105_v48 }
 0x31f   : > { %v6488_v49 = vpop.f32.mrf.mxu1  ;;  %v6530_v52 = vpop.f32.mrf.mxu0 }
 0x320   : > { %v3226_v63 = vadd.f32 %v6504_v24, %v6488_v49 }
 0x321   : > { %v3115_v37 = vpop.f32.mrf.mxu1  ;;  %v3430_v35 = vpop.f32.mrf.mxu0 }
 0x322   : > { %v3221_v10 = vadd.f32 %v3220_v38, %v3115_v37 }
 0x323   : > { %v6491_v14 = vpop.f32.mrf.mxu1  ;;  %v6533_v3 = vpop.f32.mrf.mxu0 }
 0x324   : > { %v3236_v30 = vadd.f32 %v6507_v46, %v6491_v14 }
 0x325   : > { %v3125_v57 = vpop.f32.mrf.mxu1  ;;  %v3440_v59 = vpop.f32.mrf.mxu0 }
 0x326   : > { %v8127_v4 = vadd.f32 %v3230_v56, %v3125_v57 }
 0x327   : > { %v6514_v5 = vpop.f32.mrf.mxu1  ;;  %v6536_v25 = vpop.f32.mrf.mxu0 }
 0x328   : > { %v3351_v19 = vadd.f32 %v6514_v5, %v3206_v36 }
 0x329   : > { %v3311_v54 = vpop.f32.mrf.mxu1  ;;  %v3450_v31 = vpop.f32.mrf.mxu0 }
 0x32a   : > { %v3350_v9 = vadd.f32 %v3311_v54, %v3201_v2  ;;  %v3470_v22 = vadd.f32 %v6530_v52, %v3351_v19 }
 0x32b   : > { %v6517_v26 = vpop.f32.mrf.mxu1  ;;  %v6539_v20 = vpop.f32.mrf.mxu0 }
 0x32c   : > { %v3353_v17 = vadd.f32 %v6517_v26, %v3216_v6  ;;  %v3469_v32 = vadd.f32 %v3430_v35, %v3350_v9  ;;  %6568 = vmatprep.subr.mxu0 %v3470_v22 }
 0x32d   : > { %v3321_v58 = vpop.f32.mrf.mxu1  ;;  %6569 = vmatpush3.msra.mxu0 %v3470_v22  ;;  %v8144_v38 = vpop.f32.mrf.mxu0 }
 0x32e   : > { %v3352_v29 = vadd.f32 %v3321_v58, %v3211_v42  ;;  %v3472_v12 = vadd.f32 %v6533_v3, %v3353_v17  ;;  %6570 = vmatprep.subr.mxu0 %v3469_v32 }
 0x32f   : > { %6571 = vmatpush3.msra.mxu0 %v3469_v32  ;;  %v6520_v13 = vpop.f32.mrf.mxu1 }
 0x330   : > { %v3471_v11 = vadd.f32 %v3440_v59, %v3352_v29  ;;  %v3355_v15 = vadd.f32 %v6520_v13, %v3226_v63  ;;  %6575 = vmatprep.subr.mxu1 %v3472_v12 }
 0x331   : > { %6576 = vmatpush3.msra.mxu1 %v3472_v12  ;;  %v3331_v62 = vpop.f32.mrf.mxu1 }
 0x332   : > { %v3354_v61 = vadd.f32 %v3331_v62, %v3221_v10  ;;  %v8129_v44 = vadd.f32 %v6536_v25, %v3355_v15  ;;  %6577 = vmatprep.subr.mxu1 %v3471_v11 }
 0x333   : > { %6578 = vmatpush3.msra.mxu1 %v3471_v11  ;;  %v6523_v50 = vpop.f32.mrf.mxu1 }
 0x334   : > { %v3357_v21 = vadd.f32 %v6523_v50, %v3236_v30  ;;  %v8131_v34 = vadd.f32 %v3450_v31, %v3354_v61  ;;  %6582 = vmatprep.subr.mxu0 %v8129_v44 }
 0x335   : > { %v8141_v16 = vpop.f32.mrf.mxu1 }
 0x336   : > { %v8134_v0 = vadd.f32 %v6539_v20, %v3357_v21 }
 0x338   : > { %6589 = vmatprep.subr.mxu1 %v8134_v0 }
 0x3ce   : > { %v6546_v45 = vpop.f32.mrf.mxu1 }
 0x3cf   : > { %v3826_v28 = vmul.f32 0.25, %v6546_v45 }
 0x3d0   : > { %v3555_v33 = vpop.f32.mrf.mxu1 }
 0x3d1   : > { %v3825_v23 = vmul.f32 0.25, %v3555_v33  ;;  %v3841_v24 = vadd.f32 %v5839_v41, %v3826_v28 }
 0x3d3   : > { %v3851_v55 = vsel %vm2002_vm2, %v3841_v24, -inf  ;;  %v3840_v27 = vadd.f32 %v5839_v41, %v3825_v23 }
 0x3d4   : > { %3852 = vmax.xlane.f32.xlu0 %v3851_v55 }
 0x3d5   : > { %v3848_v39 = vsel %vm2002_vm2, %v3840_v27, -inf }
 0x3d6   : > { %v6553_v1 = vpop.f32.mrf.mxu1 }
 0x3d7   : > { %v3828_v60 = vmul.f32 0.25, %v6553_v1  ;;  %v6560_v18 = vpop.f32.mrf.mxu0 }
 0x3d8   : > { %v3830_v46 = vmul.f32 0.25, %v6560_v18  ;;  %3849 = vmax.xlane.f32.xlu0 %v3848_v39  ;;  %v3642_v40 = vpop.f32.mrf.mxu1 }
 0x3d9   : > { %v3729_v51 = vpop.f32.mrf.mxu0  ;;  %v3827_v53 = vmul.f32 0.25, %v3642_v40  ;;  %v3843_v56 = vadd.f32 %v5839_v41, %v3828_v60 }
 0x3da   : > { %v3829_v47 = vmul.f32 0.25, %v3729_v51  ;;  %v3845_v52 = vadd.f32 %v5839_v41, %v3830_v46 }
 0x3db   : > { %v3857_v48 = vsel %vm2002_vm2, %v3843_v56, -inf  ;;  %v3842_v49 = vadd.f32 %v5839_v41, %v3827_v53 }
 0x3dc   : > { %3858 = vmax.xlane.f32.xlu0 %v3857_v48  ;;  %v3844_v35 = vadd.f32 %v5839_v41, %v3829_v47  ;;  %v3863_v36 = vsel %vm2002_vm2, %v3845_v52, -inf }
 0x3dd   : > { %v3854_v37 = vsel %vm2002_vm2, %v3842_v49, -inf }
 0x3de   : > { %3855 = vmax.xlane.f32.xlu1 %v3854_v37  ;;  %v6567_v10 = vpop.f32.mrf.mxu1  ;;  %v3860_v2 = vsel %vm2002_vm2, %v3844_v35, -inf }
 0x3df   : > { %v3832_v14 = vmul.f32 0.25, %v6567_v10 }
 0x3e0   : > { %3864 = vmax.xlane.f32.xlu0 %v3863_v36  ;;  %v3816_v57 = vpop.f32.mrf.mxu1 }
 0x3e1   : > { %v3831_v3 = vmul.f32 0.25, %v3816_v57  ;;  %v3847_v5 = vadd.f32 %v5839_v41, %v3832_v14 }
 0x3e2   : > { %3861 = vmax.xlane.f32.xlu1 %v3860_v2 }
 0x3e3   : > { %v3869_v6 = vsel %vm2002_vm2, %v3847_v5, -inf  ;;  %v3846_v19 = vadd.f32 %v5839_v41, %v3831_v3 }
 0x3e4   : > { %3870 = vmax.xlane.f32.xlu0 %v3869_v6 }
 0x3e5   : > { %v3866_v54 = vsel %vm2002_vm2, %v3846_v19, -inf }
 0x3e6   : > { %3867 = vmax.xlane.f32.xlu1 %v3866_v54  ;;  %v3356_v54 = vadd.f32 %v8141_v16, %v8127_v4 }
 0x45d   : > { %v3853_v59 = vpop.xlane.xlu0 %3852 }
 0x45e   : > { %v3873_v42 = vsub.f32 %v3841_v24, %v3853_v59 }
 0x460   : > { %v3882_v9 = vmul.f32 1.442695, %v3873_v42 }
 0x461   : > { %v3850_v22 = vpop.xlane.xlu0 %3849 }
 0x462   : > { %6886 = vpow2.f32 %v3882_v9  ;;  %v3872_v26 = vsub.f32 %v3840_v27, %v3850_v22 }
 0x464   : > { %v3880_v63 = vmul.f32 1.442695, %v3872_v26 }
 0x465   : > { %v3859_v17 = vpop.xlane.xlu0 %3858 }
 0x466   : > { %6888 = vpow2.f32 %v3880_v63  ;;  %v3875_v32 = vsub.f32 %v3843_v56, %v3859_v17  ;;  %v3475_v63 = vadd.f32 %v8144_v38, %v3356_v54  ;;  %v4261_v38 = vld [vmem:[%s8593_s3 + $0x8] sm:$0xff] }
 0x467   : > { %v3856_v58 = vpop.xlane.xlu1 %3855 }
 0x468   : > { %v3886_v25 = vmul.f32 1.442695, %v3875_v32  ;;  %v3874_v29 = vsub.f32 %v3842_v49, %v3856_v58  ;;  %v5849_v32 = vld [vmem:[%s8593_s3 + $0x18] sm:$0xff]  ;;  %v5848_v58 = vld [vmem:[%s8593_s3 + $0x10] sm:$0xff] }
 0x469   : > { %v3865_v12 = vpop.xlane.xlu0 %3864 }
 0x46a   : > { %6890 = vpow2.f32 %v3886_v25  ;;  %v3884_v13 = vmul.f32 1.442695, %v3874_v29  ;;  %v3877_v30 = vsub.f32 %v3845_v52, %v3865_v12  ;;  %v5855_v25 = vld [vmem:[%s8593_s3 + $0x28] sm:$0xff]  ;;  %v5859_v29 = vld [vmem:[%s8593_s3 + $0x38] sm:$0xff] }
 0x46b   : > { %v3862_v11 = vpop.xlane.xlu1 %3861 }
 0x46c   : > { %6892 = vpow2.f32 %v3884_v13  ;;  %v3890_v15 = vmul.f32 1.442695, %v3877_v30  ;;  %v3876_v62 = vsub.f32 %v3844_v35, %v3862_v11  ;;  %v5858_v30 = vld [vmem:[%s8593_s3 + $0x30] sm:$0xff] }
 0x46d   : > { %v3871_v31 = vpop.xlane.xlu0 %3870 }
 0x46e   : > { %v3888_v61 = vmul.f32 1.442695, %v3876_v62  ;;  %v3879_v50 = vsub.f32 %v3847_v5, %v3871_v31  ;;  %6894 = vpow2.f32 %v3890_v15  ;;  %v5854_v31 = vld [vmem:[%s8593_s3 + $0x20] sm:$0xff] }
 0x46f   : > { %v6887_v21 = vpop.eup %6886  ;;  %v3868_v20 = vpop.xlane.xlu1 %3867 }
 0x470   : > { %6896 = vpow2.f32 %v3888_v61  ;;  %v3894_v45 = vmul.f32 1.442695, %v3879_v50  ;;  %v3878_v41 = vsub.f32 %v3846_v19, %v3868_v20  ;;  %v3899_v28 = vsel %vm2002_vm2, %v6887_v21, 0.0  ;;  %v6830_v20 = vld [vmem:[%s8597_s7 + $0x78] sm:$0xff]  }
 0x471   : > { %3900 = vadd.xlane.f32.xlu1 %v3899_v28  ;;  %v6835_v28 = vld [vmem:[%s8597_s7 + $0xf8] sm:$0xff]  }
 0x472   : > { %v3892_v33 = vmul.f32 1.442695, %v3878_v41  ;;  %6898 = vpow2.f32 %v3894_v45  ;;  %v6831_v45 = vld [vmem:[%s8597_s7 + $0x38] sm:$0xff]   ;;  %v6832_v41 = vld [vmem:[%s8597_s7 + $0x70] sm:$0xff]  }
 0x473   : > { %v6889_v23 = vpop.eup %6888 }
 0x474   : > { %6900 = vpow2.f32 %v3892_v33  ;;  %v3896_v24 = vsel %vm2002_vm2, %v6889_v23, 0.0  ;;  %v6837_v33 = vld [vmem:[%s8597_s7 + $0xb8] sm:$0xff]  }
 0x475   : > { %3897 = vadd.xlane.f32.xlu1 %v3896_v24  ;;  %v6839_v24 = vld [vmem:[%s8597_s7 + $0xf0] sm:$0xff]  }
 0x477   : > { %v6891_v55 = vpop.eup %6890 }
 0x478   : > { %v3905_v27 = vsel %vm2002_vm2, %v6891_v55, 0.0 }
 0x479   : > { %v6893_v1 = vpop.eup %6892  ;;  %3906 = vadd.xlane.f32.xlu0 %v3905_v27  ;;  %v6841_v27 = vld [vmem:[%s8597_s7 + $0xb0] sm:$0xff]  }
 0x47a   : > { %v3902_v18 = vsel %vm2002_vm2, %v6893_v1, 0.0 }
 0x47b   : > { %v6895_v60 = vpop.eup %6894 }
 0x47c   : > { %v3911_v51 = vsel %vm2002_vm2, %v6895_v60, 0.0 }
 0x47d   : > { %v6897_v39 = vpop.eup %6896  ;;  %3903 = vadd.xlane.f32.xlu0 %v3902_v18  ;;  %v6838_v18 = vld [vmem:[%s8597_s7 + $0x60] sm:$0xff]  }
 0x47e   : > { %v3908_v46 = vsel %vm2002_vm2, %v6897_v39, 0.0 }
 0x47f   : > { %3909 = vadd.xlane.f32.xlu1 %v3908_v46  ;;  %v6899_v40 = vpop.eup %6898  ;;  %v6847_v46 = vld [vmem:[%s8597_s7 + $0xe0] sm:$0xff]  }
 0x480   : > { %v3917_v47 = vsel %vm2002_vm2, %v6899_v40, 0.0 }
 0x481   : > { %v6901_v53 = vpop.eup %6900  ;;  %3912 = vadd.xlane.f32.xlu0 %v3911_v51  ;;  %v6842_v51 = vld [vmem:[%s8597_s7 + $0x58] sm:$0xff]  }
 0x482   : > { %v3914_v56 = vsel %vm2002_vm2, %v6901_v53, 0.0 }
 0x483   : > { %3915 = vadd.xlane.f32.xlu1 %v3914_v56  ;;  %v6846_v56 = vld [vmem:[%s8597_s7 + $0x50] sm:$0xff]  }
 0x485   : > { %3918 = vadd.xlane.f32.xlu0 %v3917_v47 }
 0x4fa   : > { %v3901_v48 = vpop.xlane.xlu1 %3900 }
 0x4fb   : > { %6902 = vrcp.f32 %v3901_v48 }
 0x4fe   : > { %v3898_v49 = vpop.xlane.xlu1 %3897 }
 0x4ff   : > { %6904 = vrcp.f32 %v3898_v49 }
 0x502   : > { %v3907_v52 = vpop.xlane.xlu0 %3906 }
 0x503   : > { %6906 = vrcp.f32 %v3907_v52 }
 0x506   : > { %v3904_v37 = vpop.xlane.xlu0 %3903 }
 0x507   : > { %6908 = vrcp.f32 %v3904_v37 }
 0x508   : > { %v3910_v35 = vpop.xlane.xlu1 %3909  ;;  %v6903_v14 = vpop.eup %6902 }
 0x509   : > { %6910 = vrcp.f32 %v3910_v35  ;;  %v3923_v5 = vmul.f32 %v6903_v14, %v6887_v21 }
 0x50a   : > { %v3913_v10 = vpop.xlane.xlu0 %3912 }
 0x50b   : > { %6912 = vrcp.f32 %v3913_v10 }
 0x50c   : > { %v6905_v36 = vpop.eup %6904  ;;  %v3916_v57 = vpop.xlane.xlu1 %3915 }
 0x50d   : > { %6914 = vrcp.f32 %v3916_v57  ;;  %v3921_v3 = vmul.f32 %v6905_v36, %v6889_v23  ;;  %v6833_v23 = vld [vmem:[%s8597_s7 + $0x30] sm:$0xff]  }
 0x50e   : > { %v3919_v2 = vpop.xlane.xlu0 %3918 }
 0x50f   : > { %6916 = vrcp.f32 %v3919_v2  ;;  %6572 = vmatprep.mubr.msk.f32.mxu0 %vm2002_vm2, %v3921_v3 }
 0x510   : > { %6573 = vmatmul.mubr.msk.f32.vlgmr.msra.gmra.mxu0 %vm2002_vm2, %v3923_v5  ;;  %v6907_v6 = vpop.eup %6906 }
 0x511   : > { %6583 = vmatpush3.msra.mxu0 %v8129_v44  ;;  %v3927_v9 = vmul.f32 %v6907_v6, %v6891_v55  ;;  %v6834_v55 = vld [vmem:[%s8597_s7 + $0x68] sm:$0xff]  }
 0x512   : > { %6584 = vmatprep.subr.mxu0 %v8131_v34 }
 0x513   : > { %6585 = vmatpush3.msra.mxu0 %v8131_v34 }
 0x514   : > { %v6909_v19 = vpop.eup %6908  ;;  %6596 = vmatprep.subr.mxu0 %v5849_v32 }
 0x515   : > { %v3925_v59 = vmul.f32 %v6909_v19, %v6893_v1  ;;  %v6843_v1 = vld [vmem:[%s8597_s7 + $0xe8] sm:$0xff]  }
 0x516   : > { %v6911_v42 = vpop.eup %6910 }
 0x517   : > { %6579 = vmatprep.mubr.msk.f32.mxu1 %vm2002_vm2, %v3925_v59  ;;  %v3929_v22 = vmul.f32 %v6911_v42, %v6897_v39  ;;  %v6845_v39 = vld [vmem:[%s8597_s7 + $0xa8] sm:$0xff]  }
 0x518   : > { %v6913_v26 = vpop.eup %6912  ;;  %6580 = vmatmul.mubr.msk.f32.vlgmr.msra.gmra.mxu1 %vm2002_vm2, %v3927_v9 }
 0x519   : > { %6590 = vmatpush3.msra.mxu1 %v8134_v0  ;;  %6586 = vmatprep.mubr.msk.f32.mxu0 %vm2002_vm2, %v3929_v22  ;;  %v3931_v44 = vmul.f32 %v6913_v26, %v6895_v60  ;;  %v4260_v0 = vld [vmem:[%s8593_s3] sm:$0xff]  ;;  %v6836_v60 = vld [vmem:[%s8597_s7 + $0x28] sm:$0xff]  }
 0x51a   : > { %v6915_v34 = vpop.eup %6914  ;;  %6591 = vmatprep.subr.mxu1 %v3475_v63 }
 0x51b   : > { %6592 = vmatpush3.msra.mxu1 %v3475_v63  ;;  %6587 = vmatmul.mubr.msk.f32.vlgmr.msra.gmra.mxu0 %vm2002_vm2, %v3931_v44  ;;  %v3933_v4 = vmul.f32 %v6915_v34, %v6901_v53  ;;  %v6844_v53 = vld [vmem:[%s8597_s7 + $0x18] sm:$0xff]  }
 0x51c   : > { %v6917_v16 = vpop.eup %6916  ;;  %6603 = vmatprep.subr.mxu1 %v4261_v38  ;;  %6597 = vmatpush3.msra.mxu0 %v5849_v32 }
 0x51d   : > { %6593 = vmatprep.mubr.msk.f32.mxu1 %vm2002_vm2, %v3933_v4  ;;  %v3935_v17 = vmul.f32 %v6917_v16, %v6899_v40  ;;  %6598 = vmatprep.subr.mxu0 %v5848_v58  ;;  %v6840_v40 = vld [vmem:[%s8597_s7 + $0x20] sm:$0xff]  }
 0x51e   : > { %6599 = vmatpush3.msra.mxu0 %v5848_v58 }
 0x51f   : > { %6594 = vmatmul.mubr.msk.f32.vlgmr.msra.gmra.mxu1 %vm2002_vm2, %v3935_v17  ;;  %6610 = vmatprep.subr.mxu0 %v5855_v25 }
 0x520   : > { %6604 = vmatpush3.msra.mxu1 %v4261_v38 }
 0x521   : > { %6605 = vmatprep.subr.mxu1 %v4260_v0 }
 0x522   : > { %6606 = vmatpush3.msra.mxu1 %v4260_v0 }
 0x523   : > { %6617 = vmatprep.subr.mxu1 %v5859_v29 }
 0x5d0   : > { %v6574_v12 = vpop.f32.mrf.mxu0 }
 0x5d2   : > { %v4008_v13 = vpop.f32.mrf.mxu0 }
 0x5d3   : > { %6607 = vmatprep.mubr.msk.f32.mxu1 %vm2002_vm2, %v4008_v13 }
 0x5d4   : > { %6608 = vmatmul.mubr.msk.f32.vlgmr.msra.gmra.mxu1 %vm2002_vm2, %v6574_v12 }
 0x5d5   : > { %6618 = vmatpush3.msra.mxu1 %v5859_v29 }
 0x5d6   : > { %6619 = vmatprep.subr.mxu1 %v5858_v30 }
 0x5d7   : > { %6620 = vmatpush3.msra.mxu1 %v5858_v30 }
 0x5d8   : > { %v6581_v11 = vpop.f32.mrf.mxu1  ;;  %6271 = vmatprep.subr.bf16.mxu1 %v6835_v28 }
 0x5da   : > { %v4089_v15 = vpop.f32.mrf.mxu1 }
 0x5db   : > { %v6588_v62 = vpop.f32.mrf.mxu0  ;;  %6600 = vmatprep.mubr.msk.f32.mxu0 %vm2002_vm2, %v4089_v15 }
 0x5dc   : > { %6601 = vmatmul.mubr.msk.f32.vlgmr.msra.gmra.mxu0 %vm2002_vm2, %v6581_v11 }
 0x5dd   : > { %v4170_v61 = vpop.f32.mrf.mxu0  ;;  %6611 = vmatpush3.msra.mxu0 %v5855_v25 }
 0x5de   : > { %6612 = vmatprep.subr.mxu0 %v5854_v31  ;;  %6614 = vmatprep.mubr.msk.f32.mxu0 %vm2002_vm2, %v4170_v61 }
 0x5df   : > { %v6595_v50 = vpop.f32.mrf.mxu1  ;;  %6613 = vmatpush3.msra.mxu0 %v5854_v31 }
 0x5e0   : > { %6615 = vmatmul.mubr.msk.f32.vlgmr.msra.gmra.mxu0 %vm2002_vm2, %v6588_v62  ;;  %6249 = vmatprep.subr.bf16.mxu0 %v6830_v20 }
 0x5e1   : > { %v4251_v21 = vpop.f32.mrf.mxu1  ;;  %6250 = vmatpush3.bf16.msra.mxu0 %v6831_v45 }
 0x5e2   : > { %6621 = vmatprep.mubr.msk.f32.mxu1 %vm2002_vm2, %v4251_v21  ;;  %6251 = vmatprep.subr.bf16.mxu0 %v6832_v41 }
 0x5e3   : > { %6622 = vmatmul.mubr.msk.f32.vlgmr.msra.gmra.mxu1 %vm2002_vm2, %v6595_v50 }
 0x5e4   : > { %6272 = vmatpush3.bf16.msra.mxu1 %v6837_v33 }
 0x5e5   : > { %6273 = vmatprep.subr.bf16.mxu1 %v6839_v24  ;;  %6252 = vmatpush3.bf16.msra.mxu0 %v6833_v23 }
 0x5e6   : > { %6253 = vmatprep.subr.bf16.mxu0 %v6834_v55 }
 0x5e8   : > { %6274 = vmatpush3.bf16.msra.mxu1 %v6841_v27  ;;  %v6848_v27 = vld [vmem:[%s8597_s7 + $0x10] sm:$0xff]  }
 0x5e9   : > { %6275 = vmatprep.subr.bf16.mxu1 %v6843_v1  ;;  %6254 = vmatpush3.bf16.msra.mxu0 %v6836_v60  ;;  %v6849_v1 = vld [vmem:[%s8597_s7 + $0xa0] sm:$0xff]   ;;  %v6850_v60 = vld [vmem:[%s8597_s7 + $0x48] sm:$0xff]  }
 0x5ea   : > { %6255 = vmatprep.subr.bf16.mxu0 %v6838_v18 }
 0x5ec   : > { %6276 = vmatpush3.bf16.msra.mxu1 %v6845_v39 }
 0x5ed   : > { %6277 = vmatprep.subr.bf16.mxu1 %v6847_v46  ;;  %6256 = vmatpush3.bf16.msra.mxu0 %v6840_v40 }
 0x5ee   : > { %6257 = vmatprep.subr.bf16.mxu0 %v6842_v51  ;;  %v6851_v51 = vld [vmem:[%s8597_s7 + $0xd8] sm:$0xff]  }
 0x5f0   : > { %6278 = vmatpush3.bf16.msra.mxu1 %v6849_v1 }
 0x5f1   : > { %6258 = vmatpush3.bf16.msra.mxu0 %v6844_v53  ;;  %6279 = vmatprep.subr.bf16.mxu1 %v6851_v51 }
 0x5f2   : > { %6259 = vmatprep.subr.bf16.mxu0 %v6846_v56 }
 0x5f5   : > { %6260 = vmatpush3.bf16.msra.mxu0 %v6848_v27 }
 0x5f6   : > { %6261 = vmatprep.subr.bf16.mxu0 %v6850_v60 }
 0x694   : > { %v6609_v47 = vpop.f32.mrf.mxu1 }
 0x696   : > { %v4418_v37 = vpop.f32.mrf.mxu1 }
 0x69c   : > { %v6602_v48 = vpop.f32.mrf.mxu0 }
 0x69d   : > { %v4424_v52 = vadd.f32 %v6609_v47, %v6602_v48 }
 0x69e   : > { %v4337_v49 = vpop.f32.mrf.mxu0 }
 0x69f   : > { %v4419_v10 = vadd.f32 %v4418_v37, %v4337_v49  ;;  %v6852_v49 = vld [vmem:[%s8597_s7 + $0x8] sm:$0xff]  }
 0x6a0   : > { %v6616_v35 = vpop.f32.mrf.mxu0  ;;  %6262 = vmatpush3.bf16.msra.mxu0 %v6852_v49 }
 0x6a1   : > { %v4512_v14 = vadd.f32 %v6616_v35, %v4424_v52  ;;  %v6853_v52 = vld [vmem:[%s8597_s7 + $0x98] sm:$0xff]  }
 0x6a2   : > { %v4502_v36 = vpop.f32.mrf.mxu0  ;;  %6280 = vmatpush3.bf16.msra.mxu1 %v6853_v52 }
 0x6a3   : > { %v4511_v57 = vadd.f32 %v4502_v36, %v4419_v10  ;;  %v6623_v3 = vpop.f32.mrf.mxu1  ;;  %v6854_v36 = vld [vmem:[%s8597_s7 + $0x40] sm:$0xff]  }
 0x6a4   : > { %v8262_v2 = vadd.f32 %v6623_v3, %v4512_v14  ;;  %6263 = vmatprep.subr.bf16.mxu0 %v6854_v36 }
 0x6a5   : > { %v4588_v5 = vpop.f32.mrf.mxu1 }
 0x6a6   : > { %v4614_v6 = vadd.f32 1.0, %v8262_v2  ;;  %v8265_v19 = vadd.f32 %v4588_v5, %v4511_v57  ;;  %vm4630_vm3 = vcmp.ge.f32.partialorder %v8262_v2, -1.0  ;;  %vm4632_vm4 = vcmp.lt.f32.partialorder %v8262_v2, 1.0  ;;  %v6855_v57 = vld [vmem:[%s8597_s7 + $0xd0] sm:$0xff]  }
 0x6a7   : > { %vm4634_vm7 = vmand %vm4630_vm3, %vm4632_vm4  ;;  %6281 = vmatprep.subr.bf16.mxu1 %v6855_v57 }
 0x6a8   : > { %v4616_v54 = vmul.f32 2.5, %v4614_v6  ;;  %v4613_v59 = vadd.f32 1.0, %v8265_v19  ;;  %vm4629_vm5 = vcmp.ge.f32.partialorder %v8265_v19, -1.0  ;;  %vm4631_vm6 = vcmp.lt.f32.partialorder %v8265_v19, 1.0 }
 0x6a9   : > { %vm4633_vm8 = vmand %vm4629_vm5, %vm4631_vm6  ;;  %v5865_v25 = vsel %vm4634_vm7, 1.0, %v6942_v43 }
 0x6aa   : > { %v4618_v42 = vmax.f32 %v4616_v54, 0.0  ;;  %v4615_v9 = vmul.f32 2.5, %v4613_v59  ;;  %v8280_v12 = vsel %vm4633_vm8, 1.0, %v6942_v43 }
 0x6ac   : > { %v4620_v22 = vmin.f32 %v4618_v42, 5.0  ;;  %v4617_v26 = vmax.f32 %v4615_v9, 0.0 }
 0x6ae   : > { %v4622_v63 = vfloor.f32 %v4620_v22  ;;  %v4619_v44 = vmin.f32 %v4617_v26, 5.0 }
 0x6b0   : > { %v4624_v34 = vmax.f32 %v4622_v63, 0.0  ;;  %v4621_v4 = vfloor.f32 %v4619_v44 }
 0x6b2   : > { %v8272_v16 = vmin.f32 %v4624_v34, 4.0  ;;  %v4623_v17 = vmax.f32 %v4621_v4, 0.0 }
 0x6b4   : > { %v4628_v38 = vsub.f32 %v4620_v22, %v8272_v16  ;;  %v8275_v0 = vmin.f32 %v4623_v17, 4.0  ;;  %vm4680_vm9 = vcmp.eq.f32.partialorder %v8272_v16, 0.0  ;;  %vm4704_vm10 = vcmp.eq.f32.partialorder %v8272_v16, 3.0 }
 0x6b5   : > { %vm4684_vm11 = vcmp.eq.f32.partialorder %v8272_v16, 1.0  ;;  %vm4692_vm12 = vcmp.eq.f32.partialorder %v8272_v16, 2.0  ;;  %vm4720_vm2 = vcmp.eq.f32.partialorder %v8272_v16, 4.0 }
 0x6b6   : > { %v4640_v32 = vmul.f32 %v4628_v38, %v4628_v38  ;;  %v4644_v58 = vsub.f32 1.0, %v4628_v38  ;;  %v4627_v29 = vsub.f32 %v4619_v44, %v8275_v0  ;;  %v4668_v15 = vmul.f32 0.5, %v4628_v38  ;;  %v6856_v44 = vld [vmem:[%s8597_s7] sm:$0xff]  }
 0x6b7   : > { %vm4679_vm13 = vcmp.eq.f32.partialorder %v8275_v0, 0.0  ;;  %vm4683_vm14 = vcmp.eq.f32.partialorder %v8275_v0, 1.0  ;;  %vm4691_vm15 = vcmp.eq.f32.partialorder %v8275_v0, 2.0  ;;  %vm4703_vm3 = vcmp.eq.f32.partialorder %v8275_v0, 3.0  ;;  %6264 = vmatpush3.bf16.msra.mxu0 %v6856_v44 }
 0x6b8   : > { %v4642_v13 = vmul.f32 %v4640_v32, %v4628_v38  ;;  %v4646_v30 = vmul.f32 %v4644_v58, %v4644_v58  ;;  %v4664_v11 = vmul.f32 0.5, %v4640_v32  ;;  %v4639_v62 = vmul.f32 %v4627_v29, %v4627_v29  ;;  %6624 = vmatprep.subr.bf16.mxu0 %v6942_v43 }
 0x6b9   : > { %v4643_v31 = vsub.f32 1.0, %v4627_v29  ;;  %v4667_v41 = vmul.f32 0.5, %v4627_v29  ;;  %vm4719_vm4 = vcmp.eq.f32.partialorder %v8275_v0, 4.0 }
 0x6ba   : > { %v4654_v61 = vmul.f32 0.5, %v4642_v13  ;;  %v4662_v50 = vmul.f32 -0.5, %v4642_v13  ;;  %v4676_v21 = vmul.f32 0.16666667, %v4642_v13  ;;  %v4648_v20 = vmul.f32 %v4646_v30, %v4644_v58  ;;  %v6858_v30 = vld [vmem:[%s8597_s7 + $0xc8] sm:$0xff]  }
 0x6bb   : > { %v4641_v45 = vmul.f32 %v4639_v62, %v4627_v29  ;;  %v4645_v28 = vmul.f32 %v4643_v31, %v4643_v31  ;;  %v4663_v24 = vmul.f32 0.5, %v4639_v62 }
 0x6bc   : > { %v4656_v33 = vsub.f32 %v4654_v61, %v4640_v32  ;;  %v4666_v23 = vadd.f32 %v4664_v11, %v4662_v50  ;;  %v4650_v55 = vmul.f32 0.16666667, %v4648_v20  ;;  %v8302_v47 = vmul.f32 %v5865_v25, %v4676_v21  ;;  %v6857_v32 = vld [vmem:[%s8597_s7 + $0x90] sm:$0xff]  }
 0x6bd   : > { %v4653_v18 = vmul.f32 0.5, %v4641_v45  ;;  %v4661_v39 = vmul.f32 -0.5, %v4641_v45  ;;  %v4675_v46 = vmul.f32 0.16666667, %v4641_v45  ;;  %v4647_v40 = vmul.f32 %v4645_v28, %v4643_v31  ;;  %6282 = vmatpush3.bf16.msra.mxu1 %v6857_v32 }
 0x6be   : > { %v4658_v53 = vadd.f32 0.6666667, %v4656_v33  ;;  %v4670_v56 = vadd.f32 %v4668_v15, %v4666_v23  ;;  %v8304_v48 = vmul.f32 %v5865_v25, %v4650_v55  ;;  %v4748_v21 = vsel %vm4704_vm10, %v8302_v47, 0.0  ;;  %v6859_v33 = vld [vmem:[%s8597_s7 + $0x88] sm:$0xff]   ;;  %6283 = vmatprep.subr.bf16.mxu1 %v6858_v30 }
 0x6bf   : > { %v4655_v37 = vsub.f32 %v4653_v18, %v4639_v62  ;;  %v4665_v35 = vadd.f32 %v4663_v24, %v4661_v39  ;;  %v8313_v10 = vmul.f32 %v8280_v12, %v4675_v46  ;;  %v4649_v14 = vmul.f32 0.16666667, %v4647_v40 }
 0x6c0   : > { %v8321_v3 = vmul.f32 %v5865_v25, %v4658_v53  ;;  %v4672_v5 = vadd.f32 0.16666667, %v4670_v56  ;;  %v4682_v6 = vsel %vm4680_vm9, %v8304_v48, 0.0  ;;  %v8331_v9 = vsel %vm4704_vm10, %v8304_v48, 0.0  ;;  %v6861_v53 = vld [vmem:[%s8597_s7 + $0xc0] sm:$0xff]  }
 0x6c1   : > { %v4657_v54 = vadd.f32 0.6666667, %v4655_v37  ;;  %v4669_v59 = vadd.f32 %v4667_v41, %v4665_v35  ;;  %v4651_v42 = vmul.f32 %v8280_v12, %v4649_v14  ;;  %v4694_v26 = vsel %vm4692_vm12, %v8304_v48, 0.0  ;;  %6284 = vmatpush3.bf16.msra.mxu1 %v6859_v33  ;;  %v6862_v35 = vld [vmem:[%s8597_s7 + $0x80] sm:$0xff]  }
 0x6c2   : > { %v8333_v22 = vmul.f32 %v5865_v25, %v4672_v5  ;;  %v4696_v63 = vsel %vm4684_vm11, %v8321_v3, 0.0  ;;  %v4747_v38 = vsel %vm4703_vm3, %v8313_v10, 0.0  ;;  %v4722_v41 = vsel %vm4720_vm2, %v8304_v48, 0.0  ;;  %6285 = vmatprep.subr.bf16.mxu1 %v6861_v53 }
 0x6c3   : > { %v8346_v34 = vmul.f32 %v8280_v12, %v4657_v54  ;;  %v4671_v4 = vadd.f32 0.16666667, %v4669_v59  ;;  %v4681_v17 = vsel %vm4679_vm13, %v4651_v42, 0.0  ;;  %v4698_v25 = vadd.f32 %v4696_v63, %v4694_v26 }
 0x6c4   : > { %v6707_v58 = vpack.i.bf16 %v4682_v6, %v4681_v17  ;;  %v4700_v29 = vsel %vm4680_vm9, %v8333_v22, 0.0  ;;  %v4705_v13 = vsel %vm4703_vm3, %v4651_v42, 0.0  ;;  %v4693_v15 = vsel %vm4691_vm15, %v4651_v42, 0.0 }
 0x6c5   : > { %v4673_v11 = vmul.f32 %v8280_v12, %v4671_v4  ;;  %v4695_v62 = vsel %vm4683_vm14, %v8346_v34, 0.0  ;;  %v4746_v31 = vsel %vm4720_vm2, %v8333_v22, 0.0  ;;  %v4702_v50 = vadd.f32 %v4700_v29, %v4698_v25  ;;  %6286 = vmatpush3.bf16.msra.mxu1 %v6862_v35 }
 0x6c6   : > { %6708 = vrot.lane.b32.xlu0 %v6707_v58, %s6943_s19  ;;  %v4697_v61 = vadd.f32 %v4695_v62, %v4693_v15  ;;  %v4721_v12 = vsel %vm4719_vm4, %v4651_v42, 0.0  ;;  %v4723_v28 = vsel %vm4703_vm3, %v8346_v34, 0.0  ;;  %v4724_v55 = vsel %vm4704_vm10, %v8321_v3, 0.0  ;;  %6636 = vmatprep.subr.bf16.mxu1 %v6942_v43 }
 0x6c7   : > { %v4699_v20 = vsel %vm4679_vm13, %v4673_v11, 0.0  ;;  %v4745_v45 = vsel %vm4719_vm4, %v4673_v11, 0.0  ;;  %v4725_v27 = vadd.f32 %v4723_v28, %v4721_v12  ;;  %v4750_v1 = vadd.f32 %v4748_v21, %v4746_v31 }
 0x6c8   : > { %v4701_v23 = vadd.f32 %v4699_v20, %v4697_v61  ;;  %v4749_v24 = vadd.f32 %v4747_v38, %v4745_v45  ;;  %v4726_v60 = vadd.f32 %v4724_v55, %v4722_v41  ;;  %v4727_v18 = vsel %vm4691_vm15, %v4673_v11, 0.0 }
 0x6c9   : > { %v4728_v39 = vsel %vm4692_vm12, %v8333_v22, 0.0  ;;  %v4729_v40 = vadd.f32 %v4727_v18, %v4725_v27  ;;  %v4731_v51 = vsel %vm4683_vm14, %v8313_v10, 0.0  ;;  %v4732_v52 = vsel %vm4684_vm11, %v8302_v47, 0.0 }
 0x6ca   : > { %v6702_v46 = vpack.i.bf16 %v4702_v50, %v4701_v23  ;;  %v6712_v56 = vpack.i.bf16 %v4750_v1, %v4749_v24  ;;  %v4730_v49 = vadd.f32 %v4728_v39, %v4726_v60  ;;  %v4685_v37 = vsel %vm4683_vm14, %v4651_v42, 0.0 }
 0x6cb   : > { %v4733_v14 = vadd.f32 %v4731_v51, %v4729_v40  ;;  %v4686_v36 = vsel %vm4684_vm11, %v8304_v48, 0.0  ;;  %v4687_v57 = vsel %vm4679_vm13, %v8346_v34, 0.0  ;;  %v4688_v5 = vsel %vm4680_vm9, %v8321_v3, 0.0 }
 0x6cc   : > { %6703 = vrot.lane.b32.xlu1 %v6702_v46, %s6943_s19  ;;  %v4734_v6 = vadd.f32 %v4732_v52, %v4730_v49  ;;  %v4689_v54 = vadd.f32 %v4687_v57, %v4685_v37  ;;  %v4690_v59 = vadd.f32 %v4688_v5, %v4686_v36  ;;  %v4707_v42 = vsel %vm4691_vm15, %v8346_v34, 0.0  ;;  %v6863_v57 = vld [vmem:[%s8597_s7 + $0x110] sm:$0xff]  }
 0x6cd   : > { %v4708_v48 = vsel %vm4692_vm12, %v8321_v3, 0.0  ;;  %v4709_v26 = vadd.f32 %v4707_v42, %v4705_v13  ;;  %v4711_v63 = vsel %vm4683_vm14, %v4673_v11, 0.0  ;;  %v4712_v44 = vsel %vm4684_vm11, %v8333_v22, 0.0 }
 0x6ce   : > { %v6717_v4 = vpack.i.bf16 %v4734_v6, %v4733_v14  ;;  %v4710_v17 = vadd.f32 %v4708_v48, %v8331_v9  ;;  %v4715_v38 = vsel %vm4679_vm13, %v8313_v10, 0.0  ;;  %v4716_v32 = vsel %vm4680_vm9, %v8302_v47, 0.0  ;;  %v6864_v48 = vld [vmem:[%s8597_s7 + $0x108] sm:$0xff]  }
 0x6cf   : > { %v4713_v58 = vadd.f32 %v4711_v63, %v4709_v26  ;;  %v4735_v25 = vsel %vm4719_vm4, %v8346_v34, 0.0  ;;  %v4736_v9 = vsel %vm4720_vm2, %v8321_v3, 0.0  ;;  %v4737_v29 = vsel %vm4703_vm3, %v4673_v11, 0.0  ;;  %v6865_v26 = vld [vmem:[%s8597_s7 + $0x100] sm:$0xff]   ;;  %v6866_v63 = vld [vmem:[%s8600_s10 + $0x18] sm:$0xff]  }
 0x6d0   : > { %6713 = vrot.lane.b32.xlu1 %v6712_v56, %s6943_s19  ;;  %v4714_v13 = vadd.f32 %v4712_v44, %v4710_v17  ;;  %v4738_v30 = vsel %vm4704_vm10, %v8333_v22, 0.0  ;;  %v4739_v15 = vadd.f32 %v4737_v29, %v4735_v25  ;;  %v4741_v62 = vsel %vm4691_vm15, %v8313_v10, 0.0  ;;  %v6867_v44 = vld [vmem:[%s8600_s10 + $0x10] sm:$0xff]   ;;  %v6869_v17 = vld [vmem:[%s8600_s10] sm:$0xff]  }
 0x6d1   : > { %v4717_v34 = vadd.f32 %v4715_v38, %v4713_v58  ;;  %v4740_v31 = vadd.f32 %v4738_v30, %v4736_v9  ;;  %v4742_v3 = vsel %vm4692_vm12, %v8302_v47, 0.0  ;;  %v8465_v11 = vsel %vm4719_vm4, %v8313_v10, 0.0 }
 0x6d2   : > { %v4718_v61 = vadd.f32 %v4716_v32, %v4714_v13  ;;  %v4743_v50 = vadd.f32 %v4741_v62, %v4739_v15  ;;  %v4752_v22 = vsel %vm4720_vm2, %v8302_v47, 0.0  ;;  %v5863_v20 = vmul.f32 -1.442695, %v8262_v2 }
 0x6d3   : > { %v4744_v21 = vadd.f32 %v4742_v3, %v4740_v31  ;;  %v4797_v12 = vpack.c.bf16 %v4752_v22, %v8465_v11  ;;  %v5862_v45 = vmul.f32 -1.442695, %v8265_v19 }
 0x6d4   : > { %6718 = vrot.lane.b32.xlu1 %v6717_v4, %s6943_s19  ;;  %6918 = vpow2.f32 %v5863_v20  ;;  %v6868_v4 = vld [vmem:[%s8600_s10 + $0x8] sm:$0xff]  }
 0x6d5   : > { %6920 = vpow2.f32 %v5862_v45 }
 0x6e1   : > { %v6919_v0 = vpop.eup %6918 }
 0x6e2   : > { %v6921_v10 = vpop.eup %6920  ;;  %v4606_v41 = vadd.f32 1.0, %v6919_v0 }
 0x6e3   : > { %v4605_v28 = vadd.f32 1.0, %v6921_v10 }
 0x6e4   : > { %6922 = vrcp.f32 %v4606_v41 }
 0x6e5   : > { %6924 = vrcp.f32 %v4605_v28 }
 0x6f1   : > { %v6923_v33 = vpop.eup %6922 }
 0x6f2   : > { %v6925_v16 = vpop.eup %6924  ;;  %v4612_v23 = vmul.f32 %v6923_v33, %v8262_v2  ;;  %v6860_v2 = vld [vmem:[%s8597_s7 + $0x118] sm:$0xff]  }
 0x6f3   : > { %v4611_v27 = vmul.f32 %v6925_v16, %v8265_v19  ;;  %v6870_v33 = vld [vmem:[%s8602_s12 + $0x38] sm:$0xff]   ;;  %v6873_v16 = vld [vmem:[%s8602_s12 + $0x20] sm:$0xff]  }
 0x738   : > { %v6709_v47 = vpop.permute.xlu0 %6708 }
 0x739   : > { %v6711_v24 = vunpack.i.h.bf16 %v6709_v47  ;;  %v6710_v55 = vunpack.i.l.bf16 %v6709_v47  ;;  %v6874_v47 = vld [vmem:[%s8602_s12 + $0x18] sm:$0xff]  }
 0x73b   : > { %v4786_v1 = vsel %vm727_vm0, %v4612_v23, %v6711_v24  ;;  %v4785_v60 = vsel %vm727_vm0, %v4611_v27, %v6710_v55  ;;  %v6875_v23 = vld [vmem:[%s8602_s12 + $0x10] sm:$0xff]   ;;  %v6876_v24 = vld [vmem:[%s8602_s12 + $0x8] sm:$0xff]   ;;  %v6877_v55 = vld [vmem:[%s8602_s12] sm:$0xff]  }
 0x73c   : > { %v4793_v18 = vpack.c.bf16 %v4786_v1, %v4785_v60 }
 0x73e   : > { %v6704_v39 = vpop.permute.xlu1 %6703 }
 0x73f   : > { %v6706_v46 = vunpack.i.h.bf16 %v6704_v39  ;;  %v6705_v40 = vunpack.i.l.bf16 %v6704_v39 }
 0x741   : > { %v4787_v51 = vsel %vm727_vm0, %v4689_v54, %v6705_v40  ;;  %v4788_v53 = vsel %vm727_vm0, %v4690_v59, %v6706_v46 }
 0x742   : > { %v6714_v56 = vpop.permute.xlu1 %6713  ;;  %v4794_v49 = vpack.c.bf16 %v4788_v53, %v4787_v51 }
 0x743   : > { %v6716_v52 = vunpack.i.h.bf16 %v6714_v56  ;;  %v6715_v19 = vunpack.i.l.bf16 %v6714_v56 }
 0x744   : > { %5121 = vmatprep.mubr.bf16.mxu0 %v4794_v49  ;;  %v5905_v49 = vld [vmem:[%s8601_s11] ss:$0 sm:$0xff] }
 0x745   : > { %5122 = vmatmul.mubr.bf16.vlgmr.msra.gmra.mxu0 %v4793_v18  ;;  %v4791_v37 = vsel %vm727_vm0, %v4743_v50, %v6715_v19  ;;  %v4792_v35 = vsel %vm727_vm0, %v4744_v21, %v6716_v52 }
 0x746   : > { %6625 = vmatpush3.bf16.msra.mxu0 %v6860_v2  ;;  %v6719_v14 = vpop.permute.xlu1 %6718  ;;  %v4796_v36 = vpack.c.bf16 %v4792_v35, %v4791_v37  ;;  %6632 = vmatprep.mubr.msk.bf16.mxu0 %vm6944_vm1, %v6942_v43 }
 0x747   : > { %v6721_v5 = vunpack.i.h.bf16 %v6719_v14  ;;  %v6720_v6 = vunpack.i.l.bf16 %v6719_v14  ;;  %6626 = vmatprep.subr.bf16.mxu0 %v6942_v43 }
 0x748   : > { %5162 = vmatprep.mubr.bf16.mxu1 %v4796_v36 }
 0x749   : > { %v4790_v54 = vsel %vm727_vm0, %v4718_v61, %v6721_v5  ;;  %v4789_v59 = vsel %vm727_vm0, %v4717_v34, %v6720_v6 }
 0x74a   : > { %v4795_v42 = vpack.c.bf16 %v4790_v54, %v4789_v59  ;;  %6627 = vmatpush3.bf16.msra.mxu0 %v6863_v57 }
 0x74b   : > { %6628 = vmatprep.subr.bf16.mxu0 %v6942_v43 }
 0x74c   : > { %5163 = vmatmul.mubr.bf16.vlgmr.msra.gmra.mxu1 %v4795_v42 }
 0x74d   : > { %6644 = vmatprep.mubr.msk.bf16.mxu1 %vm6944_vm1, %v6942_v43  ;;  %6637 = vmatpush3.bf16.msra.mxu1 %v6866_v63 }
 0x74e   : > { %6629 = vmatpush3.bf16.msra.mxu0 %v6864_v48  ;;  %6638 = vmatprep.subr.bf16.mxu1 %v6942_v43 }
 0x74f   : > { %6630 = vmatprep.subr.bf16.mxu0 %v6942_v43 }
 0x751   : > { %6639 = vmatpush3.bf16.msra.mxu1 %v6867_v44 }
 0x752   : > { %6631 = vmatpush3.bf16.msra.mxu0 %v6865_v26  ;;  %6640 = vmatprep.subr.bf16.mxu1 %v6942_v43 }
 0x753   : > { %6648 = vmatprep.subr.bf16.mxu0 %v6942_v43 }
 0x755   : > { %6633 = vmatmul.mubr.msk.bf16.vlgmr.msra.gmra.mxu0 %vm727_vm0, %v4797_v12  ;;  %6641 = vmatpush3.bf16.msra.mxu1 %v6868_v4  ;;  %v5903_v4 = vld [vmem:[%s8598_s8] ss:$0 sm:$0xff] }
 0x756   : > { %6664 = vmatprep.mubr.msk.bf16.mxu0 %vm6944_vm1, %v6942_v43  ;;  %6642 = vmatprep.subr.bf16.mxu1 %v6942_v43 }
 0x757   : > { %6649 = vmatpush3.bf16.msra.mxu0 %v6870_v33 }
 0x758   : > { %6650 = vmatprep.subr.bf16.mxu0 %v6942_v43 }
 0x759   : > { %6643 = vmatpush3.bf16.msra.mxu1 %v6869_v17 }
 0x805   : > { %v6265_v38 = vpop.f32.mrf.mxu0 }
 0x807   : > { %v6266_v32 = vpop.f32.mrf.mxu0 }
 0x808   : > { %v6267_v30 = vadd.f32 %v6266_v32, %v6265_v38  ;;  %v5911_v32 = vld [vmem:[%s8603_s13] ss:$0 sm:$0xff] }
 0x809   : > { %v6268_v9 = vpop.f32.mrf.mxu0 }
 0x80b   : > { %v6269_v62 = vpop.f32.mrf.mxu0 }
 0x80c   : > { %v6287_v58 = vpop.f32.mrf.mxu1  ;;  %v6270_v11 = vadd.f32 %v6269_v62, %v6268_v9 }
 0x80e   : > { %v6288_v25 = vpop.f32.mrf.mxu1 }
 0x80f   : > { %v6289_v29 = vadd.f32 %v6288_v25, %v6287_v58  ;;  %v5904_v58 = vld [vmem:[%s8599_s9] ss:$0 sm:$0xff] }
 0x810   : > { %v6290_v13 = vpop.f32.mrf.mxu1 }
 0x811   : > { %v5165_v31 = vadd.f32 %v6289_v29, %v6267_v30 }
 0x812   : > { %v6291_v15 = vpop.f32.mrf.mxu1 }
 0x813   : > { %v6292_v34 = vadd.f32 %v6291_v15, %v6290_v13 }
 0x815   : > { %v5205_v3 = vpop.f32.mrf.mxu0  ;;  %v5168_v22 = vadd.f32 %v6292_v34, %v6270_v11 }
 0x816   : > { %v5206_v61 = vadd.f32 %v5205_v3, %v5165_v31 }
 0x817   : > { %v6634_v50 = vpop.f32.mrf.mxu0 }
 0x818   : > { %v5214_v21 = vadd.f32 %v7067_v7, %v5206_v61  ;;  %v6871_v7 = vld [vmem:[%s8602_s12 + $0x30] sm:$0xff]  }
 0x819   : > { %v5208_v12 = vpop.f32.mrf.mxu0  ;;  %6651 = vmatpush3.bf16.msra.mxu0 %v6871_v7 }
 0x81a   : > { %v5209_v20 = vadd.f32 %v5208_v12, %v5168_v22  ;;  %v5216_v45 = vsel %vm727_vm0, %v5214_v21, 0.0  ;;  %6652 = vmatprep.subr.bf16.mxu0 %v6942_v43 }
 0x81b   : > { %v6635_v0 = vpop.f32.mrf.mxu0  ;;  %5217 = vadd.xlane.f32.xlu0 %v5216_v45 }
 0x81c   : > { %v5259_v10 = vpack.c.bf16 %v5209_v20, %v5206_v61  ;;  %v5215_v41 = vadd.f32 %v7069_v8, %v5209_v20  ;;  %v6872_v8 = vld [vmem:[%s8602_s12 + $0x28] sm:$0xff]  }
 0x81d   : > { %6653 = vmatpush3.bf16.msra.mxu0 %v6872_v8 }
 0x81e   : > { %6645 = vmatmul.mubr.msk.bf16.vlgmr.msra.gmra.mxu1 %vm727_vm0, %v5259_v10  ;;  %v5219_v28 = vsel %vm727_vm0, %v5215_v41, 0.0  ;;  %6654 = vmatprep.subr.bf16.mxu0 %v6942_v43 }
 0x81f   : > { %5220 = vadd.xlane.f32.xlu1 %v5219_v28 }
 0x821   : > { %6655 = vmatpush3.bf16.msra.mxu0 %v6873_v16 }
 0x822   : > { %6656 = vmatprep.subr.bf16.mxu0 %v6942_v43 }
 0x825   : > { %6657 = vmatpush3.bf16.msra.mxu0 %v6874_v47 }
 0x826   : > { %6658 = vmatprep.subr.bf16.mxu0 %v6942_v43 }
 0x829   : > { %6659 = vmatpush3.bf16.msra.mxu0 %v6875_v23 }
 0x82a   : > { %6660 = vmatprep.subr.bf16.mxu0 %v6942_v43 }
 0x82d   : > { %6661 = vmatpush3.bf16.msra.mxu0 %v6876_v24 }
 0x82e   : > { %6662 = vmatprep.subr.bf16.mxu0 %v6942_v43 }
 0x831   : > { %6663 = vmatpush3.bf16.msra.mxu0 %v6877_v55 }
 0x8a4   : > { %v5218_v27 = vpop.xlane.xlu0 %5217 }
 0x8a5   : > { %v5223_v1 = vmul.f32 0.015625, %v5218_v27  ;;  %v5920_v27 = vld [vmem:[%s8604_s14] ss:$0 sm:$0xff] }
 0x8a7   : > { %v5225_v60 = vsub.f32 %v5214_v21, %v5223_v1 }
 0x8a8   : > { %v5221_v18 = vpop.xlane.xlu1 %5220 }
 0x8a9   : > { %v5224_v39 = vmul.f32 0.015625, %v5221_v18  ;;  %v5227_v46 = vmul.f32 %v5225_v60, %v5225_v60 }
 0x8ab   : > { %v5226_v40 = vsub.f32 %v5215_v41, %v5224_v39  ;;  %v5229_v51 = vsel %vm727_vm0, %v5227_v46, 0.0 }
 0x8ac   : > { %5230 = vadd.xlane.f32.xlu0 %v5229_v51 }
 0x8ad   : > { %v5228_v53 = vmul.f32 %v5226_v40, %v5226_v40 }
 0x8af   : > { %v5232_v56 = vsel %vm727_vm0, %v5228_v53, 0.0 }
 0x8b0   : > { %5233 = vadd.xlane.f32.xlu0 %v5232_v56 }
 0x8de   : > { %v5336_v43 = vpop.f32.mrf.mxu1 }
 0x8df   : > { %v5337_v52 = vadd.f32 %v5905_v49, %v5336_v43 }
 0x8e0   : > { %v6646_v2 = vpop.f32.mrf.mxu1 }
 0x8e1   : > { %v5343_v14 = vmax.f32 %v5337_v52, 0.0 }
 0x8e2   : > { %v5339_v19 = vpop.f32.mrf.mxu1 }
 0x8e3   : > { %v5340_v37 = vadd.f32 %v5905_v49, %v5339_v19 }
 0x8e4   : > { %v6647_v35 = vpop.f32.mrf.mxu1 }
 0x8e5   : > { %v5344_v36 = vmax.f32 %v5340_v37, 0.0 }
 0x8e7   : > { %v5345_v57 = vpack.c.bf16 %v5344_v36, %v5343_v14 }
 0x8e9   : > { %6665 = vmatmul.mubr.bf16.vlgmr.msra.gmra.mxu0 %v5345_v57 }
 0x935   : > { %v5231_v5 = vpop.xlane.xlu0 %5230 }
 0x936   : > { %v5235_v6 = vmul.f32 0.015625, %v5231_v5 }
 0x938   : > { %v5237_v59 = vadd.f32 1e-05, %v5235_v6 }
 0x939   : > { %v5234_v54 = vpop.xlane.xlu0 %5233 }
 0x93a   : > { %v5236_v42 = vmul.f32 0.015625, %v5234_v54  ;;  %6926 = vrsqrt.f32 %v5237_v59 }
 0x93c   : > { %v5238_v48 = vadd.f32 1e-05, %v5236_v42 }
 0x93e   : > { %6928 = vrsqrt.f32 %v5238_v48 }
 0x947   : > { %v6927_v26 = vpop.eup %6926 }
 0x948   : > { %v5241_v63 = vmul.f32 %v6927_v26, %v5225_v60  ;;  %v5921_v60 = vld [vmem:[%s8605_s15] ss:$0 sm:$0xff] }
 0x94a   : > { %v5249_v17 = vmul.f32 %v5903_v4, %v5241_v63 }
 0x94b   : > { %v6929_v44 = vpop.eup %6928 }
 0x94c   : > { %v5242_v38 = vmul.f32 %v6929_v44, %v5226_v40  ;;  %v5257_v29 = vadd.f32 %v5904_v58, %v5249_v17 }
 0x94e   : > { %v5250_v13 = vmul.f32 %v5903_v4, %v5242_v38 }
 0x950   : > { %v5258_v3 = vadd.f32 %v5904_v58, %v5250_v13 }
 0x9a9   : > { %v5451_v25 = vpop.f32.mrf.mxu0 }
 0x9aa   : > { %v5452_v9 = vadd.f32 %v5911_v32, %v5451_v25 }
 0x9ab   : > { %v6666_v30 = vpop.f32.mrf.mxu0 }
 0x9ac   : > { %v5460_v15 = vadd.f32 %v5452_v9, %v5257_v29 }
 0x9ad   : > { %v5454_v62 = vpop.f32.mrf.mxu0 }
 0x9ae   : > { %v5455_v34 = vadd.f32 %v5911_v32, %v5454_v62  ;;  %v5462_v31 = vsel %vm727_vm0, %v5460_v15, 0.0 }
 0x9af   : > { %v6667_v11 = vpop.f32.mrf.mxu0  ;;  %5463 = vadd.xlane.f32.xlu1 %v5462_v31 }
 0x9b0   : > { %v5461_v61 = vadd.f32 %v5455_v34, %v5258_v3 }
 0x9b2   : > { %v5465_v50 = vsel %vm727_vm0, %v5461_v61, 0.0 }
 0x9b3   : > { %5466 = vadd.xlane.f32.xlu0 %v5465_v50 }
 0xa38   : > { %v5464_v22 = vpop.xlane.xlu1 %5463 }
 0xa39   : > { %v5468_v21 = vmul.f32 0.015625, %v5464_v22 }
 0xa3b   : > { %v5470_v12 = vsub.f32 %v5460_v15, %v5468_v21 }
 0xa3c   : > { %v5467_v20 = vpop.xlane.xlu0 %5466 }
 0xa3d   : > { %v5469_v45 = vmul.f32 0.015625, %v5467_v20  ;;  %v5472_v0 = vmul.f32 %v5470_v12, %v5470_v12 }
 0xa3f   : > { %v5471_v10 = vsub.f32 %v5461_v61, %v5469_v45  ;;  %v5474_v41 = vsel %vm727_vm0, %v5472_v0, 0.0 }
 0xa40   : > { %5475 = vadd.xlane.f32.xlu1 %v5474_v41 }
 0xa41   : > { %v5473_v28 = vmul.f32 %v5471_v10, %v5471_v10 }
 0xa43   : > { %v5477_v33 = vsel %vm727_vm0, %v5473_v28, 0.0  ;;  %vm5512_vm0 = vcmask 519168  }
 0xa44   : > { %5478 = vadd.xlane.f32.xlu0 %v5477_v33 }
 0xac9   : > { %v5476_v7 = vpop.xlane.xlu1 %5475 }
 0xaca   : > { %v5480_v8 = vmul.f32 0.015625, %v5476_v7 }
 0xacc   : > { %v5482_v16 = vadd.f32 1e-05, %v5480_v8 }
 0xacd   : > { %v5479_v47 = vpop.xlane.xlu0 %5478 }
 0xace   : > { %6930 = vrsqrt.f32 %v5482_v16  ;;  %v5481_v23 = vmul.f32 0.015625, %v5479_v47 }
 0xad0   : > { %v5483_v24 = vadd.f32 1e-05, %v5481_v23 }
 0xad2   : > { %6932 = vrsqrt.f32 %v5483_v24 }
 0xadb   : > { %v6931_v55 = vpop.eup %6930 }
 0xadc   : > { %v5486_v1 = vmul.f32 %v6931_v55, %v5470_v12 }
 0xade   : > { %v5494_v18 = vmul.f32 %v5920_v27, %v5486_v1 }
 0xadf   : > { %v6933_v39 = vpop.eup %6932 }
 0xae0   : > { %v5502_v46 = vadd.f32 %v5921_v60, %v5494_v18  ;;  %v5487_v40 = vmul.f32 %v6933_v39, %v5471_v10 }
 0xae2   : > { %v5928_v51 = vpack.c.bf16 %v5502_v46, %v5502_v46  ;;  %v5495_v53 = vmul.f32 %v5920_v27, %v5487_v40 }
 0xae4   : > { %5513 = vst.msk [vmem:[%s535_s23] sm:$0xf] %vm5512_vm0, %v5928_v51  ;;  %v5503_v56 = vadd.f32 %v5921_v60, %v5495_v53 }
 0xae6   : > { %v5929_v49 = vpack.c.bf16 %v5503_v56, %v5503_v56 }
 0xae8   : > { %5514 = vst.msk [vmem:[%s535_s23 + $0x4] sm:$0xf] %vm5512_vm0, %v5929_v49 }
 0xae9 PF: > { %s26_s21 = sadd.s32 1, %s6940_s21  }
 0xaea   : > { %p23_p4 = scmp.ge.s32.totalorder %s26_s21, 4  }
 0xaec   :  { %25 = sbr.rel (!%p23_p4) target bundleno = 2 (0x2), region = 123 }

</bundles_post_ra>
